<compile_context>
chip_gen: v7x
topology: tpu7x:2x2x1
jax: 0.10.0
libtpu: 0.0.40
codegen_flags: <defaults>
</compile_context>

<pallas_src>
import functools

import jax
import jax.numpy as jnp
from jax.experimental import pallas as pl
from jax.experimental.pallas import tpu as pltpu


def _round_up(x, m):
    return ((x + m - 1) // m) * m


# ----------------------------------------------------------------------------
# Pallas kernel 1: tiled matmul + bias + activation (the hot path)
# ----------------------------------------------------------------------------
def _matmul_kernel(x_ref, w_ref, b_ref, o_ref, acc_ref, *, act):
    k = pl.program_id(1)

    @pl.when(k == 0)
    def _():
        acc_ref[...] = jnp.zeros_like(acc_ref)

    acc_ref[...] += jnp.dot(x_ref[...], w_ref[...],
                            preferred_element_type=jnp.float32)

    @pl.when(k == pl.num_programs(1) - 1)
    def _():
        acc = acc_ref[...] + b_ref[...]          # (TM, Np) + (1, Np)
        if act == "relu":
            acc = jnp.maximum(acc, 0.0)
        elif act == "sigmoid":
            acc = jax.nn.sigmoid(acc)
        o_ref[...] = acc.astype(o_ref.dtype)


def matmul_bias_act(x, w, b, act="none", *, out_dtype=jnp.float32,
                    tm=256, tk=512):
    """y = act(x @ w + b).  x:(M,K) w:(K,N) b:(N,).  bf16 operands, f32 acc."""
    M, K = x.shape
    K2, N = w.shape
    assert K == K2 and b.shape == (N,)

    TM = min(tm, _round_up(M, 8))
    Mp = _round_up(M, TM)
    TK = min(tk, _round_up(K, 128))
    Kp = _round_up(K, TK)
    Np = _round_up(N, 128)                       # lane-dense output stores

    xp = jnp.pad(x.astype(jnp.bfloat16), ((0, Mp - M), (0, Kp - K)))
    wp = jnp.pad(w.astype(jnp.bfloat16), ((0, Kp - K), (0, Np - N)))
    bp = jnp.pad(b.astype(jnp.float32), ((0, Np - N),)).reshape(1, Np)

    grid = (Mp // TM, Kp // TK)
    cost = pl.CostEstimate(
        flops=2 * Mp * Np * Kp,
        transcendentals=Mp * Np if act == "sigmoid" else 0,
        bytes_accessed=(Mp * Kp + Kp * Np) * 2 + Mp * Np * 4 + Np * 4)

    out = pl.pallas_call(
        functools.partial(_matmul_kernel, act=act),
        out_shape=jax.ShapeDtypeStruct((Mp, Np), out_dtype),
        grid=grid,
        in_specs=[
            pl.BlockSpec((TM, TK), lambda i, k: (i, k)),
            pl.BlockSpec((TK, Np), lambda i, k: (k, 0)),
            pl.BlockSpec((1, Np), lambda i, k: (0, 0)),
        ],
        out_specs=pl.BlockSpec((TM, Np), lambda i, k: (i, 0)),
        scratch_shapes=[pltpu.VMEM((TM, Np), jnp.float32)],
        compiler_params=pltpu.CompilerParams(
            dimension_semantics=("parallel", "arbitrary"),
            vmem_limit_bytes=32 * 1024 * 1024),
        cost_estimate=cost,
    )(xp, wp, bp)
    return out[:M, :N]


# ----------------------------------------------------------------------------
# Pallas kernel 2: fused fc_mu + fc_log_var + reparameterization
# ----------------------------------------------------------------------------
def _heads_kernel(h_ref, w_ref, b_ref, eps_ref, mu_ref, lv_ref, z_ref, *,
                  latent):
    acc = jnp.dot(h_ref[...], w_ref[...],
                  preferred_element_type=jnp.float32) + b_ref[...]
    mu = acc[:, :latent]
    lv = acc[:, latent:2 * latent]
    mu_ref[...] = mu
    lv_ref[...] = lv
    z_ref[...] = mu + eps_ref[...] * jnp.exp(0.5 * lv)


def fused_heads(h, w_cat, b_cat, eps, latent):
    """mu = h@Wmu+bmu, log_var = h@Wlv+blv, z = mu + eps*exp(0.5*log_var)."""
    B, F = h.shape
    N2 = 2 * latent
    assert w_cat.shape == (F, N2) and b_cat.shape == (N2,)
    out_shape = (jax.ShapeDtypeStruct((B, latent), jnp.float32),) * 3
    return pl.pallas_call(
        functools.partial(_heads_kernel, latent=latent),
        out_shape=out_shape,
        grid=(1,),
        in_specs=[
            pl.BlockSpec((B, F), lambda i: (0, 0)),
            pl.BlockSpec((F, N2), lambda i: (0, 0)),
            pl.BlockSpec((1, N2), lambda i: (0, 0)),
            pl.BlockSpec((B, latent), lambda i: (0, 0)),
        ],
        out_specs=(pl.BlockSpec((B, latent), lambda i: (0, 0)),) * 3,
        compiler_params=pltpu.CompilerParams(
            dimension_semantics=("arbitrary",),
            vmem_limit_bytes=32 * 1024 * 1024),
    )(h.astype(jnp.bfloat16), w_cat.astype(jnp.bfloat16),
      b_cat.astype(jnp.float32).reshape(1, N2), eps.astype(jnp.float32))


# ----------------------------------------------------------------------------
# JAX glue: conv / conv-transpose lowered onto the Pallas matmul kernel
# ----------------------------------------------------------------------------
def _im2col(x_nhwc, k, stride, pad_lo, pad_hi):
    """x:(B,H,W,C) -> patches (B*Ho*Wo, k*k*C) ordered (kh, kw, C)."""
    xp = jnp.pad(x_nhwc, ((0, 0), (pad_lo, pad_hi), (pad_lo, pad_hi), (0, 0)))
    B, Hp, Wp, C = xp.shape
    Ho = (Hp - k) // stride + 1
    Wo = (Wp - k) // stride + 1
    cols = []
    for i in range(k):
        for j in range(k):
            cols.append(xp[:, i:i + stride * Ho:stride, j:j + stride * Wo:stride, :])
    patches = jnp.stack(cols, axis=3)            # (B, Ho, Wo, k*k, C)
    return patches.reshape(B * Ho * Wo, k * k * C), (B, Ho, Wo)


def conv2d_im2col(x_nhwc, wm, b, stride, pad, act, out_dtype=jnp.float32):
    """Conv2d with pre-laid-out matmul weight wm:(9*I, O) on NHWC activations."""
    # TODO(synk): fold the 9-tap patch extraction into the Pallas kernel
    # (tap-accumulation over a kh*kw grid axis) to avoid the k*k HBM expansion.
    cols, (B, Ho, Wo) = _im2col(x_nhwc, 3, stride, pad, pad)
    O = wm.shape[1]
    out = matmul_bias_act(cols, wm, b, act, out_dtype=out_dtype)
    return out.reshape(B, Ho, Wo, O)


def conv_transpose2d_phase(x_nhwc, w4, b4, act, out_dtype=jnp.float32):
    """ConvTranspose2d(k=3,s=2,p=1,op=1) via sub-pixel phase decomposition.

    out[:, 2i+a, 2j+b, :] is a linear map of x[:, i(+1), j(+1), :]; the 4
    phases are computed as one matmul against a (4C, 4O) block weight.
    """
    B, H, W, C = x_nhwc.shape
    O = w4.shape[1] // 4
    xp = jnp.pad(x_nhwc, ((0, 0), (0, 1), (0, 1), (0, 0)))
    x4 = jnp.concatenate([
        xp[:, :H, :W, :],       # shift (0, 0)
        xp[:, :H, 1:, :],       # shift (0, +1)
        xp[:, 1:, :W, :],       # shift (+1, 0)
        xp[:, 1:, 1:, :],       # shift (+1, +1)
    ], axis=-1).reshape(B * H * W, 4 * C)
    out = matmul_bias_act(x4, w4, b4, act, out_dtype=out_dtype)  # (B*H*W, 4*O)
    out = out.reshape(B, H, W, 2, 2, O)                          # (a, b) phases
    out = jnp.transpose(out, (0, 1, 3, 2, 4, 5)).reshape(B, 2 * H, 2 * W, O)
    return out


def _deconv_phase_weight(w_iohw):
    """torch ConvTranspose2d weight (I, O, 3, 3) -> phase block weight (4I, 4O)."""
    I, O = w_iohw.shape[0], w_iohw.shape[1]
    Z = jnp.zeros((I, O), w_iohw.dtype)
    # taps[(shift, phase)] = (kh, kw) kernel tap contributing to that phase.
    taps = {
        ((0, 0), (0, 0)): (1, 1),
        ((0, 0), (0, 1)): (1, 2), ((0, 1), (0, 1)): (1, 0),
        ((0, 0), (1, 0)): (2, 1), ((1, 0), (1, 0)): (0, 1),
        ((0, 0), (1, 1)): (2, 2), ((0, 1), (1, 1)): (2, 0),
        ((1, 0), (1, 1)): (0, 2), ((1, 1), (1, 1)): (0, 0),
    }
    order = [(0, 0), (0, 1), (1, 0), (1, 1)]
    rows = []
    for s in order:
        blocks = []
        for p in order:
            tap = taps.get((s, p))
            blocks.append(w_iohw[:, :, tap[0], tap[1]] if tap is not None else Z)
        rows.append(jnp.concatenate(blocks, axis=1))     # (I, 4O)
    return jnp.concatenate(rows, axis=0)                 # (4I, 4O)


# ----------------------------------------------------------------------------
# Parameters (deterministic init, all layouts pre-computed) and forward pass
# ----------------------------------------------------------------------------
def init_vae_params(key, image_size, input_dim, conv_dims, fc_dim, latent_dim):
    def uni(k, shape, fan_in):
        bound = 1.0 / (fan_in ** 0.5)
        return jax.random.uniform(k, shape, jnp.float32, -bound, bound)

    keys = iter(jax.random.split(key, 64))
    params = {}

    # Encoder convs: torch Conv2d weight (O, I, 3, 3) -> matmul layout (9*I, O).
    enc_convs = []
    prev = input_dim
    for cd in conv_dims:
        w = uni(next(keys), (cd, prev, 3, 3), prev * 9)
        b = uni(next(keys), (cd,), prev * 9)
        wm = jnp.transpose(w, (2, 3, 1, 0)).reshape(9 * prev, cd).astype(jnp.bfloat16)
        enc_convs.append((wm, b))
        prev = cd
    params["enc_convs"] = enc_convs

    conv_size = image_size // (2 ** len(conv_dims))
    C_last = conv_dims[-1]
    flat = conv_size * conv_size * C_last

    # enc_fc: torch Linear(flat, fc_dim); rows permuted (c,h,w) -> (h,w,c) so
    # the NHWC flatten needs no runtime transpose.
    w = uni(next(keys), (flat, fc_dim), flat)
    b = uni(next(keys), (fc_dim,), flat)
    w = (w.reshape(C_last, conv_size, conv_size, fc_dim)
           .transpose(1, 2, 0, 3).reshape(flat, fc_dim))
    params["enc_fc"] = (w.astype(jnp.bfloat16), b)

    # Fused mu / log_var heads: (fc_dim, 2*latent), lane-dense N = 128.
    w_mu = uni(next(keys), (fc_dim, latent_dim), fc_dim)
    b_mu = uni(next(keys), (latent_dim,), fc_dim)
    w_lv = uni(next(keys), (fc_dim, latent_dim), fc_dim)
    b_lv = uni(next(keys), (latent_dim,), fc_dim)
    params["heads"] = (jnp.concatenate([w_mu, w_lv], axis=1).astype(jnp.bfloat16),
                       jnp.concatenate([b_mu, b_lv]))

    # dec_fc: torch Linear(latent, flat); columns + bias permuted (c,h,w)->(h,w,c)
    # so the decoder reshape can stay NHWC.
    w = uni(next(keys), (latent_dim, flat), latent_dim)
    b = uni(next(keys), (flat,), latent_dim)
    w = (w.reshape(latent_dim, C_last, conv_size, conv_size)
           .transpose(0, 2, 3, 1).reshape(latent_dim, flat))
    b = (b.reshape(C_last, conv_size, conv_size)
           .transpose(1, 2, 0).reshape(flat))
    params["dec_fc"] = (w.astype(jnp.bfloat16), b)

    # Decoder deconvs: torch ConvTranspose2d weight (I, O, 3, 3) -> (4I, 4O).
    dec_deconvs = []
    prev = C_last
    for cd in conv_dims[::-1]:
        w = uni(next(keys), (prev, cd, 3, 3), prev * 9)
        b = uni(next(keys), (cd,), prev * 9)
        dec_deconvs.append((_deconv_phase_weight(w).astype(jnp.bfloat16),
                            jnp.tile(b, 4)))
        prev = cd
    params["dec_deconvs"] = dec_deconvs

    # Prediction layer: Conv2d(prev, input_dim, 3, s=1, p=1).
    w = uni(next(keys), (input_dim, prev, 3, 3), prev * 9)
    b = uni(next(keys), (input_dim,), prev * 9)
    wm = jnp.transpose(w, (2, 3, 1, 0)).reshape(9 * prev, input_dim).astype(jnp.bfloat16)
    params["pred"] = (wm, b)
    return params, conv_size


def vae_forward(params, x_nchw, eps, conv_size, latent_dim):
    x = jnp.transpose(x_nchw, (0, 2, 3, 1))          # NCHW -> NHWC (API boundary)
    B = x.shape[0]

    # ---- Encoder ----
    for (wm, b) in params["enc_convs"]:
        x = conv2d_im2col(x, wm, b, stride=2, pad=1, act="relu",
                          out_dtype=jnp.bfloat16)
    x_flat = x.reshape(B, -1)                         # NHWC flatten (weights permuted)
    h = matmul_bias_act(x_flat, *params["enc_fc"], act="relu",
                        out_dtype=jnp.bfloat16)

    # ---- Fused mu / log_var / reparameterization ----
    mu, log_var, z = fused_heads(h, *params["heads"], eps, latent_dim)

    # ---- Decoder ----
    d = matmul_bias_act(z, *params["dec_fc"], act="relu",
                        out_dtype=jnp.bfloat16)
    d = d.reshape(B, conv_size, conv_size, -1)        # NHWC (weights/bias permuted)
    for (w4, b4) in params["dec_deconvs"]:
        d = conv_transpose2d_phase(d, w4, b4, act="relu",
                                   out_dtype=jnp.bfloat16)
    recon = conv2d_im2col(d, *params["pred"], stride=1, pad=1, act="sigmoid",
                          out_dtype=jnp.float32)
    recon = jnp.transpose(recon, (0, 3, 1, 2))        # back to NCHW
    return recon, mu, log_var


# ----------------------------------------------------------------------------
if __name__ == "__main__":
    # Module constants: conv_dims=[32,64], fc_dim=128, image_size=28, latent_dim=64
    image_size, input_dim = 28, 1
    conv_dims_, fc_dim_, latent_dim_ = [32, 64], 128, 64
    batch = 2

    key = jax.random.PRNGKey(0)
    k_param, k_x, k_eps = jax.random.split(key, 3)

    params, conv_size = init_vae_params(
        k_param, image_size, input_dim, conv_dims_, fc_dim_, latent_dim_)
    x = jax.random.uniform(k_x, (batch, input_dim, image_size, image_size), jnp.float32)
    # randn_like(std): supplied as a deterministic input (eps) instead of in-kernel RNG
    eps = jax.random.normal(k_eps, (batch, latent_dim_), jnp.float32)

    fwd = jax.jit(functools.partial(vae_forward, conv_size=conv_size,
                                    latent_dim=latent_dim_))
    recon, mu, log_var = fwd(params, x, eps)
    jax.block_until_ready((recon, mu, log_var))

    assert recon.shape == (batch, input_dim, image_size, image_size)
    assert mu.shape == (batch, latent_dim_) and log_var.shape == (batch, latent_dim_)
    assert bool(jnp.isfinite(recon).all()) and bool(jnp.isfinite(mu).all())
    print("KERNEL_OK")
</pallas_src>

<mosaic_0001>
module attributes {stable_mosaic.version = 11 : i64} {
  func.func @_matmul_kernel(%arg0: i32, %arg1: i32, %arg2: memref<256x128xbf16, #tpu.memory_space<vmem>>, %arg3: memref<128x128xbf16, #tpu.memory_space<vmem>>, %arg4: memref<1x128xf32, #tpu.memory_space<vmem>>, %arg5: memref<256x128xbf16, #tpu.memory_space<vmem>>, %arg6: memref<256x128xf32, #tpu.memory_space<vmem>>) attributes {dimension_semantics = [#tpu.dimension_semantics<parallel>, #tpu.dimension_semantics<arbitrary>], iteration_bounds = array<i64: 2, 1>, scalar_prefetch = 0 : i64, scratch_operands = 1 : i64, tpu.core_type = #tpu.core_type<tc>, window_params = [{transform_indices = @transform_0, window_bounds = array<i64: 256, 128>}, {transform_indices = @transform_1, window_bounds = array<i64: 128, 128>}, {pipeline_mode = #tpu.pipeline_mode<synchronous>, transform_indices = @transform_2, window_bounds = array<i64: 1, 128>}, {transform_indices = @transform_3, window_bounds = array<i64: 256, 128>}]} {
    %c0_i32 = arith.constant 0 : i32
    %0 = arith.cmpi eq, %arg1, %c0_i32 : i32
    %1 = arith.extui %0 : i1 to i32
    %c0_i32_0 = arith.constant 0 : i32
    %2 = arith.cmpi ne, %1, %c0_i32_0 : i32
    scf.if %2 {
      %cst_10 = arith.constant 0.000000e+00 : f32
      %12 = vector.broadcast %cst_10 : f32 to vector<256x128xf32>
      %c0_11 = arith.constant 0 : index
      %c0_12 = arith.constant 0 : index
      %13 = vector.load %arg6[%c0_11, %c0_12] : memref<256x128xf32, #tpu.memory_space<vmem>>, vector<256x128xf32>
      tpu.vector_store %arg6[%c0_11, %c0_12], %12 {strides = array<i32>} : memref<256x128xf32, #tpu.memory_space<vmem>>, vector<256x128xf32>,
    } else {
    }
    %c0 = arith.constant 0 : index
    %c0_1 = arith.constant 0 : index
    %3 = vector.load %arg6[%c0, %c0_1] : memref<256x128xf32, #tpu.memory_space<vmem>>, vector<256x128xf32>
    %c0_2 = arith.constant 0 : index
    %c0_3 = arith.constant 0 : index
    %4 = vector.load %arg2[%c0_2, %c0_3] : memref<256x128xbf16, #tpu.memory_space<vmem>>, vector<256x128xbf16>
    %c0_4 = arith.constant 0 : index
    %c0_5 = arith.constant 0 : index
    %5 = vector.load %arg3[%c0_4, %c0_5] : memref<128x128xbf16, #tpu.memory_space<vmem>>, vector<128x128xbf16>
    %cst = arith.constant dense<0.000000e+00> : vector<256x128xf32>
    %6 = tpu.matmul %4, %5, %cst {dimension_numbers = #tpu.dot_dimension_numbers<[1], [0], [0], [1], [0, 0, 1, 1], [], []>} : vector<256x128xbf16>, vector<128x128xbf16>, vector<256x128xf32> -> vector<256x128xf32>
    %7 = arith.addf %3, %6 : vector<256x128xf32>
    %c0_6 = arith.constant 0 : index
    %c0_7 = arith.constant 0 : index
    %8 = vector.load %arg6[%c0_6, %c0_7] : memref<256x128xf32, #tpu.memory_space<vmem>>, vector<256x128xf32>
    tpu.vector_store %arg6[%c0_6, %c0_7], %7 {strides = array<i32>} : memref<256x128xf32, #tpu.memory_space<vmem>>, vector<256x128xf32>,
    %c0_i32_8 = arith.constant 0 : i32
    %9 = arith.cmpi eq, %arg1, %c0_i32_8 : i32
    %10 = arith.extui %9 : i1 to i32
    %c0_i32_9 = arith.constant 0 : i32
    %11 = arith.cmpi ne, %10, %c0_i32_9 : i32
    scf.if %11 {
      %c0_10 = arith.constant 0 : index
      %c0_11 = arith.constant 0 : index
      %12 = vector.load %arg6[%c0_10, %c0_11] : memref<256x128xf32, #tpu.memory_space<vmem>>, vector<256x128xf32>
      %c0_12 = arith.constant 0 : index
      %c0_13 = arith.constant 0 : index
      %13 = vector.load %arg4[%c0_12, %c0_13] : memref<1x128xf32, #tpu.memory_space<vmem>>, vector<1x128xf32>
      %14 = vector.broadcast %13 : vector<1x128xf32> to vector<256x128xf32>
      %15 = arith.addf %12, %14 : vector<256x128xf32>
      %cst_14 = arith.constant 0.000000e+00 : f32
      %16 = vector.broadcast %cst_14 : f32 to vector<256x128xf32>
      %17 = arith.maximumf %15, %16 : vector<256x128xf32>
      %18 = arith.truncf %17 : vector<256x128xf32> to vector<256x128xbf16>
      %c0_15 = arith.constant 0 : index
      %c0_16 = arith.constant 0 : index
      %19 = vector.load %arg5[%c0_15, %c0_16] : memref<256x128xbf16, #tpu.memory_space<vmem>>, vector<256x128xbf16>
      tpu.vector_store %arg5[%c0_15, %c0_16], %18 {strides = array<i32>} : memref<256x128xbf16, #tpu.memory_space<vmem>>, vector<256x128xbf16>,
    } else {
    }
    return
  }
  func.func @transform_0(%arg0: i32, %arg1: i32) -> (i32, i32) {
    %c0_i32 = arith.constant 0 : i32
    return %arg0, %arg1 : i32, i32
  }
  func.func @transform_1(%arg0: i32, %arg1: i32) -> (i32, i32) {
    %c0_i32 = arith.constant 0 : i32
    %c0_i32_0 = arith.constant 0 : i32
    return %arg1, %c0_i32 : i32, i32
  }
  func.func @transform_2(%arg0: i32, %arg1: i32) -> (i32, i32) {
    %c0_i32 = arith.constant 0 : i32
    %c0_i32_0 = arith.constant 0 : i32
    %c0_i32_1 = arith.constant 0 : i32
    return %c0_i32, %c0_i32_0 : i32, i32
  }
  func.func @transform_3(%arg0: i32, %arg1: i32) -> (i32, i32) {
    %c0_i32 = arith.constant 0 : i32
    %c0_i32_0 = arith.constant 0 : i32
    return %arg0, %c0_i32 : i32, i32
  }
}

module attributes {stable_mosaic.version = 11 : i64} {
  func.func @_matmul_kernel(%arg0: i32, %arg1: i32, %arg2: memref<104x384xbf16, #tpu.memory_space<vmem>>, %arg3: memref<384x128xbf16, #tpu.memory_space<vmem>>, %arg4: memref<1x128xf32, #tpu.memory_space<vmem>>, %arg5: memref<104x128xbf16, #tpu.memory_space<vmem>>, %arg6: memref<104x128xf32, #tpu.memory_space<vmem>>) attributes {dimension_semantics = [#tpu.dimension_semantics<parallel>, #tpu.dimension_semantics<arbitrary>], iteration_bounds = array<i64: 1, 1>, scalar_prefetch = 0 : i64, scratch_operands = 1 : i64, tpu.core_type = #tpu.core_type<tc>, window_params = [{transform_indices = @transform_0, window_bounds = array<i64: 104, 384>}, {transform_indices = @transform_1, window_bounds = array<i64: 384, 128>}, {pipeline_mode = #tpu.pipeline_mode<synchronous>, transform_indices = @transform_2, window_bounds = array<i64: 1, 128>}, {transform_indices = @transform_3, window_bounds = array<i64: 104, 128>}]} {
    %c0_i32 = arith.constant 0 : i32
    %0 = arith.cmpi eq, %arg1, %c0_i32 : i32
    %1 = arith.extui %0 : i1 to i32
    %c0_i32_0 = arith.constant 0 : i32
    %2 = arith.cmpi ne, %1, %c0_i32_0 : i32
    scf.if %2 {
      %cst_10 = arith.constant 0.000000e+00 : f32
      %12 = vector.broadcast %cst_10 : f32 to vector<104x128xf32>
      %c0_11 = arith.constant 0 : index
      %c0_12 = arith.constant 0 : index
      %13 = vector.load %arg6[%c0_11, %c0_12] : memref<104x128xf32, #tpu.memory_space<vmem>>, vector<104x128xf32>
      tpu.vector_store %arg6[%c0_11, %c0_12], %12 {strides = array<i32>} : memref<104x128xf32, #tpu.memory_space<vmem>>, vector<104x128xf32>,
    } else {
    }
    %c0 = arith.constant 0 : index
    %c0_1 = arith.constant 0 : index
    %3 = vector.load %arg6[%c0, %c0_1] : memref<104x128xf32, #tpu.memory_space<vmem>>, vector<104x128xf32>
    %c0_2 = arith.constant 0 : index
    %c0_3 = arith.constant 0 : index
    %4 = vector.load %arg2[%c0_2, %c0_3] : memref<104x384xbf16, #tpu.memory_space<vmem>>, vector<104x384xbf16>
    %c0_4 = arith.constant 0 : index
    %c0_5 = arith.constant 0 : index
    %5 = vector.load %arg3[%c0_4, %c0_5] : memref<384x128xbf16, #tpu.memory_space<vmem>>, vector<384x128xbf16>
    %cst = arith.constant dense<0.000000e+00> : vector<104x128xf32>
    %6 = tpu.matmul %4, %5, %cst {dimension_numbers = #tpu.dot_dimension_numbers<[1], [0], [0], [1], [0, 0, 1, 1], [], []>} : vector<104x384xbf16>, vector<384x128xbf16>, vector<104x128xf32> -> vector<104x128xf32>
    %7 = arith.addf %3, %6 : vector<104x128xf32>
    %c0_6 = arith.constant 0 : index
    %c0_7 = arith.constant 0 : index
    %8 = vector.load %arg6[%c0_6, %c0_7] : memref<104x128xf32, #tpu.memory_space<vmem>>, vector<104x128xf32>
    tpu.vector_store %arg6[%c0_6, %c0_7], %7 {strides = array<i32>} : memref<104x128xf32, #tpu.memory_space<vmem>>, vector<104x128xf32>,
    %c0_i32_8 = arith.constant 0 : i32
    %9 = arith.cmpi eq, %arg1, %c0_i32_8 : i32
    %10 = arith.extui %9 : i1 to i32
    %c0_i32_9 = arith.constant 0 : i32
    %11 = arith.cmpi ne, %10, %c0_i32_9 : i32
    scf.if %11 {
      %c0_10 = arith.constant 0 : index
      %c0_11 = arith.constant 0 : index
      %12 = vector.load %arg6[%c0_10, %c0_11] : memref<104x128xf32, #tpu.memory_space<vmem>>, vector<104x128xf32>
      %c0_12 = arith.constant 0 : index
      %c0_13 = arith.constant 0 : index
      %13 = vector.load %arg4[%c0_12, %c0_13] : memref<1x128xf32, #tpu.memory_space<vmem>>, vector<1x128xf32>
      %14 = vector.broadcast %13 : vector<1x128xf32> to vector<104x128xf32>
      %15 = arith.addf %12, %14 : vector<104x128xf32>
      %cst_14 = arith.constant 0.000000e+00 : f32
      %16 = vector.broadcast %cst_14 : f32 to vector<104x128xf32>
      %17 = arith.maximumf %15, %16 : vector<104x128xf32>
      %18 = arith.truncf %17 : vector<104x128xf32> to vector<104x128xbf16>
      %c0_15 = arith.constant 0 : index
      %c0_16 = arith.constant 0 : index
      %19 = vector.load %arg5[%c0_15, %c0_16] : memref<104x128xbf16, #tpu.memory_space<vmem>>, vector<104x128xbf16>
      tpu.vector_store %arg5[%c0_15, %c0_16], %18 {strides = array<i32>} : memref<104x128xbf16, #tpu.memory_space<vmem>>, vector<104x128xbf16>,
    } else {
    }
    return
  }
  func.func @transform_0(%arg0: i32, %arg1: i32) -> (i32, i32) {
    %c0_i32 = arith.constant 0 : i32
    return %arg0, %arg1 : i32, i32
  }
  func.func @transform_1(%arg0: i32, %arg1: i32) -> (i32, i32) {
    %c0_i32 = arith.constant 0 : i32
    %c0_i32_0 = arith.constant 0 : i32
    return %arg1, %c0_i32 : i32, i32
  }
  func.func @transform_2(%arg0: i32, %arg1: i32) -> (i32, i32) {
    %c0_i32 = arith.constant 0 : i32
    %c0_i32_0 = arith.constant 0 : i32
    %c0_i32_1 = arith.constant 0 : i32
    return %c0_i32, %c0_i32_0 : i32, i32
  }
  func.func @transform_3(%arg0: i32, %arg1: i32) -> (i32, i32) {
    %c0_i32 = arith.constant 0 : i32
    %c0_i32_0 = arith.constant 0 : i32
    return %arg0, %c0_i32 : i32, i32
  }
}

module attributes {stable_mosaic.version = 11 : i64} {
  func.func @_matmul_kernel(%arg0: i32, %arg1: i32, %arg2: memref<8x512xbf16, #tpu.memory_space<vmem>>, %arg3: memref<512x128xbf16, #tpu.memory_space<vmem>>, %arg4: memref<1x128xf32, #tpu.memory_space<vmem>>, %arg5: memref<8x128xbf16, #tpu.memory_space<vmem>>, %arg6: memref<8x128xf32, #tpu.memory_space<vmem>>) attributes {dimension_semantics = [#tpu.dimension_semantics<parallel>, #tpu.dimension_semantics<arbitrary>], iteration_bounds = array<i64: 1, 7>, scalar_prefetch = 0 : i64, scratch_operands = 1 : i64, tpu.core_type = #tpu.core_type<tc>, window_params = [{transform_indices = @transform_0, window_bounds = array<i64: 8, 512>}, {transform_indices = @transform_1, window_bounds = array<i64: 512, 128>}, {pipeline_mode = #tpu.pipeline_mode<synchronous>, transform_indices = @transform_2, window_bounds = array<i64: 1, 128>}, {transform_indices = @transform_3, window_bounds = array<i64: 8, 128>}]} {
    %c0_i32 = arith.constant 0 : i32
    %0 = arith.cmpi eq, %arg1, %c0_i32 : i32
    %1 = arith.extui %0 : i1 to i32
    %c0_i32_0 = arith.constant 0 : i32
    %2 = arith.cmpi ne, %1, %c0_i32_0 : i32
    scf.if %2 {
      %cst_9 = arith.constant 0.000000e+00 : f32
      %12 = vector.broadcast %cst_9 : f32 to vector<8x128xf32>
      %c0_10 = arith.constant 0 : index
      %c0_11 = arith.constant 0 : index
      %13 = vector.load %arg6[%c0_10, %c0_11] : memref<8x128xf32, #tpu.memory_space<vmem>>, vector<8x128xf32>
      tpu.vector_store %arg6[%c0_10, %c0_11], %12 {strides = array<i32>} : memref<8x128xf32, #tpu.memory_space<vmem>>, vector<8x128xf32>,
    } else {
    }
    %c0 = arith.constant 0 : index
    %c0_1 = arith.constant 0 : index
    %3 = vector.load %arg6[%c0, %c0_1] : memref<8x128xf32, #tpu.memory_space<vmem>>, vector<8x128xf32>
    %c0_2 = arith.constant 0 : index
    %c0_3 = arith.constant 0 : index
    %4 = vector.load %arg2[%c0_2, %c0_3] : memref<8x512xbf16, #tpu.memory_space<vmem>>, vector<8x512xbf16>
    %c0_4 = arith.constant 0 : index
    %c0_5 = arith.constant 0 : index
    %5 = vector.load %arg3[%c0_4, %c0_5] : memref<512x128xbf16, #tpu.memory_space<vmem>>, vector<512x128xbf16>
    %cst = arith.constant dense<0.000000e+00> : vector<8x128xf32>
    %6 = tpu.matmul %4, %5, %cst {dimension_numbers = #tpu.dot_dimension_numbers<[1], [0], [0], [1], [0, 0, 1, 1], [], []>} : vector<8x512xbf16>, vector<512x128xbf16>, vector<8x128xf32> -> vector<8x128xf32>
    %7 = arith.addf %3, %6 : vector<8x128xf32>
    %c0_6 = arith.constant 0 : index
    %c0_7 = arith.constant 0 : index
    %8 = vector.load %arg6[%c0_6, %c0_7] : memref<8x128xf32, #tpu.memory_space<vmem>>, vector<8x128xf32>
    tpu.vector_store %arg6[%c0_6, %c0_7], %7 {strides = array<i32>} : memref<8x128xf32, #tpu.memory_space<vmem>>, vector<8x128xf32>,
    %c6_i32 = arith.constant 6 : i32
    %9 = arith.cmpi eq, %arg1, %c6_i32 : i32
    %10 = arith.extui %9 : i1 to i32
    %c0_i32_8 = arith.constant 0 : i32
    %11 = arith.cmpi ne, %10, %c0_i32_8 : i32
    scf.if %11 {
      %c0_9 = arith.constant 0 : index
      %c0_10 = arith.constant 0 : index
      %12 = vector.load %arg6[%c0_9, %c0_10] : memref<8x128xf32, #tpu.memory_space<vmem>>, vector<8x128xf32>
      %c0_11 = arith.constant 0 : index
      %c0_12 = arith.constant 0 : index
      %13 = vector.load %arg4[%c0_11, %c0_12] : memref<1x128xf32, #tpu.memory_space<vmem>>, vector<1x128xf32>
      %14 = vector.broadcast %13 : vector<1x128xf32> to vector<8x128xf32>
      %15 = arith.addf %12, %14 : vector<8x128xf32>
      %cst_13 = arith.constant 0.000000e+00 : f32
      %16 = vector.broadcast %cst_13 : f32 to vector<8x128xf32>
      %17 = arith.maximumf %15, %16 : vector<8x128xf32>
      %18 = arith.truncf %17 : vector<8x128xf32> to vector<8x128xbf16>
      %c0_14 = arith.constant 0 : index
      %c0_15 = arith.constant 0 : index
      %19 = vector.load %arg5[%c0_14, %c0_15] : memref<8x128xbf16, #tpu.memory_space<vmem>>, vector<8x128xbf16>
      tpu.vector_store %arg5[%c0_14, %c0_15], %18 {strides = array<i32>} : memref<8x128xbf16, #tpu.memory_space<vmem>>, vector<8x128xbf16>,
    } else {
    }
    return
  }
  func.func @transform_0(%arg0: i32, %arg1: i32) -> (i32, i32) {
    %c0_i32 = arith.constant 0 : i32
    return %arg0, %arg1 : i32, i32
  }
  func.func @transform_1(%arg0: i32, %arg1: i32) -> (i32, i32) {
    %c0_i32 = arith.constant 0 : i32
    %c0_i32_0 = arith.constant 0 : i32
    return %arg1, %c0_i32 : i32, i32
  }
  func.func @transform_2(%arg0: i32, %arg1: i32) -> (i32, i32) {
    %c0_i32 = arith.constant 0 : i32
    %c0_i32_0 = arith.constant 0 : i32
    %c0_i32_1 = arith.constant 0 : i32
    return %c0_i32, %c0_i32_0 : i32, i32
  }
  func.func @transform_3(%arg0: i32, %arg1: i32) -> (i32, i32) {
    %c0_i32 = arith.constant 0 : i32
    %c0_i32_0 = arith.constant 0 : i32
    return %arg0, %c0_i32 : i32, i32
  }
}

module attributes {stable_mosaic.version = 11 : i64} {
  func.func @_heads_kernel(%arg0: i32, %arg1: memref<2x128xbf16, #tpu.memory_space<vmem>>, %arg2: memref<128x128xbf16, #tpu.memory_space<vmem>>, %arg3: memref<1x128xf32, #tpu.memory_space<vmem>>, %arg4: memref<2x64xf32, #tpu.memory_space<vmem>>, %arg5: memref<2x64xf32, #tpu.memory_space<vmem>>, %arg6: memref<2x64xf32, #tpu.memory_space<vmem>>, %arg7: memref<2x64xf32, #tpu.memory_space<vmem>>) attributes {dimension_semantics = [#tpu.dimension_semantics<arbitrary>], iteration_bounds = array<i64: 1>, scalar_prefetch = 0 : i64, scratch_operands = 0 : i64, tpu.core_type = #tpu.core_type<tc>, window_params = [{pipeline_mode = #tpu.pipeline_mode<synchronous>, transform_indices = @transform_0, window_bounds = array<i64: 2, 128>}, {pipeline_mode = #tpu.pipeline_mode<synchronous>, transform_indices = @transform_1, window_bounds = array<i64: 128, 128>}, {pipeline_mode = #tpu.pipeline_mode<synchronous>, transform_indices = @transform_2, window_bounds = array<i64: 1, 128>}, {pipeline_mode = #tpu.pipeline_mode<synchronous>, transform_indices = @transform_3, window_bounds = array<i64: 2, 64>}, {pipeline_mode = #tpu.pipeline_mode<synchronous>, transform_indices = @transform_4, window_bounds = array<i64: 2, 64>}, {pipeline_mode = #tpu.pipeline_mode<synchronous>, transform_indices = @transform_5, window_bounds = array<i64: 2, 64>}, {pipeline_mode = #tpu.pipeline_mode<synchronous>, transform_indices = @transform_6, window_bounds = array<i64: 2, 64>}]} {
    %c0 = arith.constant 0 : index
    %c0_0 = arith.constant 0 : index
    %0 = vector.load %arg1[%c0, %c0_0] : memref<2x128xbf16, #tpu.memory_space<vmem>>, vector<2x128xbf16>
    %c0_1 = arith.constant 0 : index
    %c0_2 = arith.constant 0 : index
    %1 = vector.load %arg2[%c0_1, %c0_2] : memref<128x128xbf16, #tpu.memory_space<vmem>>, vector<128x128xbf16>
    %cst = arith.constant dense<0.000000e+00> : vector<2x128xf32>
    %2 = tpu.matmul %0, %1, %cst {dimension_numbers = #tpu.dot_dimension_numbers<[1], [0], [0], [1], [0, 0, 1, 1], [], []>} : vector<2x128xbf16>, vector<128x128xbf16>, vector<2x128xf32> -> vector<2x128xf32>
    %c0_3 = arith.constant 0 : index
    %c0_4 = arith.constant 0 : index
    %3 = vector.load %arg3[%c0_3, %c0_4] : memref<1x128xf32, #tpu.memory_space<vmem>>, vector<1x128xf32>
    %4 = vector.broadcast %3 : vector<1x128xf32> to vector<2x128xf32>
    %5 = arith.addf %2, %4 : vector<2x128xf32>
    %6 = vector.extract_strided_slice %5 {offsets = [0, 0], sizes = [2, 64], strides = [1, 1]} : vector<2x128xf32> to vector<2x64xf32>
    %7 = vector.extract_strided_slice %5 {offsets = [0, 64], sizes = [2, 64], strides = [1, 1]} : vector<2x128xf32> to vector<2x64xf32>
    %c0_5 = arith.constant 0 : index
    %c0_6 = arith.constant 0 : index
    %8 = vector.load %arg5[%c0_5, %c0_6] : memref<2x64xf32, #tpu.memory_space<vmem>>, vector<2x64xf32>
    tpu.vector_store %arg5[%c0_5, %c0_6], %6 {strides = array<i32>} : memref<2x64xf32, #tpu.memory_space<vmem>>, vector<2x64xf32>,
    %c0_7 = arith.constant 0 : index
    %c0_8 = arith.constant 0 : index
    %9 = vector.load %arg6[%c0_7, %c0_8] : memref<2x64xf32, #tpu.memory_space<vmem>>, vector<2x64xf32>
    tpu.vector_store %arg6[%c0_7, %c0_8], %7 {strides = array<i32>} : memref<2x64xf32, #tpu.memory_space<vmem>>, vector<2x64xf32>,
    %c0_9 = arith.constant 0 : index
    %c0_10 = arith.constant 0 : index
    %10 = vector.load %arg4[%c0_9, %c0_10] : memref<2x64xf32, #tpu.memory_space<vmem>>, vector<2x64xf32>
    %cst_11 = arith.constant 5.000000e-01 : f32
    %11 = vector.broadcast %cst_11 : f32 to vector<2x64xf32>
    %12 = arith.mulf %11, %7 : vector<2x64xf32>
    %13 = math.exp %12 : vector<2x64xf32>
    %14 = arith.mulf %10, %13 : vector<2x64xf32>
    %15 = arith.addf %6, %14 : vector<2x64xf32>
    %c0_12 = arith.constant 0 : index
    %c0_13 = arith.constant 0 : index
    %16 = vector.load %arg7[%c0_12, %c0_13] : memref<2x64xf32, #tpu.memory_space<vmem>>, vector<2x64xf32>
    tpu.vector_store %arg7[%c0_12, %c0_13], %15 {strides = array<i32>} : memref<2x64xf32, #tpu.memory_space<vmem>>, vector<2x64xf32>,
    return
  }
  func.func @transform_0(%arg0: i32) -> (i32, i32) {
    %c0_i32 = arith.constant 0 : i32
    %c0_i32_0 = arith.constant 0 : i32
    %c0_i32_1 = arith.constant 0 : i32
    return %c0_i32, %c0_i32_0 : i32, i32
  }
  func.func @transform_1(%arg0: i32) -> (i32, i32) {
    %c0_i32 = arith.constant 0 : i32
    %c0_i32_0 = arith.constant 0 : i32
    %c0_i32_1 = arith.constant 0 : i32
    return %c0_i32, %c0_i32_0 : i32, i32
  }
  func.func @transform_2(%arg0: i32) -> (i32, i32) {
    %c0_i32 = arith.constant 0 : i32
    %c0_i32_0 = arith.constant 0 : i32
    %c0_i32_1 = arith.constant 0 : i32
    return %c0_i32, %c0_i32_0 : i32, i32
  }
  func.func @transform_3(%arg0: i32) -> (i32, i32) {
    %c0_i32 = arith.constant 0 : i32
    %c0_i32_0 = arith.constant 0 : i32
    %c0_i32_1 = arith.constant 0 : i32
    return %c0_i32, %c0_i32_0 : i32, i32
  }
  func.func @transform_4(%arg0: i32) -> (i32, i32) {
    %c0_i32 = arith.constant 0 : i32
    %c0_i32_0 = arith.constant 0 : i32
    %c0_i32_1 = arith.constant 0 : i32
    return %c0_i32, %c0_i32_0 : i32, i32
  }
  func.func @transform_5(%arg0: i32) -> (i32, i32) {
    %c0_i32 = arith.constant 0 : i32
    %c0_i32_0 = arith.constant 0 : i32
    %c0_i32_1 = arith.constant 0 : i32
    return %c0_i32, %c0_i32_0 : i32, i32
  }
  func.func @transform_6(%arg0: i32) -> (i32, i32) {
    %c0_i32 = arith.constant 0 : i32
    %c0_i32_0 = arith.constant 0 : i32
    %c0_i32_1 = arith.constant 0 : i32
    return %c0_i32, %c0_i32_0 : i32, i32
  }
}

module attributes {stable_mosaic.version = 11 : i64} {
  func.func @_matmul_kernel(%arg0: i32, %arg1: i32, %arg2: memref<8x128xbf16, #tpu.memory_space<vmem>>, %arg3: memref<128x3200xbf16, #tpu.memory_space<vmem>>, %arg4: memref<1x3200xf32, #tpu.memory_space<vmem>>, %arg5: memref<8x3200xbf16, #tpu.memory_space<vmem>>, %arg6: memref<8x3200xf32, #tpu.memory_space<vmem>>) attributes {dimension_semantics = [#tpu.dimension_semantics<parallel>, #tpu.dimension_semantics<arbitrary>], iteration_bounds = array<i64: 1, 1>, scalar_prefetch = 0 : i64, scratch_operands = 1 : i64, tpu.core_type = #tpu.core_type<tc>, window_params = [{transform_indices = @transform_0, window_bounds = array<i64: 8, 128>}, {transform_indices = @transform_1, window_bounds = array<i64: 128, 3200>}, {pipeline_mode = #tpu.pipeline_mode<synchronous>, transform_indices = @transform_2, window_bounds = array<i64: 1, 3200>}, {transform_indices = @transform_3, window_bounds = array<i64: 8, 3200>}]} {
    %c0_i32 = arith.constant 0 : i32
    %0 = arith.cmpi eq, %arg1, %c0_i32 : i32
    %1 = arith.extui %0 : i1 to i32
    %c0_i32_0 = arith.constant 0 : i32
    %2 = arith.cmpi ne, %1, %c0_i32_0 : i32
    scf.if %2 {
      %cst_10 = arith.constant 0.000000e+00 : f32
      %12 = vector.broadcast %cst_10 : f32 to vector<8x3200xf32>
      %c0_11 = arith.constant 0 : index
      %c0_12 = arith.constant 0 : index
      %13 = vector.load %arg6[%c0_11, %c0_12] : memref<8x3200xf32, #tpu.memory_space<vmem>>, vector<8x3200xf32>
      tpu.vector_store %arg6[%c0_11, %c0_12], %12 {strides = array<i32>} : memref<8x3200xf32, #tpu.memory_space<vmem>>, vector<8x3200xf32>,
    } else {
    }
    %c0 = arith.constant 0 : index
    %c0_1 = arith.constant 0 : index
    %3 = vector.load %arg6[%c0, %c0_1] : memref<8x3200xf32, #tpu.memory_space<vmem>>, vector<8x3200xf32>
    %c0_2 = arith.constant 0 : index
    %c0_3 = arith.constant 0 : index
    %4 = vector.load %arg2[%c0_2, %c0_3] : memref<8x128xbf16, #tpu.memory_space<vmem>>, vector<8x128xbf16>
    %c0_4 = arith.constant 0 : index
    %c0_5 = arith.constant 0 : index
    %5 = vector.load %arg3[%c0_4, %c0_5] : memref<128x3200xbf16, #tpu.memory_space<vmem>>, vector<128x3200xbf16>
    %cst = arith.constant dense<0.000000e+00> : vector<8x3200xf32>
    %6 = tpu.matmul %4, %5, %cst {dimension_numbers = #tpu.dot_dimension_numbers<[1], [0], [0], [1], [0, 0, 1, 1], [], []>} : vector<8x128xbf16>, vector<128x3200xbf16>, vector<8x3200xf32> -> vector<8x3200xf32>
    %7 = arith.addf %3, %6 : vector<8x3200xf32>
    %c0_6 = arith.constant 0 : index
    %c0_7 = arith.constant 0 : index
    %8 = vector.load %arg6[%c0_6, %c0_7] : memref<8x3200xf32, #tpu.memory_space<vmem>>, vector<8x3200xf32>
    tpu.vector_store %arg6[%c0_6, %c0_7], %7 {strides = array<i32>} : memref<8x3200xf32, #tpu.memory_space<vmem>>, vector<8x3200xf32>,
    %c0_i32_8 = arith.constant 0 : i32
    %9 = arith.cmpi eq, %arg1, %c0_i32_8 : i32
    %10 = arith.extui %9 : i1 to i32
    %c0_i32_9 = arith.constant 0 : i32
    %11 = arith.cmpi ne, %10, %c0_i32_9 : i32
    scf.if %11 {
      %c0_10 = arith.constant 0 : index
      %c0_11 = arith.constant 0 : index
      %12 = vector.load %arg6[%c0_10, %c0_11] : memref<8x3200xf32, #tpu.memory_space<vmem>>, vector<8x3200xf32>
      %c0_12 = arith.constant 0 : index
      %c0_13 = arith.constant 0 : index
      %13 = vector.load %arg4[%c0_12, %c0_13] : memref<1x3200xf32, #tpu.memory_space<vmem>>, vector<1x3200xf32>
      %14 = vector.broadcast %13 : vector<1x3200xf32> to vector<8x3200xf32>
      %15 = arith.addf %12, %14 : vector<8x3200xf32>
      %cst_14 = arith.constant 0.000000e+00 : f32
      %16 = vector.broadcast %cst_14 : f32 to vector<8x3200xf32>
      %17 = arith.maximumf %15, %16 : vector<8x3200xf32>
      %18 = arith.truncf %17 : vector<8x3200xf32> to vector<8x3200xbf16>
      %c0_15 = arith.constant 0 : index
      %c0_16 = arith.constant 0 : index
      %19 = vector.load %arg5[%c0_15, %c0_16] : memref<8x3200xbf16, #tpu.memory_space<vmem>>, vector<8x3200xbf16>
      tpu.vector_store %arg5[%c0_15, %c0_16], %18 {strides = array<i32>} : memref<8x3200xbf16, #tpu.memory_space<vmem>>, vector<8x3200xbf16>,
    } else {
    }
    return
  }
  func.func @transform_0(%arg0: i32, %arg1: i32) -> (i32, i32) {
    %c0_i32 = arith.constant 0 : i32
    return %arg0, %arg1 : i32, i32
  }
  func.func @transform_1(%arg0: i32, %arg1: i32) -> (i32, i32) {
    %c0_i32 = arith.constant 0 : i32
    %c0_i32_0 = arith.constant 0 : i32
    return %arg1, %c0_i32 : i32, i32
  }
  func.func @transform_2(%arg0: i32, %arg1: i32) -> (i32, i32) {
    %c0_i32 = arith.constant 0 : i32
    %c0_i32_0 = arith.constant 0 : i32
    %c0_i32_1 = arith.constant 0 : i32
    return %c0_i32, %c0_i32_0 : i32, i32
  }
  func.func @transform_3(%arg0: i32, %arg1: i32) -> (i32, i32) {
    %c0_i32 = arith.constant 0 : i32
    %c0_i32_0 = arith.constant 0 : i32
    return %arg0, %c0_i32 : i32, i32
  }
}

module attributes {stable_mosaic.version = 11 : i64} {
  func.func @_matmul_kernel(%arg0: i32, %arg1: i32, %arg2: memref<104x256xbf16, #tpu.memory_space<vmem>>, %arg3: memref<256x256xbf16, #tpu.memory_space<vmem>>, %arg4: memref<1x256xf32, #tpu.memory_space<vmem>>, %arg5: memref<104x256xbf16, #tpu.memory_space<vmem>>, %arg6: memref<104x256xf32, #tpu.memory_space<vmem>>) attributes {dimension_semantics = [#tpu.dimension_semantics<parallel>, #tpu.dimension_semantics<arbitrary>], iteration_bounds = array<i64: 1, 1>, scalar_prefetch = 0 : i64, scratch_operands = 1 : i64, tpu.core_type = #tpu.core_type<tc>, window_params = [{transform_indices = @transform_0, window_bounds = array<i64: 104, 256>}, {transform_indices = @transform_1, window_bounds = array<i64: 256, 256>}, {pipeline_mode = #tpu.pipeline_mode<synchronous>, transform_indices = @transform_2, window_bounds = array<i64: 1, 256>}, {transform_indices = @transform_3, window_bounds = array<i64: 104, 256>}]} {
    %c0_i32 = arith.constant 0 : i32
    %0 = arith.cmpi eq, %arg1, %c0_i32 : i32
    %1 = arith.extui %0 : i1 to i32
    %c0_i32_0 = arith.constant 0 : i32
    %2 = arith.cmpi ne, %1, %c0_i32_0 : i32
    scf.if %2 {
      %cst_10 = arith.constant 0.000000e+00 : f32
      %12 = vector.broadcast %cst_10 : f32 to vector<104x256xf32>
      %c0_11 = arith.constant 0 : index
      %c0_12 = arith.constant 0 : index
      %13 = vector.load %arg6[%c0_11, %c0_12] : memref<104x256xf32, #tpu.memory_space<vmem>>, vector<104x256xf32>
      tpu.vector_store %arg6[%c0_11, %c0_12], %12 {strides = array<i32>} : memref<104x256xf32, #tpu.memory_space<vmem>>, vector<104x256xf32>,
    } else {
    }
    %c0 = arith.constant 0 : index
    %c0_1 = arith.constant 0 : index
    %3 = vector.load %arg6[%c0, %c0_1] : memref<104x256xf32, #tpu.memory_space<vmem>>, vector<104x256xf32>
    %c0_2 = arith.constant 0 : index
    %c0_3 = arith.constant 0 : index
    %4 = vector.load %arg2[%c0_2, %c0_3] : memref<104x256xbf16, #tpu.memory_space<vmem>>, vector<104x256xbf16>
    %c0_4 = arith.constant 0 : index
    %c0_5 = arith.constant 0 : index
    %5 = vector.load %arg3[%c0_4, %c0_5] : memref<256x256xbf16, #tpu.memory_space<vmem>>, vector<256x256xbf16>
    %cst = arith.constant dense<0.000000e+00> : vector<104x256xf32>
    %6 = tpu.matmul %4, %5, %cst {dimension_numbers = #tpu.dot_dimension_numbers<[1], [0], [0], [1], [0, 0, 1, 1], [], []>} : vector<104x256xbf16>, vector<256x256xbf16>, vector<104x256xf32> -> vector<104x256xf32>
    %7 = arith.addf %3, %6 : vector<104x256xf32>
    %c0_6 = arith.constant 0 : index
    %c0_7 = arith.constant 0 : index
    %8 = vector.load %arg6[%c0_6, %c0_7] : memref<104x256xf32, #tpu.memory_space<vmem>>, vector<104x256xf32>
    tpu.vector_store %arg6[%c0_6, %c0_7], %7 {strides = array<i32>} : memref<104x256xf32, #tpu.memory_space<vmem>>, vector<104x256xf32>,
    %c0_i32_8 = arith.constant 0 : i32
    %9 = arith.cmpi eq, %arg1, %c0_i32_8 : i32
    %10 = arith.extui %9 : i1 to i32
    %c0_i32_9 = arith.constant 0 : i32
    %11 = arith.cmpi ne, %10, %c0_i32_9 : i32
    scf.if %11 {
      %c0_10 = arith.constant 0 : index
      %c0_11 = arith.constant 0 : index
      %12 = vector.load %arg6[%c0_10, %c0_11] : memref<104x256xf32, #tpu.memory_space<vmem>>, vector<104x256xf32>
      %c0_12 = arith.constant 0 : index
      %c0_13 = arith.constant 0 : index
      %13 = vector.load %arg4[%c0_12, %c0_13] : memref<1x256xf32, #tpu.memory_space<vmem>>, vector<1x256xf32>
      %14 = vector.broadcast %13 : vector<1x256xf32> to vector<104x256xf32>
      %15 = arith.addf %12, %14 : vector<104x256xf32>
      %cst_14 = arith.constant 0.000000e+00 : f32
      %16 = vector.broadcast %cst_14 : f32 to vector<104x256xf32>
      %17 = arith.maximumf %15, %16 : vector<104x256xf32>
      %18 = arith.truncf %17 : vector<104x256xf32> to vector<104x256xbf16>
      %c0_15 = arith.constant 0 : index
      %c0_16 = arith.constant 0 : index
      %19 = vector.load %arg5[%c0_15, %c0_16] : memref<104x256xbf16, #tpu.memory_space<vmem>>, vector<104x256xbf16>
      tpu.vector_store %arg5[%c0_15, %c0_16], %18 {strides = array<i32>} : memref<104x256xbf16, #tpu.memory_space<vmem>>, vector<104x256xbf16>,
    } else {
    }
    return
  }
  func.func @transform_0(%arg0: i32, %arg1: i32) -> (i32, i32) {
    %c0_i32 = arith.constant 0 : i32
    return %arg0, %arg1 : i32, i32
  }
  func.func @transform_1(%arg0: i32, %arg1: i32) -> (i32, i32) {
    %c0_i32 = arith.constant 0 : i32
    %c0_i32_0 = arith.constant 0 : i32
    return %arg1, %c0_i32 : i32, i32
  }
  func.func @transform_2(%arg0: i32, %arg1: i32) -> (i32, i32) {
    %c0_i32 = arith.constant 0 : i32
    %c0_i32_0 = arith.constant 0 : i32
    %c0_i32_1 = arith.constant 0 : i32
    return %c0_i32, %c0_i32_0 : i32, i32
  }
  func.func @transform_3(%arg0: i32, %arg1: i32) -> (i32, i32) {
    %c0_i32 = arith.constant 0 : i32
    %c0_i32_0 = arith.constant 0 : i32
    return %arg0, %c0_i32 : i32, i32
  }
}

module attributes {stable_mosaic.version = 11 : i64} {
  func.func @_matmul_kernel(%arg0: i32, %arg1: i32, %arg2: memref<256x256xbf16, #tpu.memory_space<vmem>>, %arg3: memref<256x128xbf16, #tpu.memory_space<vmem>>, %arg4: memref<1x128xf32, #tpu.memory_space<vmem>>, %arg5: memref<256x128xbf16, #tpu.memory_space<vmem>>, %arg6: memref<256x128xf32, #tpu.memory_space<vmem>>) attributes {dimension_semantics = [#tpu.dimension_semantics<parallel>, #tpu.dimension_semantics<arbitrary>], iteration_bounds = array<i64: 2, 1>, scalar_prefetch = 0 : i64, scratch_operands = 1 : i64, tpu.core_type = #tpu.core_type<tc>, window_params = [{transform_indices = @transform_0, window_bounds = array<i64: 256, 256>}, {transform_indices = @transform_1, window_bounds = array<i64: 256, 128>}, {pipeline_mode = #tpu.pipeline_mode<synchronous>, transform_indices = @transform_2, window_bounds = array<i64: 1, 128>}, {transform_indices = @transform_3, window_bounds = array<i64: 256, 128>}]} {
    %c0_i32 = arith.constant 0 : i32
    %0 = arith.cmpi eq, %arg1, %c0_i32 : i32
    %1 = arith.extui %0 : i1 to i32
    %c0_i32_0 = arith.constant 0 : i32
    %2 = arith.cmpi ne, %1, %c0_i32_0 : i32
    scf.if %2 {
      %cst_10 = arith.constant 0.000000e+00 : f32
      %12 = vector.broadcast %cst_10 : f32 to vector<256x128xf32>
      %c0_11 = arith.constant 0 : index
      %c0_12 = arith.constant 0 : index
      %13 = vector.load %arg6[%c0_11, %c0_12] : memref<256x128xf32, #tpu.memory_space<vmem>>, vector<256x128xf32>
      tpu.vector_store %arg6[%c0_11, %c0_12], %12 {strides = array<i32>} : memref<256x128xf32, #tpu.memory_space<vmem>>, vector<256x128xf32>,
    } else {
    }
    %c0 = arith.constant 0 : index
    %c0_1 = arith.constant 0 : index
    %3 = vector.load %arg6[%c0, %c0_1] : memref<256x128xf32, #tpu.memory_space<vmem>>, vector<256x128xf32>
    %c0_2 = arith.constant 0 : index
    %c0_3 = arith.constant 0 : index
    %4 = vector.load %arg2[%c0_2, %c0_3] : memref<256x256xbf16, #tpu.memory_space<vmem>>, vector<256x256xbf16>
    %c0_4 = arith.constant 0 : index
    %c0_5 = arith.constant 0 : index
    %5 = vector.load %arg3[%c0_4, %c0_5] : memref<256x128xbf16, #tpu.memory_space<vmem>>, vector<256x128xbf16>
    %cst = arith.constant dense<0.000000e+00> : vector<256x128xf32>
    %6 = tpu.matmul %4, %5, %cst {dimension_numbers = #tpu.dot_dimension_numbers<[1], [0], [0], [1], [0, 0, 1, 1], [], []>} : vector<256x256xbf16>, vector<256x128xbf16>, vector<256x128xf32> -> vector<256x128xf32>
    %7 = arith.addf %3, %6 : vector<256x128xf32>
    %c0_6 = arith.constant 0 : index
    %c0_7 = arith.constant 0 : index
    %8 = vector.load %arg6[%c0_6, %c0_7] : memref<256x128xf32, #tpu.memory_space<vmem>>, vector<256x128xf32>
    tpu.vector_store %arg6[%c0_6, %c0_7], %7 {strides = array<i32>} : memref<256x128xf32, #tpu.memory_space<vmem>>, vector<256x128xf32>,
    %c0_i32_8 = arith.constant 0 : i32
    %9 = arith.cmpi eq, %arg1, %c0_i32_8 : i32
    %10 = arith.extui %9 : i1 to i32
    %c0_i32_9 = arith.constant 0 : i32
    %11 = arith.cmpi ne, %10, %c0_i32_9 : i32
    scf.if %11 {
      %c0_10 = arith.constant 0 : index
      %c0_11 = arith.constant 0 : index
      %12 = vector.load %arg6[%c0_10, %c0_11] : memref<256x128xf32, #tpu.memory_space<vmem>>, vector<256x128xf32>
      %c0_12 = arith.constant 0 : index
      %c0_13 = arith.constant 0 : index
      %13 = vector.load %arg4[%c0_12, %c0_13] : memref<1x128xf32, #tpu.memory_space<vmem>>, vector<1x128xf32>
      %14 = vector.broadcast %13 : vector<1x128xf32> to vector<256x128xf32>
      %15 = arith.addf %12, %14 : vector<256x128xf32>
      %cst_14 = arith.constant 0.000000e+00 : f32
      %16 = vector.broadcast %cst_14 : f32 to vector<256x128xf32>
      %17 = arith.maximumf %15, %16 : vector<256x128xf32>
      %18 = arith.truncf %17 : vector<256x128xf32> to vector<256x128xbf16>
      %c0_15 = arith.constant 0 : index
      %c0_16 = arith.constant 0 : index
      %19 = vector.load %arg5[%c0_15, %c0_16] : memref<256x128xbf16, #tpu.memory_space<vmem>>, vector<256x128xbf16>
      tpu.vector_store %arg5[%c0_15, %c0_16], %18 {strides = array<i32>} : memref<256x128xbf16, #tpu.memory_space<vmem>>, vector<256x128xbf16>,
    } else {
    }
    return
  }
  func.func @transform_0(%arg0: i32, %arg1: i32) -> (i32, i32) {
    %c0_i32 = arith.constant 0 : i32
    return %arg0, %arg1 : i32, i32
  }
  func.func @transform_1(%arg0: i32, %arg1: i32) -> (i32, i32) {
    %c0_i32 = arith.constant 0 : i32
    %c0_i32_0 = arith.constant 0 : i32
    return %arg1, %c0_i32 : i32, i32
  }
  func.func @transform_2(%arg0: i32, %arg1: i32) -> (i32, i32) {
    %c0_i32 = arith.constant 0 : i32
    %c0_i32_0 = arith.constant 0 : i32
    %c0_i32_1 = arith.constant 0 : i32
    return %c0_i32, %c0_i32_0 : i32, i32
  }
  func.func @transform_3(%arg0: i32, %arg1: i32) -> (i32, i32) {
    %c0_i32 = arith.constant 0 : i32
    %c0_i32_0 = arith.constant 0 : i32
    return %arg0, %c0_i32 : i32, i32
  }
}

module attributes {stable_mosaic.version = 11 : i64} {
  func.func @_matmul_kernel(%arg0: i32, %arg1: i32, %arg2: memref<256x384xbf16, #tpu.memory_space<vmem>>, %arg3: memref<384x128xbf16, #tpu.memory_space<vmem>>, %arg4: memref<1x128xf32, #tpu.memory_space<vmem>>, %arg5: memref<256x128xf32, #tpu.memory_space<vmem>>, %arg6: memref<256x128xf32, #tpu.memory_space<vmem>>) attributes {dimension_semantics = [#tpu.dimension_semantics<parallel>, #tpu.dimension_semantics<arbitrary>], iteration_bounds = array<i64: 7, 1>, scalar_prefetch = 0 : i64, scratch_operands = 1 : i64, tpu.core_type = #tpu.core_type<tc>, window_params = [{transform_indices = @transform_0, window_bounds = array<i64: 256, 384>}, {transform_indices = @transform_1, window_bounds = array<i64: 384, 128>}, {pipeline_mode = #tpu.pipeline_mode<synchronous>, transform_indices = @transform_2, window_bounds = array<i64: 1, 128>}, {transform_indices = @transform_3, window_bounds = array<i64: 256, 128>}]} {
    %c0_i32 = arith.constant 0 : i32
    %0 = arith.cmpi eq, %arg1, %c0_i32 : i32
    %1 = arith.extui %0 : i1 to i32
    %c0_i32_0 = arith.constant 0 : i32
    %2 = arith.cmpi ne, %1, %c0_i32_0 : i32
    scf.if %2 {
      %cst_10 = arith.constant 0.000000e+00 : f32
      %12 = vector.broadcast %cst_10 : f32 to vector<256x128xf32>
      %c0_11 = arith.constant 0 : index
      %c0_12 = arith.constant 0 : index
      %13 = vector.load %arg6[%c0_11, %c0_12] : memref<256x128xf32, #tpu.memory_space<vmem>>, vector<256x128xf32>
      tpu.vector_store %arg6[%c0_11, %c0_12], %12 {strides = array<i32>} : memref<256x128xf32, #tpu.memory_space<vmem>>, vector<256x128xf32>,
    } else {
    }
    %c0 = arith.constant 0 : index
    %c0_1 = arith.constant 0 : index
    %3 = vector.load %arg6[%c0, %c0_1] : memref<256x128xf32, #tpu.memory_space<vmem>>, vector<256x128xf32>
    %c0_2 = arith.constant 0 : index
    %c0_3 = arith.constant 0 : index
    %4 = vector.load %arg2[%c0_2, %c0_3] : memref<256x384xbf16, #tpu.memory_space<vmem>>, vector<256x384xbf16>
    %c0_4 = arith.constant 0 : index
    %c0_5 = arith.constant 0 : index
    %5 = vector.load %arg3[%c0_4, %c0_5] : memref<384x128xbf16, #tpu.memory_space<vmem>>, vector<384x128xbf16>
    %cst = arith.constant dense<0.000000e+00> : vector<256x128xf32>
    %6 = tpu.matmul %4, %5, %cst {dimension_numbers = #tpu.dot_dimension_numbers<[1], [0], [0], [1], [0, 0, 1, 1], [], []>} : vector<256x384xbf16>, vector<384x128xbf16>, vector<256x128xf32> -> vector<256x128xf32>
    %7 = arith.addf %3, %6 : vector<256x128xf32>
    %c0_6 = arith.constant 0 : index
    %c0_7 = arith.constant 0 : index
    %8 = vector.load %arg6[%c0_6, %c0_7] : memref<256x128xf32, #tpu.memory_space<vmem>>, vector<256x128xf32>
    tpu.vector_store %arg6[%c0_6, %c0_7], %7 {strides = array<i32>} : memref<256x128xf32, #tpu.memory_space<vmem>>, vector<256x128xf32>,
    %c0_i32_8 = arith.constant 0 : i32
    %9 = arith.cmpi eq, %arg1, %c0_i32_8 : i32
    %10 = arith.extui %9 : i1 to i32
    %c0_i32_9 = arith.constant 0 : i32
    %11 = arith.cmpi ne, %10, %c0_i32_9 : i32
    scf.if %11 {
      %c0_10 = arith.constant 0 : index
      %c0_11 = arith.constant 0 : index
      %12 = vector.load %arg6[%c0_10, %c0_11] : memref<256x128xf32, #tpu.memory_space<vmem>>, vector<256x128xf32>
      %c0_12 = arith.constant 0 : index
      %c0_13 = arith.constant 0 : index
      %13 = vector.load %arg4[%c0_12, %c0_13] : memref<1x128xf32, #tpu.memory_space<vmem>>, vector<1x128xf32>
      %14 = vector.broadcast %13 : vector<1x128xf32> to vector<256x128xf32>
      %15 = arith.addf %12, %14 : vector<256x128xf32>
      %16 = arith.negf %15 : vector<256x128xf32>
      %17 = math.exp %16 : vector<256x128xf32>
      %cst_14 = arith.constant 1.000000e+00 : f32
      %18 = vector.broadcast %cst_14 : f32 to vector<256x128xf32>
      %19 = arith.addf %18, %17 : vector<256x128xf32>
      %20 = arith.divf %18, %19 : vector<256x128xf32>
      %c0_15 = arith.constant 0 : index
      %c0_16 = arith.constant 0 : index
      %21 = vector.load %arg5[%c0_15, %c0_16] : memref<256x128xf32, #tpu.memory_space<vmem>>, vector<256x128xf32>
      tpu.vector_store %arg5[%c0_15, %c0_16], %20 {strides = array<i32>} : memref<256x128xf32, #tpu.memory_space<vmem>>, vector<256x128xf32>,
    } else {
    }
    return
  }
  func.func @transform_0(%arg0: i32, %arg1: i32) -> (i32, i32) {
    %c0_i32 = arith.constant 0 : i32
    return %arg0, %arg1 : i32, i32
  }
  func.func @transform_1(%arg0: i32, %arg1: i32) -> (i32, i32) {
    %c0_i32 = arith.constant 0 : i32
    %c0_i32_0 = arith.constant 0 : i32
    return %arg1, %c0_i32 : i32, i32
  }
  func.func @transform_2(%arg0: i32, %arg1: i32) -> (i32, i32) {
    %c0_i32 = arith.constant 0 : i32
    %c0_i32_0 = arith.constant 0 : i32
    %c0_i32_1 = arith.constant 0 : i32
    return %c0_i32, %c0_i32_0 : i32, i32
  }
  func.func @transform_3(%arg0: i32, %arg1: i32) -> (i32, i32) {
    %c0_i32 = arith.constant 0 : i32
    %c0_i32_0 = arith.constant 0 : i32
    return %arg0, %c0_i32 : i32, i32
  }
}

</mosaic_0001>

<bundles_post_ra>
// kernel: vae_forward.8
= control target key start
LH: loop header
LB: loop body
LE: loop exit
PB: predicated region body
PF: predicated region fallthrough
CT: control target
= control target key end

     0   :  { %s1430_s12 = smov 0   ;;  %s1432_s13 = smov 0   ;;  %s1567_s0 = inlined_call_operand.vmem [shape: bf16[512,128], index: 0, kind: input, shape index: {}]   ;;  %s1568_s1 = inlined_call_operand.vmem [shape: bf16[128,128], index: 1, kind: input, shape index: {}]   ;;  %s1569_s2 = inlined_call_operand.vmem [shape: f32[1,128], index: 2, kind: input, shape index: {}]   ;;  %s1570_s3 = inlined_call_operand.vmem [shape: bf16[512,128], index: 3, kind: output, shape index: {}]  }
   0x1   :  { %s1434_s14 = smov 0  }
   0x2 LB: > { %s25_s15 = sadd.s32 1, %s1404_s13  ;;  %p1059_p0 = scmp.ge.s32.totalorder %s1408_s14, 1  ;;  %s1408_s14 = sphi %s1434_s14, %s13_s14   ;;  %s1404_s13 = sphi %s1432_s13, %s1572_s13   ;;  %s1400_s12 = sphi %s1430_s12, %s1571_s12  }
   0x3   : > { %p27_p1 = scmp.ge.s32.totalorder %s25_s15, 2  ;;  %p166_p2 = scmp.lt.s32.totalorder %s1408_s14, 3 }
   0x5   : > { %s1574_s15 = smov (%p27_p1, %s25_s15), 0  ;;  %p167_p3 = pnand %p1059_p0, %p166_p2 }
   0x6   : > { %v1362_v0 = vld [vmem:[%s1568_s1] sm:$0xff] (!%p167_p3)   ;;  %s1060_s18 = sshll.u32 (!%p167_p3), %s1400_s12, 5  ;;  %v1363_v1 = vld [vmem:[%s1568_s1 + $0x8] sm:$0xff] (!%p167_p3)   ;;  %v1364_v2 = vld [vmem:[%s1568_s1 + $0x10] sm:$0xff] (!%p167_p3)  }
   0x7   : > { %170 = sbr.rel (%p167_p3) target bundleno = 285 (0x11d), region = 32  ;;  %p199_p4 = scmp.lt.s32.totalorder (!%p167_p3), %s1060_s18, 63  ;;  %1274 = vmatprep.subr.bf16.mxu0 (!%p167_p3), %v1362_v0  ;;  %1322 = vmatprep.subr.bf16.mxu1 (!%p167_p3), %v1362_v0  ;;  %v1365_v3 = vld [vmem:[%s1568_s1 + $0x18] sm:$0xff] (!%p167_p3)   ;;  %v1366_v6 = vld [vmem:[%s1568_s1 + $0x20] sm:$0xff] (!%p167_p3)   ;;  %v1367_v7 = vld [vmem:[%s1568_s1 + $0x28] sm:$0xff] (!%p167_p3)  }
   0x8   : > { %1275 = vmatpush3.bf16.msra.mxu0 (!%p167_p3), %v1362_v0  ;;  %1330 = vmatpush3.bf16.msra.mxu1 (!%p167_p3), %v1362_v0  ;;  %v1368_v8 = vld [vmem:[%s1568_s1 + $0x30] sm:$0xff] (!%p167_p3)   ;;  %v1369_v9 = vld [vmem:[%s1568_s1 + $0x38] sm:$0xff] (!%p167_p3)   ;;  %v1501_v24 = vld [vmem:[%s1569_s2] ss:$0 sm:$0xff] (!%p167_p3) }
   0x9   : > { %1276 = vmatprep.subr.bf16.mxu0 (!%p167_p3), %v1363_v1  ;;  %1323 = vmatprep.subr.bf16.mxu1 (!%p167_p3), %v1363_v1 }
   0xc   : > { %1277 = vmatpush3.bf16.msra.mxu0 (!%p167_p3), %v1363_v1  ;;  %1331 = vmatpush3.bf16.msra.mxu1 (!%p167_p3), %v1363_v1 }
   0xd   : > { %1278 = vmatprep.subr.bf16.mxu0 (!%p167_p3), %v1364_v2  ;;  %1324 = vmatprep.subr.bf16.mxu1 (!%p167_p3), %v1364_v2 }
   0xe   : > { %s1576_s18 = smov (!%p199_p4, %s1060_s18), 63 }
   0xf   : > { %s1061_s23 = sshll.u32 %s1576_s18, 2 }
  0x10   : > { %s1465_s26 = scalar_lea.vmem %s1567_s0, %s1061_s23  ;;  %1279 = vmatpush3.bf16.msra.mxu0 %v1364_v2  ;;  %1332 = vmatpush3.bf16.msra.mxu1 %v1364_v2  ;;  %s1516_s17 = scalar_lea.vmem %s1570_s3, %s1061_s23 }
  0x11   : > { %v1370_v4 = vld [vmem:[%s1465_s26] sm:$0xff]   ;;  %1280 = vmatprep.subr.bf16.mxu0 %v1365_v3  ;;  %1325 = vmatprep.subr.bf16.mxu1 %v1365_v3  ;;  %v1372_v10 = vld [vmem:[%s1465_s26 + $0x8] sm:$0xff]   ;;  %v1374_v12 = vld [vmem:[%s1465_s26 + $0x10] sm:$0xff]  }
  0x12   : > { %v1371_v5 = vld [vmem:[%s1465_s26 + $0x40] sm:$0xff]   ;;  %1290 = vmatprep.mubr.bf16.mxu0 %v1370_v4  ;;  %v1373_v11 = vld [vmem:[%s1465_s26 + $0x48] sm:$0xff]   ;;  %v1375_v13 = vld [vmem:[%s1465_s26 + $0x50] sm:$0xff]  }
  0x13   : > { %1306 = vmatprep.mubr.bf16.mxu1 %v1371_v5  ;;  %v1376_v14 = vld [vmem:[%s1465_s26 + $0x18] sm:$0xff]   ;;  %v1378_v16 = vld [vmem:[%s1465_s26 + $0x20] sm:$0xff]   ;;  %v1380_v18 = vld [vmem:[%s1465_s26 + $0x28] sm:$0xff]  }
  0x14   : > { %1281 = vmatpush3.bf16.msra.mxu0 %v1365_v3  ;;  %1333 = vmatpush3.bf16.msra.mxu1 %v1365_v3  ;;  %v1377_v15 = vld [vmem:[%s1465_s26 + $0x58] sm:$0xff]   ;;  %v1379_v17 = vld [vmem:[%s1465_s26 + $0x60] sm:$0xff]   ;;  %v1381_v19 = vld [vmem:[%s1465_s26 + $0x68] sm:$0xff]  }
  0x15   : > { %1282 = vmatprep.subr.bf16.mxu0 %v1366_v6  ;;  %1326 = vmatprep.subr.bf16.mxu1 %v1366_v6  ;;  %v1382_v20 = vld [vmem:[%s1465_s26 + $0x30] sm:$0xff]   ;;  %v1384_v22 = vld [vmem:[%s1465_s26 + $0x38] sm:$0xff]  }
  0x16   : > { %v1383_v21 = vld [vmem:[%s1465_s26 + $0x70] sm:$0xff]   ;;  %v1385_v23 = vld [vmem:[%s1465_s26 + $0x78] sm:$0xff]  }
  0x18   : > { %1283 = vmatpush3.bf16.msra.mxu0 %v1366_v6  ;;  %1334 = vmatpush3.bf16.msra.mxu1 %v1366_v6 }
  0x19   : > { %1284 = vmatprep.subr.bf16.mxu0 %v1367_v7  ;;  %1327 = vmatprep.subr.bf16.mxu1 %v1367_v7 }
  0x1c   : > { %1285 = vmatpush3.bf16.msra.mxu0 %v1367_v7  ;;  %1335 = vmatpush3.bf16.msra.mxu1 %v1367_v7 }
  0x1d   : > { %1286 = vmatprep.subr.bf16.mxu0 %v1368_v8  ;;  %1328 = vmatprep.subr.bf16.mxu1 %v1368_v8 }
  0x20   : > { %1287 = vmatpush3.bf16.msra.mxu0 %v1368_v8  ;;  %1336 = vmatpush3.bf16.msra.mxu1 %v1368_v8 }
  0x21   : > { %1288 = vmatprep.subr.bf16.mxu0 %v1369_v9  ;;  %1329 = vmatprep.subr.bf16.mxu1 %v1369_v9 }
  0x24   : > { %1289 = vmatpush3.bf16.msra.mxu0 %v1369_v9  ;;  %1337 = vmatpush3.bf16.msra.mxu1 %v1369_v9 }
  0x27   : > { %1291 = vmatmul.mubr.bf16.vlgmr.msra.gmra.mrb[0].mxu0 %v1372_v10  ;;  %1307 = vmatmul.mubr.bf16.vlgmr.msra.gmra.mrb[0].mxu1 %v1373_v11 }
  0x28   : > { %1294 = vmatprep.mubr.bf16.mxu0 %v1374_v12  ;;  %1310 = vmatprep.mubr.bf16.mxu1 %v1375_v13 }
  0x2f   : > { %1295 = vmatmul.mubr.bf16.gmra.mrb[4].mxu0 %v1376_v14  ;;  %1311 = vmatmul.mubr.bf16.gmra.mrb[4].mxu1 %v1377_v15 }
  0x30   : > { %1298 = vmatprep.mubr.bf16.mxu0 %v1378_v16  ;;  %1314 = vmatprep.mubr.bf16.mxu1 %v1379_v17 }
  0x37   : > { %1299 = vmatmul.mubr.bf16.gmra.mrb[8].mxu0 %v1380_v18  ;;  %1315 = vmatmul.mubr.bf16.gmra.mrb[8].mxu1 %v1381_v19 }
  0x38   : > { %1302 = vmatprep.mubr.bf16.mxu0 %v1382_v20  ;;  %1318 = vmatprep.mubr.bf16.mxu1 %v1383_v21 }
  0x3f   : > { %1303 = vmatmul.mubr.bf16.gmra.mrb[12].mxu0 %v1384_v22  ;;  %1319 = vmatmul.mubr.bf16.gmra.mrb[12].mxu1 %v1385_v23 }
  0xfa   : > { %v1292_v25 = vpop.f32.mrb[0].mxu0  ;;  %v1308_v26 = vpop.f32.mrb[0].mxu1 }
  0xfb   : > { %v749_v27 = vadd.f32 %v1292_v25, %v1501_v24  ;;  %v765_v28 = vadd.f32 %v1308_v26, %v1501_v24  ;;  %v514_v29 = vpop.f32.mrb[1].mxu0  ;;  %v578_v30 = vpop.f32.mrb[1].mxu1 }
  0xfc   : > { %v747_v31 = vadd.f32 %v1501_v24, %v514_v29  ;;  %v763_v32 = vadd.f32 %v1501_v24, %v578_v30  ;;  %v1293_v33 = vpop.f32.mrb[2].mxu0  ;;  %v1309_v34 = vpop.f32.mrb[2].mxu1 }
  0xfd   : > { %v750_v35 = vadd.f32 %v1293_v33, %v1501_v24  ;;  %v766_v36 = vadd.f32 %v1309_v34, %v1501_v24  ;;  %v517_v37 = vpop.f32.mrb[3].mxu0  ;;  %v581_v38 = vpop.f32.mrb[3].mxu1  ;;  %v781_v41 = vmax.f32 %v749_v27, 0.0  ;;  %v797_v42 = vmax.f32 %v765_v28, 0.0 }
  0xfe   : > { %v748_v39 = vadd.f32 %v1501_v24, %v517_v37  ;;  %v764_v40 = vadd.f32 %v1501_v24, %v581_v38  ;;  %v779_v45 = vmax.f32 %v747_v31, 0.0  ;;  %v795_v46 = vmax.f32 %v763_v32, 0.0 }
  0xff   : > { %v782_v43 = vmax.f32 %v750_v35, 0.0  ;;  %v798_v44 = vmax.f32 %v766_v36, 0.0 }
 0x100   : > { %v780_v47 = vmax.f32 %v748_v39, 0.0  ;;  %v796_v48 = vmax.f32 %v764_v40, 0.0 }
 0x101   : > { %v1163_v49 = vpack.c.bf16 %v782_v43, %v781_v41  ;;  %v1203_v50 = vpack.c.bf16 %v798_v44, %v797_v42 }
 0x102   : > { %v1158_v51 = vpack.c.bf16 %v780_v47, %v779_v45  ;;  %v1198_v52 = vpack.c.bf16 %v796_v48, %v795_v46  ;;  %v1296_v53 = vpop.f32.mrb[4].mxu0  ;;  %v1312_v54 = vpop.f32.mrb[4].mxu1 }
 0x103   : > { %1235 = vst [vmem:[%s1516_s17 + $0x8] sm:$0xff] %v1163_v49   ;;  %1243 = vst [vmem:[%s1516_s17 + $0x48] sm:$0xff] %v1203_v50   ;;  %v753_v55 = vadd.f32 %v1296_v53, %v1501_v24  ;;  %v769_v56 = vadd.f32 %v1312_v54, %v1501_v24  ;;  %v530_v57 = vpop.f32.mrb[5].mxu0  ;;  %v594_v58 = vpop.f32.mrb[5].mxu1 }
 0x104   : > { %1159 = vst [vmem:[%s1516_s17] sm:$0xff] %v1158_v51   ;;  %1242 = vst [vmem:[%s1516_s17 + $0x40] sm:$0xff] %v1198_v52   ;;  %v751_v59 = vadd.f32 %v1501_v24, %v530_v57  ;;  %v767_v60 = vadd.f32 %v1501_v24, %v594_v58  ;;  %v1297_v61 = vpop.f32.mrb[6].mxu0  ;;  %v1313_v62 = vpop.f32.mrb[6].mxu1 }
 0x105   : > { %v754_v63 = vadd.f32 %v1297_v61, %v1501_v24  ;;  %v770_v0 = vadd.f32 %v1313_v62, %v1501_v24  ;;  %v533_v1 = vpop.f32.mrb[7].mxu0  ;;  %v597_v2 = vpop.f32.mrb[7].mxu1  ;;  %v785_v5 = vmax.f32 %v753_v55, 0.0  ;;  %v801_v6 = vmax.f32 %v769_v56, 0.0 }
 0x106   : > { %v752_v3 = vadd.f32 %v1501_v24, %v533_v1  ;;  %v768_v4 = vadd.f32 %v1501_v24, %v597_v2  ;;  %v783_v9 = vmax.f32 %v751_v59, 0.0  ;;  %v799_v10 = vmax.f32 %v767_v60, 0.0 }
 0x107   : > { %v786_v7 = vmax.f32 %v754_v63, 0.0  ;;  %v802_v8 = vmax.f32 %v770_v0, 0.0 }
 0x108   : > { %v784_v11 = vmax.f32 %v752_v3, 0.0  ;;  %v800_v12 = vmax.f32 %v768_v4, 0.0 }
 0x109   : > { %v1173_v13 = vpack.c.bf16 %v786_v7, %v785_v5  ;;  %v1213_v14 = vpack.c.bf16 %v802_v8, %v801_v6 }
 0x10a   : > { %v1168_v15 = vpack.c.bf16 %v784_v11, %v783_v9  ;;  %v1208_v16 = vpack.c.bf16 %v800_v12, %v799_v10  ;;  %v1300_v17 = vpop.f32.mrb[8].mxu0  ;;  %v1316_v18 = vpop.f32.mrb[8].mxu1 }
 0x10b   : > { %1237 = vst [vmem:[%s1516_s17 + $0x18] sm:$0xff] %v1173_v13   ;;  %1245 = vst [vmem:[%s1516_s17 + $0x58] sm:$0xff] %v1213_v14   ;;  %v757_v19 = vadd.f32 %v1300_v17, %v1501_v24  ;;  %v773_v20 = vadd.f32 %v1316_v18, %v1501_v24  ;;  %v546_v21 = vpop.f32.mrb[9].mxu0  ;;  %v610_v22 = vpop.f32.mrb[9].mxu1 }
 0x10c   : > { %1236 = vst [vmem:[%s1516_s17 + $0x10] sm:$0xff] %v1168_v15   ;;  %1244 = vst [vmem:[%s1516_s17 + $0x50] sm:$0xff] %v1208_v16   ;;  %v755_v23 = vadd.f32 %v1501_v24, %v546_v21  ;;  %v771_v25 = vadd.f32 %v1501_v24, %v610_v22  ;;  %v1301_v26 = vpop.f32.mrb[10].mxu0  ;;  %v1317_v27 = vpop.f32.mrb[10].mxu1 }
 0x10d   : > { %v758_v28 = vadd.f32 %v1301_v26, %v1501_v24  ;;  %v774_v29 = vadd.f32 %v1317_v27, %v1501_v24  ;;  %v549_v30 = vpop.f32.mrb[11].mxu0  ;;  %v613_v31 = vpop.f32.mrb[11].mxu1  ;;  %v789_v34 = vmax.f32 %v757_v19, 0.0  ;;  %v805_v35 = vmax.f32 %v773_v20, 0.0 }
 0x10e   : > { %v756_v32 = vadd.f32 %v1501_v24, %v549_v30  ;;  %v772_v33 = vadd.f32 %v1501_v24, %v613_v31  ;;  %v787_v38 = vmax.f32 %v755_v23, 0.0  ;;  %v803_v39 = vmax.f32 %v771_v25, 0.0 }
 0x10f   : > { %v790_v36 = vmax.f32 %v758_v28, 0.0  ;;  %v806_v37 = vmax.f32 %v774_v29, 0.0 }
 0x110   : > { %v788_v40 = vmax.f32 %v756_v32, 0.0  ;;  %v804_v41 = vmax.f32 %v772_v33, 0.0 }
 0x111   : > { %v1183_v42 = vpack.c.bf16 %v790_v36, %v789_v34  ;;  %v1223_v43 = vpack.c.bf16 %v806_v37, %v805_v35 }
 0x112   : > { %v1178_v44 = vpack.c.bf16 %v788_v40, %v787_v38  ;;  %v1218_v45 = vpack.c.bf16 %v804_v41, %v803_v39  ;;  %v1304_v46 = vpop.f32.mrb[12].mxu0  ;;  %v1320_v47 = vpop.f32.mrb[12].mxu1 }
 0x113   : > { %1239 = vst [vmem:[%s1516_s17 + $0x28] sm:$0xff] %v1183_v42   ;;  %1247 = vst [vmem:[%s1516_s17 + $0x68] sm:$0xff] %v1223_v43   ;;  %v761_v48 = vadd.f32 %v1304_v46, %v1501_v24  ;;  %v777_v49 = vadd.f32 %v1320_v47, %v1501_v24  ;;  %v562_v50 = vpop.f32.mrb[13].mxu0  ;;  %v626_v51 = vpop.f32.mrb[13].mxu1 }
 0x114   : > { %1238 = vst [vmem:[%s1516_s17 + $0x20] sm:$0xff] %v1178_v44   ;;  %1246 = vst [vmem:[%s1516_s17 + $0x60] sm:$0xff] %v1218_v45   ;;  %v759_v52 = vadd.f32 %v1501_v24, %v562_v50  ;;  %v775_v53 = vadd.f32 %v1501_v24, %v626_v51  ;;  %v1305_v54 = vpop.f32.mrb[14].mxu0  ;;  %v1321_v55 = vpop.f32.mrb[14].mxu1 }
 0x115   : > { %v762_v56 = vadd.f32 %v1305_v54, %v1501_v24  ;;  %v778_v57 = vadd.f32 %v1321_v55, %v1501_v24  ;;  %v565_v58 = vpop.f32.mrb[15].mxu0  ;;  %v629_v59 = vpop.f32.mrb[15].mxu1  ;;  %v793_v62 = vmax.f32 %v761_v48, 0.0  ;;  %v809_v63 = vmax.f32 %v777_v49, 0.0 }
 0x116   : > { %v760_v60 = vadd.f32 %v1501_v24, %v565_v58  ;;  %v776_v61 = vadd.f32 %v1501_v24, %v629_v59  ;;  %v791_v2 = vmax.f32 %v759_v52, 0.0  ;;  %v807_v3 = vmax.f32 %v775_v53, 0.0 }
 0x117   : > { %v794_v0 = vmax.f32 %v762_v56, 0.0  ;;  %v810_v1 = vmax.f32 %v778_v57, 0.0 }
 0x118   : > { %v792_v4 = vmax.f32 %v760_v60, 0.0  ;;  %v808_v5 = vmax.f32 %v776_v61, 0.0 }
 0x119   : > { %v1193_v6 = vpack.c.bf16 %v794_v0, %v793_v62  ;;  %v1233_v7 = vpack.c.bf16 %v810_v1, %v809_v63 }
 0x11a   : > { %v1188_v8 = vpack.c.bf16 %v792_v4, %v791_v2  ;;  %v1228_v9 = vpack.c.bf16 %v808_v5, %v807_v3 }
 0x11b   : > { %1241 = vst [vmem:[%s1516_s17 + $0x38] sm:$0xff] %v1193_v6   ;;  %1249 = vst [vmem:[%s1516_s17 + $0x78] sm:$0xff] %v1233_v7  }
 0x11c   : > { %1240 = vst [vmem:[%s1516_s17 + $0x30] sm:$0xff] %v1188_v8   ;;  %1248 = vst [vmem:[%s1516_s17 + $0x70] sm:$0xff] %v1228_v9  }
 0x11d PF: > { %s13_s14 = sadd.s32 1, %s1408_s14   ;;  %s1571_s12 = smov %s1404_s13 }
 0x11e   : > { %p10_p5 = scmp.ge.s32.totalorder %s13_s14, 4   ;;  %s1572_s13 = smov %s1574_s15 }
 0x120   :  { %12 = sbr.rel (!%p10_p5) target bundleno = 2 (0x2), region = 73 }

// kernel: vae_forward.9
= control target key start
LH: loop header
LB: loop body
LE: loop exit
PB: predicated region body
PF: predicated region fallthrough
CT: control target
= control target key end

     0   :  { %v968_v1 = vmov 0.0   ;;  %vm969_vm0 = vmmov 0   ;;  %s1183_s1 = inlined_call_operand.vmem [shape: bf16[384,128], index: 1, kind: input, shape index: {}]   ;;  %s1184_s0 = inlined_call_operand.vmem [shape: bf16[104,384], index: 0, kind: input, shape index: {}]   ;;  %s1185_s2 = inlined_call_operand.vmem [shape: f32[1,128], index: 2, kind: input, shape index: {}]   ;;  %s1186_s3 = inlined_call_operand.vmem [shape: bf16[104,128], index: 3, kind: output, shape index: {}]  }
   0x1   :  { %v917_v0 = vld [vmem:[%s1183_s1 + $0x40] sm:$0xff]   ;;  %871 = vmatprep.subr.bf16.mxu1 %v968_v1  ;;  %887 = vmatprep.mubr.msk.bf16.mxu1 %vm969_vm0, %v968_v1  ;;  %v920_v4 = vld [vmem:[%s1183_s1 + $0x48] sm:$0xff]   ;;  %v923_v7 = vld [vmem:[%s1183_s1 + $0x50] sm:$0xff]  }
   0x2   :  { %v918_v2 = vld [vmem:[%s1183_s1] sm:$0xff]   ;;  %798 = vmatprep.subr.bf16.mxu0 %v917_v0  ;;  %v921_v5 = vld [vmem:[%s1183_s1 + $0x8] sm:$0xff]   ;;  %v924_v8 = vld [vmem:[%s1183_s1 + $0x10] sm:$0xff]  }
   0x3   :  { %v919_v3 = vld [vmem:[%s1183_s1 + $0x80] sm:$0xff]   ;;  %799 = vmatpush3.bf16.msra.mxu0 %v918_v2  ;;  %v922_v6 = vld [vmem:[%s1183_s1 + $0x88] sm:$0xff]   ;;  %v925_v9 = vld [vmem:[%s1183_s1 + $0x90] sm:$0xff]  }
   0x4   :  { %872 = vmatpush3.bf16.msra.mxu1 %v919_v3  ;;  %800 = vmatprep.subr.bf16.mxu0 %v920_v4  ;;  %v926_v10 = vld [vmem:[%s1183_s1 + $0x58] sm:$0xff]   ;;  %v929_v13 = vld [vmem:[%s1183_s1 + $0x60] sm:$0xff]   ;;  %v932_v16 = vld [vmem:[%s1183_s1 + $0x68] sm:$0xff]  }
   0x5   :  { %873 = vmatprep.subr.bf16.mxu1 %v968_v1  ;;  %v927_v11 = vld [vmem:[%s1183_s1 + $0x18] sm:$0xff]   ;;  %v930_v14 = vld [vmem:[%s1183_s1 + $0x20] sm:$0xff]   ;;  %v933_v17 = vld [vmem:[%s1183_s1 + $0x28] sm:$0xff]  }
   0x6   :  { %v928_v12 = vld [vmem:[%s1183_s1 + $0x98] sm:$0xff]   ;;  %v931_v15 = vld [vmem:[%s1183_s1 + $0xa0] sm:$0xff]   ;;  %v934_v18 = vld [vmem:[%s1183_s1 + $0xa8] sm:$0xff]  }
   0x7   :  { %801 = vmatpush3.bf16.msra.mxu0 %v921_v5  ;;  %v935_v19 = vld [vmem:[%s1183_s1 + $0x70] sm:$0xff]   ;;  %v938_v22 = vld [vmem:[%s1183_s1 + $0x78] sm:$0xff]   ;;  %v941_v26 = vld [vmem:[%s1184_s0] ss:$12 sps:$4 sm:$0xff]  }
   0x8   :  { %874 = vmatpush3.bf16.msra.mxu1 %v922_v6  ;;  %802 = vmatprep.subr.bf16.mxu0 %v923_v7  ;;  %v936_v20 = vld [vmem:[%s1183_s1 + $0x30] sm:$0xff]   ;;  %v939_v24 = vld [vmem:[%s1183_s1 + $0x38] sm:$0xff]   ;;  %v948_v30 = vld [vmem:[%s1184_s0 + $0x20] ss:$12 sps:$4 sm:$0xff]  }
   0x9   :  { %875 = vmatprep.subr.bf16.mxu1 %v968_v1  ;;  %v937_v21 = vld [vmem:[%s1183_s1 + $0xb0] sm:$0xff]   ;;  %v940_v25 = vld [vmem:[%s1183_s1 + $0xb8] sm:$0xff]   ;;  %v959_v38 = vld [vmem:[%s1184_s0 + $0x60] ss:$12 sps:$4 sm:$0xff]  }
   0xa   :  { %v943_v23 = vld [vmem:[%s1184_s0 + $0x4] ss:$12 sps:$4 sm:$0xff]   ;;  %v944_v27 = vld [vmem:[%s1184_s0 + $0x8] ss:$12 sps:$4 sm:$0xff]   ;;  %v953_v34 = vld [vmem:[%s1184_s0 + $0x4c] ss:$12 sps:$4 sm:$0xff]  }
   0xb   :  { %803 = vmatpush3.bf16.msra.mxu0 %v924_v8  ;;  %402 = vmatprep.mubr.bf16.mxu0 %v943_v23  ;;  %v945_v28 = vld [vmem:[%s1184_s0 + $0x1c] ss:$12 sps:$4 sm:$0xff]   ;;  %v947_v29 = vld [vmem:[%s1184_s0 + $0x18] ss:$12 sps:$4 sm:$0xff]   ;;  %v949_v31 = vld [vmem:[%s1184_s0 + $0x34] ss:$12 sps:$4 sm:$0xff]  }
   0xc   :  { %876 = vmatpush3.bf16.msra.mxu1 %v925_v9  ;;  %804 = vmatprep.subr.bf16.mxu0 %v926_v10  ;;  %v951_v32 = vld [vmem:[%s1184_s0 + $0x30] ss:$12 sps:$4 sm:$0xff]   ;;  %v952_v33 = vld [vmem:[%s1184_s0 + $0x38] ss:$12 sps:$4 sm:$0xff]   ;;  %v955_v35 = vld [vmem:[%s1184_s0 + $0x48] ss:$12 sps:$4 sm:$0xff]  }
   0xd   :  { %877 = vmatprep.subr.bf16.mxu1 %v968_v1  ;;  %v956_v36 = vld [vmem:[%s1184_s0 + $0x50] ss:$12 sps:$4 sm:$0xff]   ;;  %v960_v39 = vld [vmem:[%s1184_s0 + $0x68] ss:$12 sps:$4 sm:$0xff]   ;;  %v963_v42 = vld [vmem:[%s1184_s0 + $0x78] ss:$12 sps:$4 sm:$0xff]  }
   0xe   :  { %v957_v37 = vld [vmem:[%s1184_s0 + $0x64] ss:$12 sps:$4 sm:$0xff]   ;;  %v961_v40 = vld [vmem:[%s1184_s0 + $0x7c] ss:$12 sps:$4 sm:$0xff]   ;;  %v964_v43 = vld [vmem:[%s1184_s0 + $0x80] ss:$12 sps:$4 sm:$0xff]  }
   0xf   :  { %805 = vmatpush3.bf16.msra.mxu0 %v927_v11  ;;  %v69_v41 = vld [vmem:[%s1184_s0 + $0x90] sm:$0xff]  ;;  %v967_v46 = vld [vmem:[%s1184_s0 + $0x98] ss:$0 sps:$4 sm:$0xff]   ;;  %v1147_v53 = vld [vmem:[%s1185_s2] ss:$0 sm:$0xff] }
  0x10   :  { %878 = vmatpush3.bf16.msra.mxu1 %v928_v12  ;;  %806 = vmatprep.subr.bf16.mxu0 %v929_v13  ;;  %v710_v44 = vcombine.high %v69_v41, %v69_v41  ;;  %v709_v45 = vcombine.low %v69_v41, %v69_v41 }
  0x11   :  { %879 = vmatprep.subr.bf16.mxu1 %v968_v1 }
  0x13   :  { %807 = vmatpush3.bf16.msra.mxu0 %v930_v14 }
  0x14   :  { %880 = vmatpush3.bf16.msra.mxu1 %v931_v15  ;;  %808 = vmatprep.subr.bf16.mxu0 %v932_v16 }
  0x15   :  { %881 = vmatprep.subr.bf16.mxu1 %v968_v1 }
  0x17   :  { %809 = vmatpush3.bf16.msra.mxu0 %v933_v17 }
  0x18   :  { %882 = vmatpush3.bf16.msra.mxu1 %v934_v18  ;;  %810 = vmatprep.subr.bf16.mxu0 %v935_v19 }
  0x19   :  { %883 = vmatprep.subr.bf16.mxu1 %v968_v1 }
  0x1b   :  { %811 = vmatpush3.bf16.msra.mxu0 %v936_v20 }
  0x1c   :  { %884 = vmatpush3.bf16.msra.mxu1 %v937_v21  ;;  %812 = vmatprep.subr.bf16.mxu0 %v938_v22 }
  0x1d   :  { %885 = vmatprep.subr.bf16.mxu1 %v968_v1 }
  0x1f   :  { %813 = vmatpush3.bf16.msra.mxu0 %v939_v24 }
  0x20   :  { %886 = vmatpush3.bf16.msra.mxu1 %v940_v25 }
  0x22   :  { %403 = vmatmul.mubr.bf16.vlgmr.msra.gmra.mrb[0].mxu0 %v941_v26 }
  0x23   :  { %888 = vmatmul.mubr.bf16.vlgmr.msra.gmra.mrb[0].mxu1 %v944_v27  ;;  %410 = vmatprep.mubr.bf16.mxu0 %v945_v28 }
  0x24   :  { %891 = vmatprep.mubr.msk.bf16.mxu1 %vm969_vm0, %v968_v1 }
  0x2a   :  { %411 = vmatmul.mubr.bf16.gmra.mrb[4].mxu0 %v947_v29 }
  0x2b   :  { %892 = vmatmul.mubr.bf16.gmra.mrb[4].mxu1 %v948_v30  ;;  %418 = vmatprep.mubr.bf16.mxu0 %v949_v31 }
  0x2c   :  { %895 = vmatprep.mubr.msk.bf16.mxu1 %vm969_vm0, %v968_v1 }
  0x32   :  { %419 = vmatmul.mubr.bf16.gmra.mrb[8].mxu0 %v951_v32 }
  0x33   :  { %896 = vmatmul.mubr.bf16.gmra.mrb[8].mxu1 %v952_v33  ;;  %426 = vmatprep.mubr.bf16.mxu0 %v953_v34 }
  0x34   :  { %899 = vmatprep.mubr.msk.bf16.mxu1 %vm969_vm0, %v968_v1 }
  0x3a   :  { %427 = vmatmul.mubr.bf16.gmra.mrb[12].mxu0 %v955_v35 }
  0x3b   :  { %900 = vmatmul.mubr.bf16.gmra.mrb[12].mxu1 %v956_v36  ;;  %434 = vmatprep.mubr.bf16.mxu0 %v957_v37 }
  0x3c   :  { %903 = vmatprep.mubr.msk.bf16.mxu1 %vm969_vm0, %v968_v1 }
  0x42   :  { %435 = vmatmul.mubr.bf16.gmra.mrb[16].mxu0 %v959_v38 }
  0x43   :  { %904 = vmatmul.mubr.bf16.gmra.mrb[16].mxu1 %v960_v39  ;;  %442 = vmatprep.mubr.bf16.mxu0 %v961_v40 }
  0x44   :  { %907 = vmatprep.mubr.msk.bf16.mxu1 %vm969_vm0, %v968_v1 }
  0x4a   :  { %443 = vmatmul.mubr.bf16.gmra.mrb[20].mxu0 %v963_v42 }
  0x4b   :  { %908 = vmatmul.mubr.bf16.gmra.mrb[20].mxu1 %v964_v43  ;;  %450 = vmatprep.mubr.bf16.mxu0 %v710_v44 }
  0x4c   :  { %911 = vmatprep.mubr.msk.bf16.mxu1 %vm969_vm0, %v968_v1 }
  0x52   :  { %451 = vmatmul.mubr.bf16.gmra.mrb[24].mxu0 %v709_v45 }
  0x53   :  { %912 = vmatmul.mubr.bf16.gmra.mrb[24].mxu1 %v967_v46 }
  0xf5   :  { %v814_v47 = vpop.f32.mrb[0].mxu0 }
  0xf6   :  { %v492_v48 = vpop.f32.mrb[0].mxu1  ;;  %v815_v49 = vpop.f32.mrb[1].mxu0 }
  0xf7   :  { %v816_v50 = vadd.f32 %v815_v49, %v814_v47  ;;  %v889_v51 = vpop.f32.mrb[1].mxu1  ;;  %v817_v52 = vpop.f32.mrb[2].mxu0 }
  0xf8   :  { %v495_v54 = vpop.f32.mrb[2].mxu1  ;;  %v818_v55 = vpop.f32.mrb[3].mxu0 }
  0xf9   :  { %v493_v56 = vadd.f32 %v816_v50, %v492_v48  ;;  %v819_v57 = vadd.f32 %v818_v55, %v817_v52  ;;  %v890_v58 = vpop.f32.mrb[3].mxu1 }
  0xfb   :  { %v595_v59 = vadd.f32 %v1147_v53, %v493_v56  ;;  %v496_v60 = vadd.f32 %v819_v57, %v495_v54 }
  0xfd   :  { %v596_v61 = vadd.f32 %v1147_v53, %v496_v60  ;;  %v820_v62 = vpop.f32.mrb[4].mxu0  ;;  %v608_v1 = vmax.f32 %v595_v59, 0.0 }
  0xfe   :  { %v500_v63 = vpop.f32.mrb[4].mxu1  ;;  %v821_v0 = vpop.f32.mrb[5].mxu0 }
  0xff   :  { %v609_v2 = vmax.f32 %v596_v61, 0.0  ;;  %v822_v3 = vadd.f32 %v821_v0, %v820_v62  ;;  %v893_v4 = vpop.f32.mrb[5].mxu1  ;;  %v823_v5 = vpop.f32.mrb[6].mxu0 }
 0x100   :  { %v503_v6 = vpop.f32.mrb[6].mxu1  ;;  %v824_v7 = vpop.f32.mrb[7].mxu0 }
 0x101   :  { %v766_v8 = vpack.c.bf16 %v609_v2, %v608_v1  ;;  %v501_v9 = vadd.f32 %v822_v3, %v500_v63  ;;  %v825_v10 = vadd.f32 %v824_v7, %v823_v5  ;;  %v894_v11 = vpop.f32.mrb[7].mxu1 }
 0x103   :  { %767 = vst [vmem:[%s1186_s3] sm:$0xff] %v766_v8   ;;  %v597_v12 = vadd.f32 %v1147_v53, %v501_v9  ;;  %v504_v13 = vadd.f32 %v825_v10, %v503_v6 }
 0x105   :  { %v598_v14 = vadd.f32 %v1147_v53, %v504_v13  ;;  %v826_v15 = vpop.f32.mrb[8].mxu0  ;;  %v610_v18 = vmax.f32 %v597_v12, 0.0 }
 0x106   :  { %v508_v16 = vpop.f32.mrb[8].mxu1  ;;  %v827_v17 = vpop.f32.mrb[9].mxu0 }
 0x107   :  { %v611_v19 = vmax.f32 %v598_v14, 0.0  ;;  %v828_v20 = vadd.f32 %v827_v17, %v826_v15  ;;  %v897_v21 = vpop.f32.mrb[9].mxu1  ;;  %v829_v22 = vpop.f32.mrb[10].mxu0 }
 0x108   :  { %v511_v23 = vpop.f32.mrb[10].mxu1  ;;  %v830_v24 = vpop.f32.mrb[11].mxu0 }
 0x109   :  { %v771_v25 = vpack.c.bf16 %v611_v19, %v610_v18  ;;  %v509_v26 = vadd.f32 %v828_v20, %v508_v16  ;;  %v831_v27 = vadd.f32 %v830_v24, %v829_v22  ;;  %v898_v28 = vpop.f32.mrb[11].mxu1 }
 0x10b   :  { %793 = vst [vmem:[%s1186_s3 + $0x8] sm:$0xff] %v771_v25   ;;  %v599_v29 = vadd.f32 %v1147_v53, %v509_v26  ;;  %v512_v30 = vadd.f32 %v831_v27, %v511_v23 }
 0x10d   :  { %v600_v31 = vadd.f32 %v1147_v53, %v512_v30  ;;  %v832_v32 = vpop.f32.mrb[12].mxu0  ;;  %v612_v35 = vmax.f32 %v599_v29, 0.0 }
 0x10e   :  { %v516_v33 = vpop.f32.mrb[12].mxu1  ;;  %v833_v34 = vpop.f32.mrb[13].mxu0 }
 0x10f   :  { %v613_v36 = vmax.f32 %v600_v31, 0.0  ;;  %v834_v37 = vadd.f32 %v833_v34, %v832_v32  ;;  %v901_v38 = vpop.f32.mrb[13].mxu1  ;;  %v835_v39 = vpop.f32.mrb[14].mxu0 }
 0x110   :  { %v519_v40 = vpop.f32.mrb[14].mxu1  ;;  %v836_v41 = vpop.f32.mrb[15].mxu0 }
 0x111   :  { %v776_v42 = vpack.c.bf16 %v613_v36, %v612_v35  ;;  %v517_v43 = vadd.f32 %v834_v37, %v516_v33  ;;  %v837_v44 = vadd.f32 %v836_v41, %v835_v39  ;;  %v902_v45 = vpop.f32.mrb[15].mxu1 }
 0x113   :  { %794 = vst [vmem:[%s1186_s3 + $0x10] sm:$0xff] %v776_v42   ;;  %v601_v46 = vadd.f32 %v1147_v53, %v517_v43  ;;  %v520_v47 = vadd.f32 %v837_v44, %v519_v40 }
 0x115   :  { %v602_v48 = vadd.f32 %v1147_v53, %v520_v47  ;;  %v838_v49 = vpop.f32.mrb[16].mxu0  ;;  %v614_v52 = vmax.f32 %v601_v46, 0.0 }
 0x116   :  { %v524_v50 = vpop.f32.mrb[16].mxu1  ;;  %v839_v51 = vpop.f32.mrb[17].mxu0 }
 0x117   :  { %v615_v54 = vmax.f32 %v602_v48, 0.0  ;;  %v840_v55 = vadd.f32 %v839_v51, %v838_v49  ;;  %v905_v56 = vpop.f32.mrb[17].mxu1  ;;  %v841_v57 = vpop.f32.mrb[18].mxu0 }
 0x118   :  { %v527_v58 = vpop.f32.mrb[18].mxu1  ;;  %v842_v59 = vpop.f32.mrb[19].mxu0 }
 0x119   :  { %v781_v60 = vpack.c.bf16 %v615_v54, %v614_v52  ;;  %v525_v61 = vadd.f32 %v840_v55, %v524_v50  ;;  %v843_v62 = vadd.f32 %v842_v59, %v841_v57  ;;  %v906_v63 = vpop.f32.mrb[19].mxu1 }
 0x11b   :  { %795 = vst [vmem:[%s1186_s3 + $0x18] sm:$0xff] %v781_v60   ;;  %v603_v0 = vadd.f32 %v1147_v53, %v525_v61  ;;  %v528_v1 = vadd.f32 %v843_v62, %v527_v58 }
 0x11d   :  { %v604_v2 = vadd.f32 %v1147_v53, %v528_v1  ;;  %v844_v3 = vpop.f32.mrb[20].mxu0  ;;  %v616_v6 = vmax.f32 %v603_v0, 0.0 }
 0x11e   :  { %v532_v4 = vpop.f32.mrb[20].mxu1  ;;  %v845_v5 = vpop.f32.mrb[21].mxu0 }
 0x11f   :  { %v617_v7 = vmax.f32 %v604_v2, 0.0  ;;  %v846_v8 = vadd.f32 %v845_v5, %v844_v3  ;;  %v909_v9 = vpop.f32.mrb[21].mxu1  ;;  %v847_v10 = vpop.f32.mrb[22].mxu0 }
 0x120   :  { %v535_v11 = vpop.f32.mrb[22].mxu1  ;;  %v848_v12 = vpop.f32.mrb[23].mxu0 }
 0x121   :  { %v786_v13 = vpack.c.bf16 %v617_v7, %v616_v6  ;;  %v533_v14 = vadd.f32 %v846_v8, %v532_v4  ;;  %v849_v15 = vadd.f32 %v848_v12, %v847_v10  ;;  %v910_v16 = vpop.f32.mrb[23].mxu1 }
 0x123   :  { %796 = vst [vmem:[%s1186_s3 + $0x20] sm:$0xff] %v786_v13   ;;  %v605_v17 = vadd.f32 %v1147_v53, %v533_v14  ;;  %v536_v18 = vadd.f32 %v849_v15, %v535_v11 }
 0x125   :  { %v606_v19 = vadd.f32 %v1147_v53, %v536_v18  ;;  %v850_v20 = vpop.f32.mrb[24].mxu0  ;;  %v618_v23 = vmax.f32 %v605_v17, 0.0 }
 0x126   :  { %v540_v21 = vpop.f32.mrb[24].mxu1  ;;  %v851_v22 = vpop.f32.mrb[25].mxu0 }
 0x127   :  { %v619_v24 = vmax.f32 %v606_v19, 0.0  ;;  %v852_v25 = vadd.f32 %v851_v22, %v850_v20  ;;  %v913_v26 = vpop.f32.mrb[25].mxu1  ;;  %v853_v27 = vpop.f32.mrb[26].mxu0 }
 0x128   :  { %v543_v28 = vpop.f32.mrb[26].mxu1  ;;  %v854_v29 = vpop.f32.mrb[27].mxu0 }
 0x129   :  { %v791_v30 = vpack.c.bf16 %v619_v24, %v618_v23  ;;  %v541_v31 = vadd.f32 %v852_v25, %v540_v21  ;;  %v914_v32 = vpop.f32.mrb[27].mxu1 }
 0x12b   :  { %797 = vst [vmem:[%s1186_s3 + $0x28] sm:$0xff] %v791_v30   ;;  %v607_v33 = vadd.f32 %v1147_v53, %v541_v31 }
 0x12d   :  { %v620_v34 = vmax.f32 %v607_v33, 0.0 }
 0x12f   :  { %v762_v35 = vpack.c.bf16 %v620_v34, %v620_v34 }
 0x131   :  { %686 = vst [vmem:[%s1186_s3 + $0x30] sm:$0xf] %v762_v35 }

// kernel: vae_forward.10
= control target key start
LH: loop header
LB: loop body
LE: loop exit
PB: predicated region body
PF: predicated region fallthrough
CT: control target
= control target key end

     0   :  { %s873_s12 = smov 0   ;;  %s875_s13 = smov 0   ;;  %s956_s0 = inlined_call_operand.vmem [shape: bf16[8,3584], index: 0, kind: input, shape index: {}]   ;;  %s957_s1 = inlined_call_operand.vmem [shape: bf16[3584,128], index: 1, kind: input, shape index: {}]   ;;  %s958_s2 = inlined_call_operand.vmem [shape: f32[1,128], index: 2, kind: input, shape index: {}]   ;;  %s959_s3 = inlined_call_operand.vmem [shape: bf16[8,128], index: 3, kind: output, shape index: {}]  }
   0x1   :  { %s877_s14 = smov 0  }
   0x2 LB: > { %s22_s15 = sadd.s32 1, %s846_s13  ;;  %p676_p0 = scmp.ge.s32.totalorder %s850_s14, 1  ;;  %s850_s14 = sphi %s877_s14, %s13_s14   ;;  %s846_s13 = sphi %s875_s13, %s961_s13   ;;  %s842_s12 = sphi %s873_s12, %s960_s12  }
   0x3   : > { %p23_p1 = scmp.ge.s32.totalorder %s22_s15, 7  ;;  %p167_p2 = scmp.lt.s32.totalorder %s850_s14, 8 }
   0x5   : > { %s963_s15 = smov (%p23_p1, %s22_s15), 0  ;;  %p168_p3 = pnand %p676_p0, %p167_p2 }
   0x6   : > { %s677_s16 = sshll.u32 (!%p168_p3), %s842_s12, 2  ;;  %s679_s17 = sshll.u32 (!%p168_p3), %s842_s12, 6 }
   0x7   : > { %171 = sbr.rel (%p168_p3) target bundleno = 293 (0x125), region = 32  ;;  %p202_p4 = scmp.lt.s32.totalorder (!%p168_p3), %s677_s16, 27 }
   0x8   : > { %p210_p5 = scmp.lt.s32.totalorder (!%p168_p3), %s679_s17, 447  ;;  %p681_p6 = scmp.ne.s32.totalorder (!%p168_p3), %s842_s12, 0 }
   0xe   : > { %s965_s16 = smov (!%p202_p4, %s677_s16), 27  ;;  %s967_s17 = smov (!%p210_p5, %s679_s17), 447 }
   0xf   : > { %s678_s18 = sshll.u32 %s965_s16, 2  ;;  %s680_s22 = sshll.u32 %s967_s17, 2  ;;  %v852_v0 = vmov (!%p681_p6), 0.0  }
  0x10   : > { %s898_s21 = scalar_lea.vmem %s956_s0, %s678_s18  ;;  %s903_s25 = scalar_lea.vmem %s957_s1, %s680_s22  ;;  %224 = vst [vmem:[#allocation2] sm:$0xff] (!%p681_p6), %v852_v0 }
  0x11   : > { %223 = sbr.rel (%p681_p6) target bundleno = 24 (0x18), region = 36 }
  0x18 PF: > { %v792_v1 = vld [vmem:[%s903_s25 + $0x40] sm:$0xff]   ;;  %v796_v5 = vld [vmem:[%s903_s25 + $0x48] sm:$0xff]   ;;  %v800_v9 = vld [vmem:[%s903_s25 + $0x50] sm:$0xff]   ;;  %p718_p7 = scmp.ne.s32.totalorder %s842_s12, 6 }
  0x19   : > { %v793_v2 = vld [vmem:[%s903_s25 + $0xc0] sm:$0xff]   ;;  %723 = vmatprep.subr.bf16.mxu0 %v792_v1  ;;  %v797_v6 = vld [vmem:[%s903_s25 + $0xc8] sm:$0xff]   ;;  %v801_v10 = vld [vmem:[%s903_s25 + $0xd0] sm:$0xff]  }
  0x1a   : > { %v794_v3 = vld [vmem:[%s903_s25] sm:$0xff]   ;;  %745 = vmatprep.subr.bf16.mxu1 %v793_v2  ;;  %v798_v7 = vld [vmem:[%s903_s25 + $0x8] sm:$0xff]   ;;  %v802_v11 = vld [vmem:[%s903_s25 + $0x10] sm:$0xff]  }
  0x1b   : > { %v795_v4 = vld [vmem:[%s903_s25 + $0x80] sm:$0xff]   ;;  %724 = vmatpush3.bf16.msra.mxu0 %v794_v3  ;;  %v799_v8 = vld [vmem:[%s903_s25 + $0x88] sm:$0xff]   ;;  %v803_v12 = vld [vmem:[%s903_s25 + $0x90] sm:$0xff]  }
  0x1c   : > { %746 = vmatpush3.bf16.msra.mxu1 %v795_v4  ;;  %725 = vmatprep.subr.bf16.mxu0 %v796_v5  ;;  %v804_v13 = vld [vmem:[%s903_s25 + $0x58] sm:$0xff]   ;;  %v808_v17 = vld [vmem:[%s903_s25 + $0x60] sm:$0xff]   ;;  %v812_v21 = vld [vmem:[%s903_s25 + $0x68] sm:$0xff]  }
  0x1d   : > { %747 = vmatprep.subr.bf16.mxu1 %v797_v6  ;;  %v805_v14 = vld [vmem:[%s903_s25 + $0xd8] sm:$0xff]   ;;  %v809_v18 = vld [vmem:[%s903_s25 + $0xe0] sm:$0xff]   ;;  %v813_v22 = vld [vmem:[%s903_s25 + $0xe8] sm:$0xff]  }
  0x1e   : > { %v806_v15 = vld [vmem:[%s903_s25 + $0x18] sm:$0xff]   ;;  %v810_v19 = vld [vmem:[%s903_s25 + $0x20] sm:$0xff]   ;;  %v814_v23 = vld [vmem:[%s903_s25 + $0x28] sm:$0xff]  }
  0x1f   : > { %726 = vmatpush3.bf16.msra.mxu0 %v798_v7  ;;  %v807_v16 = vld [vmem:[%s903_s25 + $0x98] sm:$0xff]   ;;  %v811_v20 = vld [vmem:[%s903_s25 + $0xa0] sm:$0xff]   ;;  %v815_v24 = vld [vmem:[%s903_s25 + $0xa8] sm:$0xff]  }
  0x20   : > { %748 = vmatpush3.bf16.msra.mxu1 %v799_v8  ;;  %727 = vmatprep.subr.bf16.mxu0 %v800_v9  ;;  %v816_v25 = vld [vmem:[%s903_s25 + $0x70] sm:$0xff]   ;;  %v820_v29 = vld [vmem:[%s903_s25 + $0x78] sm:$0xff]   ;;  %v226_v33 = vld [vmem:[%s898_s21] sm:$0xff] }
  0x21   : > { %749 = vmatprep.subr.bf16.mxu1 %v801_v10  ;;  %v817_v26 = vld [vmem:[%s903_s25 + $0xf0] sm:$0xff]   ;;  %v821_v30 = vld [vmem:[%s903_s25 + $0xf8] sm:$0xff]   ;;  %v227_v34 = vld [vmem:[%s898_s21 + $0x8] sm:$0xff]  ;;  %v682_v35 = vcombine.low %v226_v33, %v226_v33  ;;  %v683_v36 = vcombine.high %v226_v33, %v226_v33 }
  0x22   : > { %v818_v27 = vld [vmem:[%s903_s25 + $0x30] sm:$0xff]   ;;  %v822_v31 = vld [vmem:[%s903_s25 + $0x38] sm:$0xff]   ;;  %v684_v37 = vcombine.low %v227_v34, %v227_v34  ;;  %v685_v38 = vcombine.high %v227_v34, %v227_v34  ;;  %v225_v47 = vld [vmem:[#allocation2] sm:$0xff] }
  0x23   : > { %728 = vmatpush3.bf16.msra.mxu0 %v802_v11  ;;  %v819_v28 = vld [vmem:[%s903_s25 + $0xb0] sm:$0xff]   ;;  %v823_v32 = vld [vmem:[%s903_s25 + $0xb8] sm:$0xff]   ;;  %530 = vmatprep.mubr.bf16.mxu0 %v683_v36  ;;  %v719_v53 = vld [vmem:[%s958_s2] ss:$0 sm:$0xff] (!%p718_p7) }
  0x24   : > { %750 = vmatpush3.bf16.msra.mxu1 %v803_v12  ;;  %729 = vmatprep.subr.bf16.mxu0 %v804_v13 }
  0x25   : > { %751 = vmatprep.subr.bf16.mxu1 %v805_v14  ;;  %570 = vmatprep.mubr.bf16.mxu1 %v685_v38 }
  0x27   : > { %730 = vmatpush3.bf16.msra.mxu0 %v806_v15 }
  0x28   : > { %752 = vmatpush3.bf16.msra.mxu1 %v807_v16  ;;  %731 = vmatprep.subr.bf16.mxu0 %v808_v17 }
  0x29   : > { %753 = vmatprep.subr.bf16.mxu1 %v809_v18 }
  0x2b   : > { %732 = vmatpush3.bf16.msra.mxu0 %v810_v19 }
  0x2c   : > { %754 = vmatpush3.bf16.msra.mxu1 %v811_v20  ;;  %733 = vmatprep.subr.bf16.mxu0 %v812_v21 }
  0x2d   : > { %755 = vmatprep.subr.bf16.mxu1 %v813_v22 }
  0x2f   : > { %734 = vmatpush3.bf16.msra.mxu0 %v814_v23 }
  0x30   : > { %756 = vmatpush3.bf16.msra.mxu1 %v815_v24  ;;  %735 = vmatprep.subr.bf16.mxu0 %v816_v25 }
  0x31   : > { %757 = vmatprep.subr.bf16.mxu1 %v817_v26 }
  0x33   : > { %736 = vmatpush3.bf16.msra.mxu0 %v818_v27 }
  0x34   : > { %758 = vmatpush3.bf16.msra.mxu1 %v819_v28  ;;  %737 = vmatprep.subr.bf16.mxu0 %v820_v29 }
  0x35   : > { %759 = vmatprep.subr.bf16.mxu1 %v821_v30 }
  0x37   : > { %738 = vmatpush3.bf16.msra.mxu0 %v822_v31 }
  0x38   : > { %760 = vmatpush3.bf16.msra.mxu1 %v823_v32 }
  0x3a   : > { %531 = vmatmul.mubr.bf16.vlgmr.msra.gmra.mrb[0].mxu0 %v682_v35 }
  0x3b   : > { %571 = vmatmul.mubr.bf16.vlgmr.msra.gmra.mrb[0].mxu1 %v684_v37 }
 0x10d   : > { %v739_v39 = vpop.f32.mrb[0].mxu0 }
 0x10e   : > { %v761_v40 = vpop.f32.mrb[0].mxu1  ;;  %v740_v41 = vpop.f32.mrb[1].mxu0 }
 0x10f   : > { %v762_v42 = vpop.f32.mrb[1].mxu1  ;;  %v741_v43 = vadd.f32 %v740_v41, %v739_v39  ;;  %v742_v45 = vpop.f32.mrb[2].mxu0 }
 0x110   : > { %v763_v44 = vadd.f32 %v762_v42, %v761_v40  ;;  %v764_v46 = vpop.f32.mrb[2].mxu1  ;;  %v743_v48 = vpop.f32.mrb[3].mxu0  ;;  %583 = sbr.rel (%p718_p7) target bundleno = 293 (0x125), region = 40 }
 0x111   : > { %v765_v49 = vpop.f32.mrb[3].mxu1 }
 0x112   : > { %v573_v50 = vadd.f32 %v763_v44, %v741_v43 }
 0x114   : > { %v578_v51 = vadd.f32 %v573_v50, %v225_v47 }
 0x116   : > { %579 = vst [vmem:[#allocation2] sm:$0xff] %v578_v51 }
 0x11d   : > { %v584_v52 = vld [vmem:[#allocation2] sm:$0xff] }
 0x11e   : > { %v592_v54 = vadd.f32 %v719_v53, %v584_v52 }
 0x120   : > { %v593_v55 = vmax.f32 %v592_v54, 0.0 }
 0x122   : > { %v594_v56 = vpack.c.bf16 %v593_v55, %v593_v55 }
 0x124   : > { %595 = vst [vmem:[%s959_s3] sm:$0xf] %v594_v56 }
 0x125 PF: > { %s13_s14 = sadd.s32 1, %s850_s14   ;;  %s960_s12 = smov %s846_s13 }
 0x126   : > { %p10_p8 = scmp.ge.s32.totalorder %s13_s14, 9   ;;  %s961_s13 = smov %s963_s15 }
 0x128   :  { %12 = sbr.rel (!%p10_p8) target bundleno = 2 (0x2), region = 73 }

// kernel: vae_forward.11
= control target key start
LH: loop header
LB: loop body
LE: loop exit
PB: predicated region body
PF: predicated region fallthrough
CT: control target
= control target key end

     0   :  { %12 = vsyncpa [#allocation3], 0  ;;  %v286_v1 = vmov 0.0   ;;  %vm287_vm0 = vmmov 0   ;;  %s389_s0 = inlined_call_operand.vmem [shape: bf16[2,128], index: 0, kind: input, shape index: {}]   ;;  %s390_s1 = inlined_call_operand.vmem [shape: bf16[128,128], index: 1, kind: input, shape index: {}]   ;;  %s391_s2 = inlined_call_operand.vmem [shape: f32[1,128], index: 2, kind: input, shape index: {}]   ;;  %s392_s3 = inlined_call_operand.vmem [shape: f32[2,64], index: 3, kind: input, shape index: {}]   ;;  %s393_s4 = inlined_call_operand.hbm [shape: f32[2,64], index: 4, kind: output, shape index: {0}]   ;;  %s394_s5 = inlined_call_operand.hbm [shape: f32[2,64], index: 5, kind: output, shape index: {1}]   ;;  %s395_s6 = inlined_call_operand.vmem [shape: f32[2,64], index: 6, kind: output, shape index: {2}]  }
   0x1   :  { %v228_v0 = vld [vmem:[%s390_s1] sm:$0xff]   ;;  %203 = vmatprep.subr.bf16.mxu0 %v286_v1  ;;  %v229_v2 = vld [vmem:[%s390_s1 + $0x8] sm:$0xff]   ;;  %219 = vmatprep.mubr.msk.bf16.mxu0 %vm287_vm0, %v286_v1  ;;  %v230_v3 = vld [vmem:[%s390_s1 + $0x10] sm:$0xff]  }
   0x2   :  { %204 = vmatpush3.bf16.msra.mxu0 %v228_v0 }
   0x3   :  { %205 = vmatprep.subr.bf16.mxu0 %v286_v1 }
   0x6   :  { %206 = vmatpush3.bf16.msra.mxu0 %v229_v2 }
   0x7   :  { %207 = vmatprep.subr.bf16.mxu0 %v286_v1 }
   0x8   :  { %13 = vsyncpa [#allocation5], 0  ;;  %v231_v4 = vld [vmem:[%s390_s1 + $0x18] sm:$0xff]   ;;  %v232_v5 = vld [vmem:[%s390_s1 + $0x20] sm:$0xff]   ;;  %vm135_vm1 = vcmask 517120  }
   0x9   :  { %v233_v6 = vld [vmem:[%s390_s1 + $0x28] sm:$0xff]   ;;  %v234_v7 = vld [vmem:[%s390_s1 + $0x30] sm:$0xff]   ;;  %v235_v8 = vld [vmem:[%s390_s1 + $0x38] sm:$0xff]   ;;  %s288_s1 = smov [#allocation2]  }
   0xa   :  { %208 = vmatpush3.bf16.msra.mxu0 %v230_v3  ;;  %v23_v9 = vld [vmem:[%s389_s0] sm:$0x1]  ;;  %s159_s17 = sshll.u32 %s288_s1, 4  ;;  %s160_s17 = int_to_ptr.vmem [resolvable:$true] %s159_s17 }
   0xb   :  { %209 = vmatprep.subr.bf16.mxu0 %v286_v1  ;;  %v185_v10 = vld [vmem:[%s391_s2] ss:$0 sm:$0xff]  ;;  %s238_s0 = scalar_lea.vmem %s160_s17, 32  ;;  %p243_p1 = scmp.lt.s32.totalorder %s160_s17, %s160_s17 }
   0xc   :  { %p239_p0 = scmp.ne.s32.totalorder %s160_s17, %s238_s0  ;;  %p244_p2 = scmp.lt.s32.totalorder %s238_s0, %s238_s0 }
   0xe   :  { %210 = vmatpush3.bf16.msra.mxu0 %v231_v4  ;;  %p245_p3 = por %p244_p2, %p243_p1 }
   0xf   :  { %211 = vmatprep.subr.bf16.mxu0 %v286_v1 }
  0x10   :  { %p246_p4 = pnand %p245_p3, %p239_p0 }
  0x12   :  { %212 = vmatpush3.bf16.msra.mxu0 %v232_v5 }
  0x13   :  { %213 = vmatprep.subr.bf16.mxu0 %v286_v1 }
  0x16   :  { %214 = vmatpush3.bf16.msra.mxu0 %v233_v6 }
  0x17   :  { %215 = vmatprep.subr.bf16.mxu0 %v286_v1 }
  0x1a   :  { %216 = vmatpush3.bf16.msra.mxu0 %v234_v7 }
  0x1b   :  { %217 = vmatprep.subr.bf16.mxu0 %v286_v1 }
  0x1e   :  { %218 = vmatpush3.bf16.msra.mxu0 %v235_v8 }
  0x21   :  { %220 = vmatmul.mubr.bf16.vlgmr.msra.gmra.mrb[0].mxu0 %v23_v9 }
  0xf4   :  { %v129_v11 = vpop.f32.mrb[0].mxu0 }
  0xf5   :  { %v130_v12 = vadd.f32 %v185_v10, %v129_v11  ;;  %v221_v13 = vpop.f32.mrb[1].mxu0 }
  0xf6   :  { %v132_v14 = vpop.f32.mrb[2].mxu0 }
  0xf7   :  { %v143_v15 = vmul.f32 0.5, %v130_v12  ;;  %v222_v16 = vpop.f32.mrb[3].mxu0  ;;  %136 = vst.msk [vmem:[#allocation2] sm:$0x3] %vm135_vm1, %v130_v12 }
  0xf9   :  { %v144_v17 = vmul.f32 1.442695, %v143_v15 }
  0xfb   :  { %236 = vpow2.f32 %v144_v17 }
  0xfc   :  { %249 = shalt.err (!%p246_p4)
}
  0xfd   :  { %s250_s19 = scalar_lea.hbm %s393_s4, 32 }
  0xfe   :  { %p251_p5 = scmp.ne.s32.totalorder %s393_s4, %s250_s19  ;;  %p254_p6 = scmp.lt.u32.totalorder %s250_s19, %s393_s4 }
 0x100   :  { %p256_p7 = pnand %p254_p6, %p251_p5 }
 0x102   :  { %259 = shalt.err (!%p256_p7)
}
 0x103   :  { %162 = dma.vmem_to_hbm [thread:$0]  %s160_s17, 32, %s393_s4, [#allocation3]   ;;  %v142_v19 = vld [vmem:[%s392_s3] sm:$0x3] }
 0x104   :  { %s289_s26 = smov 64   ;;  %s290_s29 = smov [#allocation4]  }
 0x105   :  { %v237_v18 = vpop.eup %236  ;;  %s169_s30 = sshll.u32 %s290_s29, 4  ;;  %s170_s30 = int_to_ptr.vmem [resolvable:$true] %s169_s30 }
 0x106   :  { %147 = vrot.lane.b32.xlu0 %v237_v18, %s289_s26  ;;  %s260_s4 = scalar_lea.vmem %s170_s30, 32  ;;  %p265_p9 = scmp.lt.s32.totalorder %s170_s30, %s170_s30 }
 0x107   :  { %p261_p8 = scmp.ne.s32.totalorder %s170_s30, %s260_s4  ;;  %p266_p10 = scmp.lt.s32.totalorder %s260_s4, %s260_s4 }
 0x109   :  { %p267_p11 = por %p266_p10, %p265_p9 }
 0x10a   :  { %138 = vrot.lane.b32.xlu0 %v130_v12, %s289_s26 }
 0x10b   :  { %p268_p12 = pnand %p267_p11, %p261_p8 }
 0x178   :  { %v148_v20 = vpop.permute.xlu0 %147 }
 0x179   :  { %v150_v21 = vmul.f32 %v148_v20, %v142_v19 }
 0x17b   :  { %v151_v22 = vadd.f32 %v150_v21, %v130_v12 }
 0x17c   :  { %v139_v23 = vpop.permute.xlu0 %138 }
 0x17d   :  { %152 = vst.msk [vmem:[%s395_s6] sm:$0x3] %vm135_vm1, %v151_v22  ;;  %141 = vst.msk [vmem:[#allocation4] sm:$0x3] %vm135_vm1, %v139_v23 }
 0x17e   :  { %271 = shalt.err (!%p268_p12)
}
 0x17f   :  { %s272_s10 = scalar_lea.hbm %s394_s5, 32 }
 0x180   :  { %p273_p13 = scmp.ne.s32.totalorder %s394_s5, %s272_s10  ;;  %p276_p0 = scmp.lt.u32.totalorder %s272_s10, %s394_s5 }
 0x182   :  { %p278_p1 = pnand %p276_p0, %p273_p13 }
 0x184   :  { %281 = shalt.err (!%p278_p1)
}
 0x185   :  { %172 = dma.vmem_to_hbm [thread:$0]  %s170_s30, 32, %s394_s5, [#allocation5]  }
 0x186   :  { %282 = dma.done.wait [#allocation3], 32  }
 0x187   :  { %283 = vsyncadd [#allocation3], 4294967264 }
 0x188   :  { %284 = dma.done.wait [#allocation5], 32  }
 0x189   :  { %285 = vsyncadd [#allocation5], 4294967264 }
 0x18a   :  { %183 = vsyncpa [#allocation3], 1 }
 0x18b   :  { %184 = vsyncpa [#allocation5], 1 }

// kernel: vae_forward.13
= control target key start
LH: loop header
LB: loop body
LE: loop exit
PB: predicated region body
PF: predicated region fallthrough
CT: control target
= control target key end

     0   :  { %v526_v47 = vlaneseq  ;;  %s1084_s1 = inlined_call_operand.vmem [shape: bf16[256,256], index: 1, kind: input, shape index: {}]   ;;  %s1085_s0 = inlined_call_operand.vmem [shape: bf16[104,256], index: 0, kind: input, shape index: {}]   ;;  %s1086_s2 = inlined_call_operand.vmem [shape: f32[1,256], index: 2, kind: input, shape index: {}]   ;;  %s1087_s3 = inlined_call_operand.vmem [shape: bf16[104,256], index: 3, kind: output, shape index: {}]  }
   0x1   :  { %v789_v0 = vld [vmem:[%s1084_s1 + $0x4] ss:$8 sps:$4 sm:$0xff]   ;;  %v791_v1 = vld [vmem:[%s1084_s1] ss:$8 sps:$4 sm:$0xff]   ;;  %v792_v2 = vld [vmem:[%s1084_s1 + $0x14] ss:$8 sps:$4 sm:$0xff]  }
   0x2   :  { %342 = vmatprep.subr.bf16.mxu0 %v789_v0  ;;  %757 = vmatprep.subr.bf16.mxu1 %v789_v0  ;;  %v794_v3 = vld [vmem:[%s1084_s1 + $0x10] ss:$8 sps:$4 sm:$0xff]   ;;  %v795_v4 = vld [vmem:[%s1084_s1 + $0x24] ss:$8 sps:$4 sm:$0xff]   ;;  %v797_v5 = vld [vmem:[%s1084_s1 + $0x20] ss:$8 sps:$4 sm:$0xff]  }
   0x3   :  { %343 = vmatpush1.bf16.msra.mxu0 %v791_v1  ;;  %773 = vmatpush1.bf16.msra.mxu1 %v791_v1  ;;  %v798_v6 = vld [vmem:[%s1084_s1 + $0x34] ss:$8 sps:$4 sm:$0xff]   ;;  %v800_v7 = vld [vmem:[%s1084_s1 + $0x30] ss:$8 sps:$4 sm:$0xff]   ;;  %v801_v8 = vld [vmem:[%s1084_s1 + $0x44] ss:$8 sps:$4 sm:$0xff]  }
   0x4   :  { %344 = vmatprep.subr.bf16.mxu0 %v792_v2  ;;  %758 = vmatprep.subr.bf16.mxu1 %v792_v2  ;;  %v803_v9 = vld [vmem:[%s1084_s1 + $0x40] ss:$8 sps:$4 sm:$0xff]   ;;  %v804_v10 = vld [vmem:[%s1084_s1 + $0x54] ss:$8 sps:$4 sm:$0xff]   ;;  %v806_v11 = vld [vmem:[%s1084_s1 + $0x50] ss:$8 sps:$4 sm:$0xff]  }
   0x5   :  { %v807_v12 = vld [vmem:[%s1084_s1 + $0x64] ss:$8 sps:$4 sm:$0xff]   ;;  %v809_v14 = vld [vmem:[%s1084_s1 + $0x60] ss:$8 sps:$4 sm:$0xff]   ;;  %v810_v16 = vld [vmem:[%s1084_s1 + $0x74] ss:$8 sps:$4 sm:$0xff]  }
   0x6   :  { %v839_v13 = vld [vmem:[%s1085_s0 + $0x4] ss:$8 sps:$4 sm:$0xff]   ;;  %v812_v17 = vld [vmem:[%s1084_s1 + $0x70] ss:$8 sps:$4 sm:$0xff]   ;;  %v815_v19 = vld [vmem:[%s1084_s1 + $0x80] ss:$8 sps:$4 sm:$0xff]  }
   0x7   :  { %345 = vmatpush1.bf16.msra.mxu0 %v794_v3  ;;  %774 = vmatpush1.bf16.msra.mxu1 %v794_v3  ;;  %v842_v15 = vld [vmem:[%s1085_s0 + $0x44] ss:$8 sps:$4 sm:$0xff]   ;;  %v816_v20 = vld [vmem:[%s1084_s1 + $0x94] ss:$8 sps:$4 sm:$0xff]   ;;  %v818_v21 = vld [vmem:[%s1084_s1 + $0x90] ss:$8 sps:$4 sm:$0xff]  }
   0x8   :  { %346 = vmatprep.subr.bf16.mxu0 %v795_v4  ;;  %759 = vmatprep.subr.bf16.mxu1 %v795_v4  ;;  %v813_v18 = vld [vmem:[%s1084_s1 + $0x84] ss:$8 sps:$4 sm:$0xff]   ;;  %v821_v23 = vld [vmem:[%s1084_s1 + $0xa0] ss:$8 sps:$4 sm:$0xff]   ;;  %v822_v24 = vld [vmem:[%s1084_s1 + $0xb4] ss:$8 sps:$4 sm:$0xff]  }
   0x9   :  { %374 = vmatprep.mubr.bf16.mxu0 %v839_v13  ;;  %414 = vmatprep.mubr.bf16.mxu1 %v842_v15  ;;  %v819_v22 = vld [vmem:[%s1084_s1 + $0xa4] ss:$8 sps:$4 sm:$0xff]   ;;  %v824_v25 = vld [vmem:[%s1084_s1 + $0xb0] ss:$8 sps:$4 sm:$0xff]   ;;  %v827_v27 = vld [vmem:[%s1084_s1 + $0xc0] ss:$8 sps:$4 sm:$0xff]  }
   0xa   :  { %v825_v26 = vld [vmem:[%s1084_s1 + $0xc4] ss:$8 sps:$4 sm:$0xff]   ;;  %v828_v28 = vld [vmem:[%s1084_s1 + $0xd4] ss:$8 sps:$4 sm:$0xff]   ;;  %v830_v29 = vld [vmem:[%s1084_s1 + $0xd0] ss:$8 sps:$4 sm:$0xff]  }
   0xb   :  { %347 = vmatpush1.bf16.msra.mxu0 %v797_v5  ;;  %775 = vmatpush1.bf16.msra.mxu1 %v797_v5  ;;  %v831_v30 = vld [vmem:[%s1084_s1 + $0xe4] ss:$8 sps:$4 sm:$0xff]   ;;  %v833_v31 = vld [vmem:[%s1084_s1 + $0xe0] ss:$8 sps:$4 sm:$0xff]   ;;  %v834_v32 = vld [vmem:[%s1084_s1 + $0xf4] ss:$8 sps:$4 sm:$0xff]  }
   0xc   :  { %348 = vmatprep.subr.bf16.mxu0 %v798_v6  ;;  %760 = vmatprep.subr.bf16.mxu1 %v798_v6  ;;  %v836_v33 = vld [vmem:[%s1084_s1 + $0xf0] ss:$8 sps:$4 sm:$0xff]   ;;  %v837_v34 = vld [vmem:[%s1085_s0] ss:$8 sps:$4 sm:$0xff]   ;;  %v843_v36 = vld [vmem:[%s1085_s0 + $0x14] ss:$8 sps:$4 sm:$0xff]  }
   0xd   :  { %v840_v35 = vld [vmem:[%s1085_s0 + $0x40] ss:$8 sps:$4 sm:$0xff]   ;;  %v846_v37 = vld [vmem:[%s1085_s0 + $0x54] ss:$8 sps:$4 sm:$0xff]   ;;  %v845_v39 = vld [vmem:[%s1085_s0 + $0x10] ss:$8 sps:$4 sm:$0xff]  }
   0xe   :  { %v82_v38 = vld [vmem:[%s1085_s0 + $0x60] sm:$0xff]  ;;  %v850_v40 = vld [vmem:[%s1085_s0 + $0x50] ss:$8 sps:$4 sm:$0xff]   ;;  %v853_v45 = vld [vmem:[%s1085_s0 + $0x34] ss:$8 sps:$4 sm:$0xff]   ;;  %v527_v48 = vshrl.u32 %v526_v47, 7 }
   0xf   :  { %349 = vmatpush1.bf16.msra.mxu0 %v800_v7  ;;  %776 = vmatpush1.bf16.msra.mxu1 %v800_v7  ;;  %v848_v41 = vld [vmem:[%s1085_s0 + $0x24] ss:$8 sps:$4 sm:$0xff]   ;;  %v698_v42 = vcombine.high %v82_v38, %v82_v38  ;;  %v851_v43 = vld [vmem:[%s1085_s0 + $0x20] ss:$8 sps:$4 sm:$0xff]   ;;  %v697_v44 = vcombine.low %v82_v38, %v82_v38  ;;  %v856_v46 = vld [vmem:[%s1085_s0 + $0x30] ss:$8 sps:$4 sm:$0xff]  }
  0x10   :  { %350 = vmatprep.subr.bf16.mxu0 %v801_v8  ;;  %761 = vmatprep.subr.bf16.mxu1 %v801_v8  ;;  %v528_v49 = vsub.s32 0, %v527_v48  ;;  %v524_v50 = vld [vmem:[%s1086_s2] sm:$0x3]  ;;  %v532_v51 = vsub.s32 1, %v527_v48 }
  0x12   :  { %v1015_v52 = vrot.slane %v524_v50, %v528_v49  ;;  %v1017_v53 = vrot.slane %v524_v50, %v532_v51 }
  0x13   :  { %351 = vmatpush1.bf16.msra.mxu0 %v803_v9  ;;  %777 = vmatpush1.bf16.msra.mxu1 %v803_v9 }
  0x14   :  { %352 = vmatprep.subr.bf16.mxu0 %v804_v10  ;;  %762 = vmatprep.subr.bf16.mxu1 %v804_v10 }
  0x17   :  { %353 = vmatpush1.bf16.msra.mxu0 %v806_v11  ;;  %778 = vmatpush1.bf16.msra.mxu1 %v806_v11 }
  0x18   :  { %354 = vmatprep.subr.bf16.mxu0 %v807_v12  ;;  %763 = vmatprep.subr.bf16.mxu1 %v807_v12 }
  0x1b   :  { %355 = vmatpush1.bf16.msra.mxu0 %v809_v14  ;;  %779 = vmatpush1.bf16.msra.mxu1 %v809_v14 }
  0x1c   :  { %356 = vmatprep.subr.bf16.mxu0 %v810_v16  ;;  %764 = vmatprep.subr.bf16.mxu1 %v810_v16 }
  0x1f   :  { %357 = vmatpush1.bf16.msra.mxu0 %v812_v17  ;;  %780 = vmatpush1.bf16.msra.mxu1 %v812_v17 }
  0x20   :  { %358 = vmatprep.subr.bf16.mxu0 %v813_v18  ;;  %765 = vmatprep.subr.bf16.mxu1 %v813_v18 }
  0x23   :  { %359 = vmatpush1.bf16.msra.mxu0 %v815_v19  ;;  %781 = vmatpush1.bf16.msra.mxu1 %v815_v19 }
  0x24   :  { %360 = vmatprep.subr.bf16.mxu0 %v816_v20  ;;  %766 = vmatprep.subr.bf16.mxu1 %v816_v20 }
  0x27   :  { %361 = vmatpush1.bf16.msra.mxu0 %v818_v21  ;;  %782 = vmatpush1.bf16.msra.mxu1 %v818_v21 }
  0x28   :  { %362 = vmatprep.subr.bf16.mxu0 %v819_v22  ;;  %767 = vmatprep.subr.bf16.mxu1 %v819_v22 }
  0x2b   :  { %363 = vmatpush1.bf16.msra.mxu0 %v821_v23  ;;  %783 = vmatpush1.bf16.msra.mxu1 %v821_v23 }
  0x2c   :  { %364 = vmatprep.subr.bf16.mxu0 %v822_v24  ;;  %768 = vmatprep.subr.bf16.mxu1 %v822_v24 }
  0x2f   :  { %365 = vmatpush1.bf16.msra.mxu0 %v824_v25  ;;  %784 = vmatpush1.bf16.msra.mxu1 %v824_v25 }
  0x30   :  { %366 = vmatprep.subr.bf16.mxu0 %v825_v26  ;;  %769 = vmatprep.subr.bf16.mxu1 %v825_v26 }
  0x33   :  { %367 = vmatpush1.bf16.msra.mxu0 %v827_v27  ;;  %785 = vmatpush1.bf16.msra.mxu1 %v827_v27 }
  0x34   :  { %368 = vmatprep.subr.bf16.mxu0 %v828_v28  ;;  %770 = vmatprep.subr.bf16.mxu1 %v828_v28 }
  0x37   :  { %369 = vmatpush1.bf16.msra.mxu0 %v830_v29  ;;  %786 = vmatpush1.bf16.msra.mxu1 %v830_v29 }
  0x38   :  { %370 = vmatprep.subr.bf16.mxu0 %v831_v30  ;;  %771 = vmatprep.subr.bf16.mxu1 %v831_v30 }
  0x3b   :  { %371 = vmatpush1.bf16.msra.mxu0 %v833_v31  ;;  %787 = vmatpush1.bf16.msra.mxu1 %v833_v31 }
  0x3c   :  { %372 = vmatprep.subr.bf16.mxu0 %v834_v32  ;;  %772 = vmatprep.subr.bf16.mxu1 %v834_v32 }
  0x3f   :  { %373 = vmatpush1.bf16.msra.mxu0 %v836_v33  ;;  %788 = vmatpush1.bf16.msra.mxu1 %v836_v33 }
  0x42   :  { %375 = vmatmul.mubr.bf16.vlgmr.msra.gmra.mrb[0].mxu0 %v837_v34  ;;  %415 = vmatmul.mubr.bf16.vlgmr.msra.gmra.mrb[0].mxu1 %v840_v35 }
  0x43   :  { %384 = vmatprep.mubr.bf16.mxu0 %v843_v36  ;;  %424 = vmatprep.mubr.bf16.mxu1 %v846_v37 }
  0x4a   :  { %385 = vmatmul.mubr.bf16.gmra.mrb[4].mxu0 %v845_v39  ;;  %425 = vmatmul.mubr.bf16.gmra.mrb[4].mxu1 %v850_v40 }
  0x4b   :  { %394 = vmatprep.mubr.bf16.mxu0 %v848_v41  ;;  %434 = vmatprep.mubr.bf16.mxu1 %v698_v42 }
  0x52   :  { %395 = vmatmul.mubr.bf16.gmra.mrb[8].mxu0 %v851_v43  ;;  %435 = vmatmul.mubr.bf16.gmra.mrb[8].mxu1 %v697_v44 }
  0x53   :  { %404 = vmatprep.mubr.bf16.mxu0 %v853_v45 }
  0x5a   :  { %405 = vmatmul.mubr.bf16.gmra.mrb[12].mxu0 %v856_v46 }
 0x115   :  { %v376_v54 = vpop.f32.mrb[0].mxu0  ;;  %v416_v55 = vpop.f32.mrb[0].mxu1 }
 0x116   :  { %v536_v56 = vadd.f32 %v1015_v52, %v376_v54  ;;  %v378_v57 = vpop.f32.mrb[1].mxu0  ;;  %v552_v58 = vadd.f32 %v1015_v52, %v416_v55  ;;  %v418_v59 = vpop.f32.mrb[1].mxu1 }
 0x117   :  { %v537_v60 = vadd.f32 %v1017_v53, %v378_v57  ;;  %v380_v61 = vpop.f32.mrb[2].mxu0  ;;  %v553_v62 = vadd.f32 %v1017_v53, %v418_v59  ;;  %v420_v63 = vpop.f32.mrb[2].mxu1 }
 0x118   :  { %v562_v0 = vmax.f32 %v536_v56, 0.0  ;;  %v538_v1 = vadd.f32 %v1015_v52, %v380_v61  ;;  %v382_v2 = vpop.f32.mrb[3].mxu0  ;;  %v578_v3 = vmax.f32 %v552_v58, 0.0  ;;  %v554_v4 = vadd.f32 %v1015_v52, %v420_v63  ;;  %v422_v5 = vpop.f32.mrb[3].mxu1 }
 0x119   :  { %v563_v6 = vmax.f32 %v537_v60, 0.0  ;;  %v539_v7 = vadd.f32 %v1017_v53, %v382_v2  ;;  %v579_v8 = vmax.f32 %v553_v62, 0.0  ;;  %v555_v9 = vadd.f32 %v1017_v53, %v422_v5 }
 0x11a   :  { %v564_v10 = vmax.f32 %v538_v1, 0.0  ;;  %v580_v11 = vmax.f32 %v554_v4, 0.0 }
 0x11b   :  { %v744_v12 = vpack.c.bf16 %v563_v6, %v562_v0  ;;  %v565_v13 = vmax.f32 %v539_v7, 0.0  ;;  %v752_v14 = vpack.c.bf16 %v579_v8, %v578_v3  ;;  %v581_v15 = vmax.f32 %v555_v9, 0.0 }
 0x11d   :  { %668 = vst [vmem:[%s1087_s3] sm:$0xff] %v744_v12  ;;  %v745_v16 = vpack.c.bf16 %v565_v13, %v564_v10  ;;  %v386_v17 = vpop.f32.mrb[4].mxu0  ;;  %676 = vst [vmem:[%s1087_s3 + $0x40] sm:$0xff] %v752_v14  ;;  %v753_v18 = vpack.c.bf16 %v581_v15, %v580_v11  ;;  %v426_v19 = vpop.f32.mrb[4].mxu1 }
 0x11e   :  { %v540_v20 = vadd.f32 %v1015_v52, %v386_v17  ;;  %v388_v21 = vpop.f32.mrb[5].mxu0  ;;  %v556_v22 = vadd.f32 %v1015_v52, %v426_v19  ;;  %v428_v23 = vpop.f32.mrb[5].mxu1 }
 0x11f   :  { %669 = vst [vmem:[%s1087_s3 + $0x8] sm:$0xff] %v745_v16  ;;  %v541_v24 = vadd.f32 %v1017_v53, %v388_v21  ;;  %v390_v25 = vpop.f32.mrb[6].mxu0  ;;  %677 = vst [vmem:[%s1087_s3 + $0x48] sm:$0xff] %v753_v18  ;;  %v557_v26 = vadd.f32 %v1017_v53, %v428_v23  ;;  %v430_v27 = vpop.f32.mrb[6].mxu1 }
 0x120   :  { %v566_v28 = vmax.f32 %v540_v20, 0.0  ;;  %v542_v29 = vadd.f32 %v1015_v52, %v390_v25  ;;  %v392_v30 = vpop.f32.mrb[7].mxu0  ;;  %v582_v31 = vmax.f32 %v556_v22, 0.0  ;;  %v558_v32 = vadd.f32 %v1015_v52, %v430_v27  ;;  %v432_v33 = vpop.f32.mrb[7].mxu1 }
 0x121   :  { %v567_v34 = vmax.f32 %v541_v24, 0.0  ;;  %v543_v35 = vadd.f32 %v1017_v53, %v392_v30  ;;  %v583_v36 = vmax.f32 %v557_v26, 0.0  ;;  %v559_v37 = vadd.f32 %v1017_v53, %v432_v33 }
 0x122   :  { %v568_v38 = vmax.f32 %v542_v29, 0.0  ;;  %v584_v39 = vmax.f32 %v558_v32, 0.0 }
 0x123   :  { %v746_v40 = vpack.c.bf16 %v567_v34, %v566_v28  ;;  %v569_v41 = vmax.f32 %v543_v35, 0.0  ;;  %v754_v42 = vpack.c.bf16 %v583_v36, %v582_v31  ;;  %v585_v43 = vmax.f32 %v559_v37, 0.0 }
 0x125   :  { %670 = vst [vmem:[%s1087_s3 + $0x10] sm:$0xff] %v746_v40  ;;  %v747_v44 = vpack.c.bf16 %v569_v41, %v568_v38  ;;  %v396_v45 = vpop.f32.mrb[8].mxu0  ;;  %678 = vst [vmem:[%s1087_s3 + $0x50] sm:$0xff] %v754_v42  ;;  %v755_v46 = vpack.c.bf16 %v585_v43, %v584_v39  ;;  %v436_v47 = vpop.f32.mrb[8].mxu1 }
 0x126   :  { %v544_v48 = vadd.f32 %v1015_v52, %v396_v45  ;;  %v398_v49 = vpop.f32.mrb[9].mxu0  ;;  %v560_v50 = vadd.f32 %v1015_v52, %v436_v47  ;;  %v438_v51 = vpop.f32.mrb[9].mxu1 }
 0x127   :  { %671 = vst [vmem:[%s1087_s3 + $0x18] sm:$0xff] %v747_v44  ;;  %v545_v54 = vadd.f32 %v1017_v53, %v398_v49  ;;  %v400_v55 = vpop.f32.mrb[10].mxu0  ;;  %679 = vst [vmem:[%s1087_s3 + $0x58] sm:$0xff] %v755_v46  ;;  %v561_v56 = vadd.f32 %v1017_v53, %v438_v51  ;;  %v440_v57 = vpop.f32.mrb[10].mxu1 }
 0x128   :  { %v570_v58 = vmax.f32 %v544_v48, 0.0  ;;  %v546_v59 = vadd.f32 %v1015_v52, %v400_v55  ;;  %v402_v60 = vpop.f32.mrb[11].mxu0  ;;  %v586_v61 = vmax.f32 %v560_v50, 0.0  ;;  %v441_v62 = vpop.f32.mrb[11].mxu1 }
 0x129   :  { %v571_v63 = vmax.f32 %v545_v54, 0.0  ;;  %v547_v0 = vadd.f32 %v1017_v53, %v402_v60  ;;  %v587_v1 = vmax.f32 %v561_v56, 0.0 }
 0x12a   :  { %v572_v2 = vmax.f32 %v546_v59, 0.0 }
 0x12b   :  { %v748_v3 = vpack.c.bf16 %v571_v63, %v570_v58  ;;  %v573_v4 = vmax.f32 %v547_v0, 0.0  ;;  %v756_v5 = vpack.c.bf16 %v587_v1, %v586_v61 }
 0x12d   :  { %672 = vst [vmem:[%s1087_s3 + $0x20] sm:$0xff] %v748_v3  ;;  %v749_v6 = vpack.c.bf16 %v573_v4, %v572_v2  ;;  %v406_v7 = vpop.f32.mrb[12].mxu0  ;;  %680 = vst [vmem:[%s1087_s3 + $0x60] sm:$0xff] %v756_v5 }
 0x12e   :  { %v548_v8 = vadd.f32 %v1015_v52, %v406_v7  ;;  %v408_v9 = vpop.f32.mrb[13].mxu0 }
 0x12f   :  { %673 = vst [vmem:[%s1087_s3 + $0x28] sm:$0xff] %v749_v6  ;;  %v549_v10 = vadd.f32 %v1017_v53, %v408_v9  ;;  %v410_v11 = vpop.f32.mrb[14].mxu0 }
 0x130   :  { %v574_v12 = vmax.f32 %v548_v8, 0.0  ;;  %v550_v13 = vadd.f32 %v1015_v52, %v410_v11  ;;  %v412_v14 = vpop.f32.mrb[15].mxu0 }
 0x131   :  { %v575_v15 = vmax.f32 %v549_v10, 0.0  ;;  %v551_v16 = vadd.f32 %v1017_v53, %v412_v14 }
 0x132   :  { %v576_v17 = vmax.f32 %v550_v13, 0.0 }
 0x133   :  { %v750_v18 = vpack.c.bf16 %v575_v15, %v574_v12  ;;  %v577_v19 = vmax.f32 %v551_v16, 0.0 }
 0x135   :  { %674 = vst [vmem:[%s1087_s3 + $0x30] sm:$0xff] %v750_v18  ;;  %v751_v20 = vpack.c.bf16 %v577_v19, %v576_v17 }
 0x137   :  { %675 = vst [vmem:[%s1087_s3 + $0x38] sm:$0xff] %v751_v20 }

// kernel: vae_forward.12
= control target key start
LH: loop header
LB: loop body
LE: loop exit
PB: predicated region body
PF: predicated region fallthrough
CT: control target
= control target key end

     0   :  { %v2753_v1 = vmov 0   ;;  %vm2755_vm0 = vmmov 0   ;;  %s3498_s1 = inlined_call_operand.vmem [shape: bf16[128,3200], index: 1, kind: input, shape index: {}]   ;;  %s3499_s0 = inlined_call_operand.vmem [shape: bf16[8,128], index: 0, kind: input, shape index: {}]   ;;  %s3500_s2 = inlined_call_operand.vmem [shape: f32[1,3200], index: 2, kind: input, shape index: {}]   ;;  %s3501_s3 = inlined_call_operand.vmem [shape: bf16[8,3200], index: 3, kind: output, shape index: {}]  }
   0x1   :  { %v2456_v0 = vld [vmem:[%s3498_s1 + $0x4] ss:$100 sps:$4 sm:$0xff]   ;;  %1318 = vmatprep.mubr.bf16.mxu0 %v2753_v1  ;;  %1359 = vmatprep.mubr.bf16.mxu1 %v2753_v1  ;;  %v2459_v3 = vld [vmem:[%s3498_s1 + $0xcc] ss:$100 sps:$4 sm:$0xff]   ;;  %v2462_v5 = vld [vmem:[%s3498_s1 + $0x194] ss:$100 sps:$4 sm:$0xff]  }
   0x2   :  { %v2458_v2 = vld [vmem:[%s3498_s1] ss:$100 sps:$4 sm:$0xff]   ;;  %1286 = vmatprep.subr.bf16.mxu0 %v2456_v0  ;;  %v2461_v4 = vld [vmem:[%s3498_s1 + $0xc8] ss:$100 sps:$4 sm:$0xff]   ;;  %v2464_v6 = vld [vmem:[%s3498_s1 + $0x190] ss:$100 sps:$4 sm:$0xff]  }
   0x3   :  { %1287 = vmatpush1.bf16.msra.mxu0 %v2458_v2  ;;  %v2465_v7 = vld [vmem:[%s3498_s1 + $0x25c] ss:$100 sps:$4 sm:$0xff]   ;;  %v2479_v9 = vld [vmem:[%s3498_s1 + $0xc] ss:$100 sps:$4 sm:$0xff]   ;;  %v2468_v11 = vld [vmem:[%s3498_s1 + $0x324] ss:$100 sps:$4 sm:$0xff]  }
   0x4   :  { %1288 = vmatprep.subr.bf16.mxu0 %v2459_v3  ;;  %v2467_v8 = vld [vmem:[%s3498_s1 + $0x258] ss:$100 sps:$4 sm:$0xff]   ;;  %v2482_v10 = vld [vmem:[%s3498_s1 + $0x8] ss:$100 sps:$4 sm:$0xff]   ;;  %1327 = vmatprep.subr.bf16.mxu1 %v2479_v9  ;;  %v2470_v13 = vld [vmem:[%s3498_s1 + $0x320] ss:$100 sps:$4 sm:$0xff]  }
   0x5   :  { %v2483_v12 = vld [vmem:[%s3498_s1 + $0xd4] ss:$100 sps:$4 sm:$0xff]   ;;  %1328 = vmatpush1.bf16.msra.mxu1 %v2482_v10  ;;  %v2489_v15 = vld [vmem:[%s3498_s1 + $0x19c] ss:$100 sps:$4 sm:$0xff]   ;;  %v2471_v16 = vld [vmem:[%s3498_s1 + $0x3ec] ss:$100 sps:$4 sm:$0xff]  }
   0x6   :  { %v2488_v14 = vld [vmem:[%s3498_s1 + $0xd0] ss:$100 sps:$4 sm:$0xff]   ;;  %1329 = vmatprep.subr.bf16.mxu1 %v2483_v12  ;;  %v2494_v17 = vld [vmem:[%s3498_s1 + $0x198] ss:$100 sps:$4 sm:$0xff]   ;;  %v2473_v18 = vld [vmem:[%s3498_s1 + $0x3e8] ss:$100 sps:$4 sm:$0xff]  }
   0x7   :  { %1289 = vmatpush1.bf16.msra.mxu0 %v2461_v4  ;;  %v2495_v19 = vld [vmem:[%s3498_s1 + $0x264] ss:$100 sps:$4 sm:$0xff]   ;;  %v2474_v20 = vld [vmem:[%s3498_s1 + $0x4b4] ss:$100 sps:$4 sm:$0xff]   ;;  %v2501_v23 = vld [vmem:[%s3498_s1 + $0x32c] ss:$100 sps:$4 sm:$0xff]  }
   0x8   :  { %1290 = vmatprep.subr.bf16.mxu0 %v2462_v5  ;;  %v2476_v21 = vld [vmem:[%s3498_s1 + $0x4b0] ss:$100 sps:$4 sm:$0xff]   ;;  %v2500_v22 = vld [vmem:[%s3498_s1 + $0x260] ss:$100 sps:$4 sm:$0xff]   ;;  %v2506_v25 = vld [vmem:[%s3498_s1 + $0x328] ss:$100 sps:$4 sm:$0xff]  }
   0x9   :  { %1330 = vmatpush1.bf16.msra.mxu1 %v2488_v14  ;;  %v2477_v24 = vld [vmem:[%s3498_s1 + $0x57c] ss:$100 sps:$4 sm:$0xff]   ;;  %v2507_v27 = vld [vmem:[%s3498_s1 + $0x3f4] ss:$100 sps:$4 sm:$0xff]   ;;  %v2519_v36 = vld [vmem:[%s3498_s1 + $0x584] ss:$100 sps:$4 sm:$0xff]  }
   0xa   :  { %1331 = vmatprep.subr.bf16.mxu1 %v2489_v15  ;;  %v2481_v26 = vld [vmem:[%s3498_s1 + $0x578] ss:$100 sps:$4 sm:$0xff]   ;;  %v2865_v29 = vld [vmem:[%s3499_s0] sm:$0xf]  ;;  %v2485_v30 = vld [vmem:[%s3498_s1 + $0x10] ss:$100 sps:$4 sm:$0xff]  }
   0xb   :  { %1291 = vmatpush1.bf16.msra.mxu0 %v2464_v6  ;;  %v2487_v28 = vld [vmem:[%s3498_s1 + $0x14] ss:$100 sps:$4 sm:$0xff]   ;;  %v2513_v32 = vld [vmem:[%s3498_s1 + $0x4bc] ss:$100 sps:$4 sm:$0xff]   ;;  %v2499_v37 = vld [vmem:[%s3498_s1 + $0x1a4] ss:$100 sps:$4 sm:$0xff]  }
   0xc   :  { %1292 = vmatprep.subr.bf16.mxu0 %v2465_v7  ;;  %v2512_v31 = vld [vmem:[%s3498_s1 + $0x3f0] ss:$100 sps:$4 sm:$0xff]   ;;  %v2493_v33 = vld [vmem:[%s3498_s1 + $0xdc] ss:$100 sps:$4 sm:$0xff]   ;;  %v2503_v42 = vld [vmem:[%s3498_s1 + $0x268] ss:$100 sps:$4 sm:$0xff]  }
   0xd   :  { %1332 = vmatpush1.bf16.msra.mxu1 %v2494_v17  ;;  %v2491_v34 = vld [vmem:[%s3498_s1 + $0xd8] ss:$100 sps:$4 sm:$0xff]   ;;  %v2497_v38 = vld [vmem:[%s3498_s1 + $0x1a0] ss:$100 sps:$4 sm:$0xff]   ;;  %v2505_v41 = vld [vmem:[%s3498_s1 + $0x26c] ss:$100 sps:$4 sm:$0xff]  }
   0xe   :  { %1333 = vmatprep.subr.bf16.mxu1 %v2495_v19  ;;  %v2518_v35 = vld [vmem:[%s3498_s1 + $0x4b8] ss:$100 sps:$4 sm:$0xff]   ;;  %v2524_v39 = vld [vmem:[%s3498_s1 + $0x580] ss:$100 sps:$4 sm:$0xff]   ;;  %v2509_v46 = vld [vmem:[%s3498_s1 + $0x330] ss:$100 sps:$4 sm:$0xff]  }
   0xf   :  { %1293 = vmatpush1.bf16.msra.mxu0 %v2467_v8  ;;  %v2530_v40 = vld [vmem:[%s3498_s1 + $0x1c] ss:$100 sps:$4 sm:$0xff]   ;;  %v2533_v44 = vld [vmem:[%s3498_s1 + $0xe4] ss:$100 sps:$4 sm:$0xff]   ;;  %v2511_v45 = vld [vmem:[%s3498_s1 + $0x334] ss:$100 sps:$4 sm:$0xff]  }
  0x10   :  { %1294 = vmatprep.subr.bf16.mxu0 %v2468_v11  ;;  %v2528_v43 = vld [vmem:[%s3498_s1 + $0x18] ss:$100 sps:$4 sm:$0xff]   ;;  %v2531_v47 = vld [vmem:[%s3498_s1 + $0xe0] ss:$100 sps:$4 sm:$0xff]   ;;  %v2539_v48 = vld [vmem:[%s3498_s1 + $0x1ac] ss:$100 sps:$4 sm:$0xff]  }
  0x11   :  { %1334 = vmatpush1.bf16.msra.mxu1 %v2500_v22  ;;  %v2517_v49 = vld [vmem:[%s3498_s1 + $0x3fc] ss:$100 sps:$4 sm:$0xff]   ;;  %v2537_v51 = vld [vmem:[%s3498_s1 + $0x1a8] ss:$100 sps:$4 sm:$0xff]   ;;  %v2545_v52 = vld [vmem:[%s3498_s1 + $0x274] ss:$100 sps:$4 sm:$0xff]  }
  0x12   :  { %1335 = vmatprep.subr.bf16.mxu1 %v2501_v23  ;;  %v2515_v50 = vld [vmem:[%s3498_s1 + $0x3f8] ss:$100 sps:$4 sm:$0xff]   ;;  %v2523_v53 = vld [vmem:[%s3498_s1 + $0x4c4] ss:$100 sps:$4 sm:$0xff]   ;;  %v2543_v55 = vld [vmem:[%s3498_s1 + $0x270] ss:$100 sps:$4 sm:$0xff]  }
  0x13   :  { %1295 = vmatpush1.bf16.msra.mxu0 %v2470_v13  ;;  %v2521_v54 = vld [vmem:[%s3498_s1 + $0x4c0] ss:$100 sps:$4 sm:$0xff]   ;;  %v2527_v57 = vld [vmem:[%s3498_s1 + $0x58c] ss:$100 sps:$4 sm:$0xff]   ;;  %v2549_v59 = vld [vmem:[%s3498_s1 + $0x338] ss:$100 sps:$4 sm:$0xff]  }
  0x14   :  { %1296 = vmatprep.subr.bf16.mxu0 %v2471_v16  ;;  %v2551_v56 = vld [vmem:[%s3498_s1 + $0x33c] ss:$100 sps:$4 sm:$0xff]   ;;  %v2525_v58 = vld [vmem:[%s3498_s1 + $0x588] ss:$100 sps:$4 sm:$0xff]   ;;  %v2569_v5 = vld [vmem:[%s3498_s1 + $0x594] ss:$100 sps:$4 sm:$0xff]  }
  0x15   :  { %1336 = vmatpush1.bf16.msra.mxu1 %v2506_v25  ;;  %v2557_v60 = vld [vmem:[%s3498_s1 + $0x404] ss:$100 sps:$4 sm:$0xff]   ;;  %v2563_v0 = vld [vmem:[%s3498_s1 + $0x4cc] ss:$100 sps:$4 sm:$0xff]   ;;  %v2548_v6 = vld [vmem:[%s3498_s1 + $0x1b4] ss:$100 sps:$4 sm:$0xff]  }
  0x16   :  { %1337 = vmatprep.subr.bf16.mxu1 %v2507_v27  ;;  %v2536_v61 = vld [vmem:[%s3498_s1 + $0x24] ss:$100 sps:$4 sm:$0xff]   ;;  %v2542_v2 = vld [vmem:[%s3498_s1 + $0xec] ss:$100 sps:$4 sm:$0xff]   ;;  %v2554_v10 = vld [vmem:[%s3498_s1 + $0x27c] ss:$100 sps:$4 sm:$0xff]  }
  0x17   :  { %1297 = vmatpush1.bf16.msra.mxu0 %v2473_v18  ;;  %v2534_v62 = vld [vmem:[%s3498_s1 + $0x20] ss:$100 sps:$4 sm:$0xff]   ;;  %v2540_v3 = vld [vmem:[%s3498_s1 + $0xe8] ss:$100 sps:$4 sm:$0xff]   ;;  %v2546_v7 = vld [vmem:[%s3498_s1 + $0x1b0] ss:$100 sps:$4 sm:$0xff]  }
  0x18   :  { %1298 = vmatprep.subr.bf16.mxu0 %v2474_v20  ;;  %v2555_v63 = vld [vmem:[%s3498_s1 + $0x400] ss:$100 sps:$4 sm:$0xff]   ;;  %v2561_v4 = vld [vmem:[%s3498_s1 + $0x4c8] ss:$100 sps:$4 sm:$0xff]   ;;  %v2567_v8 = vld [vmem:[%s3498_s1 + $0x590] ss:$100 sps:$4 sm:$0xff]  }
  0x19   :  { %1338 = vmatpush1.bf16.msra.mxu1 %v2512_v31  ;;  %v2578_v9 = vld [vmem:[%s3498_s1 + $0x2c] ss:$100 sps:$4 sm:$0xff]   ;;  %v2552_v11 = vld [vmem:[%s3498_s1 + $0x278] ss:$100 sps:$4 sm:$0xff]   ;;  %v2560_v14 = vld [vmem:[%s3498_s1 + $0x344] ss:$100 sps:$4 sm:$0xff]  }
  0x1a   :  { %1339 = vmatprep.subr.bf16.mxu1 %v2513_v32  ;;  %v2576_v12 = vld [vmem:[%s3498_s1 + $0x28] ss:$100 sps:$4 sm:$0xff]   ;;  %v2581_v13 = vld [vmem:[%s3498_s1 + $0xf4] ss:$100 sps:$4 sm:$0xff]   ;;  %v2558_v15 = vld [vmem:[%s3498_s1 + $0x340] ss:$100 sps:$4 sm:$0xff]  }
  0x1b   :  { %1299 = vmatpush1.bf16.msra.mxu0 %v2476_v21  ;;  %v2579_v16 = vld [vmem:[%s3498_s1 + $0xf0] ss:$100 sps:$4 sm:$0xff]   ;;  %v2587_v17 = vld [vmem:[%s3498_s1 + $0x1bc] ss:$100 sps:$4 sm:$0xff]   ;;  %v2564_v19 = vld [vmem:[%s3498_s1 + $0x408] ss:$100 sps:$4 sm:$0xff]  }
  0x1c   :  { %1300 = vmatprep.subr.bf16.mxu0 %v2477_v24  ;;  %v2566_v18 = vld [vmem:[%s3498_s1 + $0x40c] ss:$100 sps:$4 sm:$0xff]   ;;  %v2585_v20 = vld [vmem:[%s3498_s1 + $0x1b8] ss:$100 sps:$4 sm:$0xff]   ;;  %v2593_v21 = vld [vmem:[%s3498_s1 + $0x284] ss:$100 sps:$4 sm:$0xff]  }
  0x1d   :  { %1340 = vmatpush1.bf16.msra.mxu1 %v2518_v35  ;;  %v2572_v22 = vld [vmem:[%s3498_s1 + $0x4d4] ss:$100 sps:$4 sm:$0xff]   ;;  %v2591_v24 = vld [vmem:[%s3498_s1 + $0x280] ss:$100 sps:$4 sm:$0xff]   ;;  %v2599_v25 = vld [vmem:[%s3498_s1 + $0x34c] ss:$100 sps:$4 sm:$0xff]  }
  0x1e   :  { %1341 = vmatprep.subr.bf16.mxu1 %v2519_v36  ;;  %v2570_v23 = vld [vmem:[%s3498_s1 + $0x4d0] ss:$100 sps:$4 sm:$0xff]   ;;  %v2573_v27 = vld [vmem:[%s3498_s1 + $0x598] ss:$100 sps:$4 sm:$0xff]  }
  0x1f   :  { %1301 = vmatpush1.bf16.msra.mxu0 %v2481_v26  ;;  %v2575_v26 = vld [vmem:[%s3498_s1 + $0x59c] ss:$100 sps:$4 sm:$0xff]   ;;  %v2584_v31 = vld [vmem:[%s3498_s1 + $0x34] ss:$100 sps:$4 sm:$0xff]  }
  0x20   :  { %1368 = vmatprep.subr.bf16.mxu0 %v2487_v28  ;;  %v2597_v28 = vld [vmem:[%s3498_s1 + $0x348] ss:$100 sps:$4 sm:$0xff]   ;;  %v2582_v32 = vld [vmem:[%s3498_s1 + $0x30] ss:$100 sps:$4 sm:$0xff]   ;;  %v2590_v35 = vld [vmem:[%s3498_s1 + $0xfc] ss:$100 sps:$4 sm:$0xff]  }
  0x21   :  { %1342 = vmatpush1.bf16.msra.mxu1 %v2524_v39  ;;  %v2588_v36 = vld [vmem:[%s3498_s1 + $0xf8] ss:$100 sps:$4 sm:$0xff]   ;;  %v2596_v39 = vld [vmem:[%s3498_s1 + $0x1c4] ss:$100 sps:$4 sm:$0xff]  }
  0x22   :  { %1319 = vmatmul.mubr.bf16.vlgmr.msra.gmra.mrb[0].mxu0 %v2865_v29  ;;  %1409 = vmatprep.subr.bf16.mxu1 %v2530_v40  ;;  %v2594_v40 = vld [vmem:[%s3498_s1 + $0x1c0] ss:$100 sps:$4 sm:$0xff]  }
  0x23   :  { %1369 = vmatpush1.bf16.msra.mxu0 %v2485_v30  ;;  %1400 = vmatprep.mubr.bf16.mxu0 %v2753_v1  ;;  %v2605_v30 = vld [vmem:[%s3498_s1 + $0x414] ss:$100 sps:$4 sm:$0xff]  }
  0x24   :  { %1370 = vmatprep.subr.bf16.mxu0 %v2493_v33  ;;  %1360 = vmatmul.mubr.bf16.vlgmr.msra.gmra.mrb[0].mxu1 %v2865_v29  ;;  %v2603_v33 = vld [vmem:[%s3498_s1 + $0x410] ss:$100 sps:$4 sm:$0xff]  }
  0x25   :  { %1410 = vmatpush1.bf16.msra.mxu1 %v2528_v43  ;;  %1441 = vmatprep.mubr.bf16.mxu1 %v2753_v1  ;;  %v2602_v43 = vld [vmem:[%s3498_s1 + $0x28c] ss:$100 sps:$4 sm:$0xff]  }
  0x26   :  { %1411 = vmatprep.subr.bf16.mxu1 %v2533_v44  ;;  %v2600_v44 = vld [vmem:[%s3498_s1 + $0x288] ss:$100 sps:$4 sm:$0xff]  }
  0x27   :  { %1371 = vmatpush1.bf16.msra.mxu0 %v2491_v34  ;;  %v2611_v34 = vld [vmem:[%s3498_s1 + $0x4dc] ss:$100 sps:$4 sm:$0xff]  }
  0x28   :  { %1372 = vmatprep.subr.bf16.mxu0 %v2499_v37  ;;  %v2609_v37 = vld [vmem:[%s3498_s1 + $0x4d8] ss:$100 sps:$4 sm:$0xff]  }
  0x29   :  { %1412 = vmatpush1.bf16.msra.mxu1 %v2531_v47  ;;  %v2608_v47 = vld [vmem:[%s3498_s1 + $0x354] ss:$100 sps:$4 sm:$0xff]  }
  0x2a   :  { %1413 = vmatprep.subr.bf16.mxu1 %v2539_v48  ;;  %v2606_v48 = vld [vmem:[%s3498_s1 + $0x350] ss:$100 sps:$4 sm:$0xff]  }
  0x2b   :  { %1373 = vmatpush1.bf16.msra.mxu0 %v2497_v38  ;;  %v2617_v38 = vld [vmem:[%s3498_s1 + $0x5a4] ss:$100 sps:$4 sm:$0xff]  }
  0x2c   :  { %1374 = vmatprep.subr.bf16.mxu0 %v2505_v41  ;;  %v2615_v41 = vld [vmem:[%s3498_s1 + $0x5a0] ss:$100 sps:$4 sm:$0xff]  }
  0x2d   :  { %1414 = vmatpush1.bf16.msra.mxu1 %v2537_v51  ;;  %v2614_v51 = vld [vmem:[%s3498_s1 + $0x41c] ss:$100 sps:$4 sm:$0xff]  }
  0x2e   :  { %1415 = vmatprep.subr.bf16.mxu1 %v2545_v52  ;;  %v2612_v52 = vld [vmem:[%s3498_s1 + $0x418] ss:$100 sps:$4 sm:$0xff]  }
  0x2f   :  { %1375 = vmatpush1.bf16.msra.mxu0 %v2503_v42  ;;  %v2626_v42 = vld [vmem:[%s3498_s1 + $0x3c] ss:$100 sps:$4 sm:$0xff]  }
  0x30   :  { %1376 = vmatprep.subr.bf16.mxu0 %v2511_v45  ;;  %v2624_v45 = vld [vmem:[%s3498_s1 + $0x38] ss:$100 sps:$4 sm:$0xff]  }
  0x31   :  { %1416 = vmatpush1.bf16.msra.mxu1 %v2543_v55  ;;  %v2620_v55 = vld [vmem:[%s3498_s1 + $0x4e4] ss:$100 sps:$4 sm:$0xff]  }
  0x32   :  { %1417 = vmatprep.subr.bf16.mxu1 %v2551_v56  ;;  %v2618_v56 = vld [vmem:[%s3498_s1 + $0x4e0] ss:$100 sps:$4 sm:$0xff]  }
  0x33   :  { %1377 = vmatpush1.bf16.msra.mxu0 %v2509_v46  ;;  %v2629_v46 = vld [vmem:[%s3498_s1 + $0x104] ss:$100 sps:$4 sm:$0xff]  }
  0x34   :  { %1378 = vmatprep.subr.bf16.mxu0 %v2517_v49  ;;  %v2627_v49 = vld [vmem:[%s3498_s1 + $0x100] ss:$100 sps:$4 sm:$0xff]  }
  0x35   :  { %1418 = vmatpush1.bf16.msra.mxu1 %v2549_v59  ;;  %v2623_v59 = vld [vmem:[%s3498_s1 + $0x5ac] ss:$100 sps:$4 sm:$0xff]  }
  0x36   :  { %1419 = vmatprep.subr.bf16.mxu1 %v2557_v60  ;;  %v2621_v60 = vld [vmem:[%s3498_s1 + $0x5a8] ss:$100 sps:$4 sm:$0xff]  }
  0x37   :  { %1379 = vmatpush1.bf16.msra.mxu0 %v2515_v50  ;;  %v2635_v50 = vld [vmem:[%s3498_s1 + $0x1cc] ss:$100 sps:$4 sm:$0xff]  }
  0x38   :  { %1380 = vmatprep.subr.bf16.mxu0 %v2523_v53  ;;  %v2633_v53 = vld [vmem:[%s3498_s1 + $0x1c8] ss:$100 sps:$4 sm:$0xff]  }
  0x39   :  { %1420 = vmatpush1.bf16.msra.mxu1 %v2555_v63  ;;  %v2632_v63 = vld [vmem:[%s3498_s1 + $0x44] ss:$100 sps:$4 sm:$0xff]  }
  0x3a   :  { %1421 = vmatprep.subr.bf16.mxu1 %v2563_v0  ;;  %v2630_v0 = vld [vmem:[%s3498_s1 + $0x40] ss:$100 sps:$4 sm:$0xff]  }
  0x3b   :  { %1381 = vmatpush1.bf16.msra.mxu0 %v2521_v54  ;;  %v2641_v54 = vld [vmem:[%s3498_s1 + $0x294] ss:$100 sps:$4 sm:$0xff]  }
  0x3c   :  { %1382 = vmatprep.subr.bf16.mxu0 %v2527_v57  ;;  %v2639_v57 = vld [vmem:[%s3498_s1 + $0x290] ss:$100 sps:$4 sm:$0xff]  }
  0x3d   :  { %1422 = vmatpush1.bf16.msra.mxu1 %v2561_v4  ;;  %v2638_v4 = vld [vmem:[%s3498_s1 + $0x10c] ss:$100 sps:$4 sm:$0xff]  }
  0x3e   :  { %1423 = vmatprep.subr.bf16.mxu1 %v2569_v5  ;;  %v2657_v5 = vld [vmem:[%s3498_s1 + $0x4e8] ss:$100 sps:$4 sm:$0xff]  }
  0x3f   :  { %1383 = vmatpush1.bf16.msra.mxu0 %v2525_v58  ;;  %v2647_v58 = vld [vmem:[%s3498_s1 + $0x35c] ss:$100 sps:$4 sm:$0xff]  }
  0x40   :  { %1450 = vmatprep.subr.bf16.mxu0 %v2536_v61  ;;  %v2645_v61 = vld [vmem:[%s3498_s1 + $0x358] ss:$100 sps:$4 sm:$0xff]  }
  0x41   :  { %1424 = vmatpush1.bf16.msra.mxu1 %v2567_v8  ;;  %v2644_v8 = vld [vmem:[%s3498_s1 + $0x1d4] ss:$100 sps:$4 sm:$0xff]  }
  0x42   :  { %1401 = vmatmul.mubr.bf16.vlgmr.msra.gmra.mrb[4].mxu0 %v2865_v29  ;;  %1491 = vmatprep.subr.bf16.mxu1 %v2578_v9  ;;  %v2642_v9 = vld [vmem:[%s3498_s1 + $0x1d0] ss:$100 sps:$4 sm:$0xff]  }
  0x43   :  { %1451 = vmatpush1.bf16.msra.mxu0 %v2534_v62  ;;  %1482 = vmatprep.mubr.bf16.mxu0 %v2753_v1  ;;  %v2653_v62 = vld [vmem:[%s3498_s1 + $0x424] ss:$100 sps:$4 sm:$0xff]  }
  0x44   :  { %1452 = vmatprep.subr.bf16.mxu0 %v2542_v2  ;;  %1442 = vmatmul.mubr.bf16.vlgmr.msra.gmra.mrb[4].mxu1 %v2865_v29  ;;  %v2651_v2 = vld [vmem:[%s3498_s1 + $0x420] ss:$100 sps:$4 sm:$0xff]  }
  0x45   :  { %1492 = vmatpush1.bf16.msra.mxu1 %v2576_v12  ;;  %1523 = vmatprep.mubr.bf16.mxu1 %v2753_v1  ;;  %v2650_v12 = vld [vmem:[%s3498_s1 + $0x29c] ss:$100 sps:$4 sm:$0xff]  }
  0x46   :  { %1493 = vmatprep.subr.bf16.mxu1 %v2581_v13  ;;  %v2672_v13 = vld [vmem:[%s3498_s1 + $0x48] ss:$100 sps:$4 sm:$0xff]  }
  0x47   :  { %1453 = vmatpush1.bf16.msra.mxu0 %v2540_v3  ;;  %v2659_v3 = vld [vmem:[%s3498_s1 + $0x4ec] ss:$100 sps:$4 sm:$0xff]  }
  0x48   :  { %1454 = vmatprep.subr.bf16.mxu0 %v2548_v6  ;;  %v2636_v6 = vld [vmem:[%s3498_s1 + $0x108] ss:$100 sps:$4 sm:$0xff]  }
  0x49   :  { %1494 = vmatpush1.bf16.msra.mxu1 %v2579_v16  ;;  %v2656_v16 = vld [vmem:[%s3498_s1 + $0x364] ss:$100 sps:$4 sm:$0xff]  }
  0x4a   :  { %1495 = vmatprep.subr.bf16.mxu1 %v2587_v17  ;;  %v2675_v17 = vld [vmem:[%s3498_s1 + $0x110] ss:$100 sps:$4 sm:$0xff]  }
  0x4b   :  { %1455 = vmatpush1.bf16.msra.mxu0 %v2546_v7  ;;  %v2665_v7 = vld [vmem:[%s3498_s1 + $0x5b4] ss:$100 sps:$4 sm:$0xff]  }
  0x4c   :  { %1456 = vmatprep.subr.bf16.mxu0 %v2554_v10  ;;  %v2663_v10 = vld [vmem:[%s3498_s1 + $0x5b0] ss:$100 sps:$4 sm:$0xff]  }
  0x4d   :  { %1496 = vmatpush1.bf16.msra.mxu1 %v2585_v20  ;;  %v2662_v20 = vld [vmem:[%s3498_s1 + $0x42c] ss:$100 sps:$4 sm:$0xff]  }
  0x4e   :  { %1497 = vmatprep.subr.bf16.mxu1 %v2593_v21  ;;  %v2681_v21 = vld [vmem:[%s3498_s1 + $0x1d8] ss:$100 sps:$4 sm:$0xff]  }
  0x4f   :  { %1457 = vmatpush1.bf16.msra.mxu0 %v2552_v11  ;;  %v2674_v11 = vld [vmem:[%s3498_s1 + $0x4c] ss:$100 sps:$4 sm:$0xff]  }
  0x50   :  { %1458 = vmatprep.subr.bf16.mxu0 %v2560_v14  ;;  %v2648_v14 = vld [vmem:[%s3498_s1 + $0x298] ss:$100 sps:$4 sm:$0xff]  }
  0x51   :  { %1498 = vmatpush1.bf16.msra.mxu1 %v2591_v24  ;;  %v2668_v24 = vld [vmem:[%s3498_s1 + $0x4f4] ss:$100 sps:$4 sm:$0xff]  }
  0x52   :  { %1499 = vmatprep.subr.bf16.mxu1 %v2599_v25  ;;  %v2687_v25 = vld [vmem:[%s3498_s1 + $0x2a0] ss:$100 sps:$4 sm:$0xff]  }
  0x53   :  { %1459 = vmatpush1.bf16.msra.mxu0 %v2558_v15  ;;  %v2677_v15 = vld [vmem:[%s3498_s1 + $0x114] ss:$100 sps:$4 sm:$0xff]  }
  0x54   :  { %1460 = vmatprep.subr.bf16.mxu0 %v2566_v18  ;;  %v2654_v18 = vld [vmem:[%s3498_s1 + $0x360] ss:$100 sps:$4 sm:$0xff]  }
  0x55   :  { %1500 = vmatpush1.bf16.msra.mxu1 %v2597_v28  ;;  %v2671_v28 = vld [vmem:[%s3498_s1 + $0x5bc] ss:$100 sps:$4 sm:$0xff]  }
  0x56   :  { %1501 = vmatprep.subr.bf16.mxu1 %v2605_v30  ;;  %v2693_v30 = vld [vmem:[%s3498_s1 + $0x368] ss:$100 sps:$4 sm:$0xff]  }
  0x57   :  { %1461 = vmatpush1.bf16.msra.mxu0 %v2564_v19  ;;  %v2683_v19 = vld [vmem:[%s3498_s1 + $0x1dc] ss:$100 sps:$4 sm:$0xff]  }
  0x58   :  { %1462 = vmatprep.subr.bf16.mxu0 %v2572_v22  ;;  %v2660_v22 = vld [vmem:[%s3498_s1 + $0x428] ss:$100 sps:$4 sm:$0xff]  }
  0x59   :  { %1502 = vmatpush1.bf16.msra.mxu1 %v2603_v33  ;;  %v2680_v33 = vld [vmem:[%s3498_s1 + $0x54] ss:$100 sps:$4 sm:$0xff]  }
  0x5a   :  { %1503 = vmatprep.subr.bf16.mxu1 %v2611_v34  ;;  %v2699_v34 = vld [vmem:[%s3498_s1 + $0x430] ss:$100 sps:$4 sm:$0xff]  }
  0x5b   :  { %1463 = vmatpush1.bf16.msra.mxu0 %v2570_v23  ;;  %v2689_v23 = vld [vmem:[%s3498_s1 + $0x2a4] ss:$100 sps:$4 sm:$0xff]  }
  0x5c   :  { %1464 = vmatprep.subr.bf16.mxu0 %v2575_v26  ;;  %v2666_v26 = vld [vmem:[%s3498_s1 + $0x4f0] ss:$100 sps:$4 sm:$0xff]  }
  0x5d   :  { %1504 = vmatpush1.bf16.msra.mxu1 %v2609_v37  ;;  %v2686_v37 = vld [vmem:[%s3498_s1 + $0x11c] ss:$100 sps:$4 sm:$0xff]  }
  0x5e   :  { %1505 = vmatprep.subr.bf16.mxu1 %v2617_v38  ;;  %v2705_v38 = vld [vmem:[%s3498_s1 + $0x4f8] ss:$100 sps:$4 sm:$0xff]  }
  0x5f   :  { %1465 = vmatpush1.bf16.msra.mxu0 %v2573_v27  ;;  %v2695_v27 = vld [vmem:[%s3498_s1 + $0x36c] ss:$100 sps:$4 sm:$0xff]  }
  0x60   :  { %1532 = vmatprep.subr.bf16.mxu0 %v2584_v31  ;;  %v2669_v31 = vld [vmem:[%s3498_s1 + $0x5b8] ss:$100 sps:$4 sm:$0xff]  }
  0x61   :  { %1506 = vmatpush1.bf16.msra.mxu1 %v2615_v41  ;;  %v2692_v41 = vld [vmem:[%s3498_s1 + $0x1e4] ss:$100 sps:$4 sm:$0xff]  }
  0x62   :  { %1483 = vmatmul.mubr.bf16.vlgmr.msra.gmra.mrb[8].mxu0 %v2865_v29  ;;  %1573 = vmatprep.subr.bf16.mxu1 %v2626_v42  ;;  %v2711_v42 = vld [vmem:[%s3498_s1 + $0x5c0] ss:$100 sps:$4 sm:$0xff]  }
  0x63   :  { %1533 = vmatpush1.bf16.msra.mxu0 %v2582_v32  ;;  %1564 = vmatprep.mubr.bf16.mxu0 %v2753_v1  ;;  %v2701_v32 = vld [vmem:[%s3498_s1 + $0x434] ss:$100 sps:$4 sm:$0xff]  }
  0x64   :  { %1534 = vmatprep.subr.bf16.mxu0 %v2590_v35  ;;  %1524 = vmatmul.mubr.bf16.vlgmr.msra.gmra.mrb[8].mxu1 %v2865_v29  ;;  %v2678_v35 = vld [vmem:[%s3498_s1 + $0x50] ss:$100 sps:$4 sm:$0xff]  }
  0x65   :  { %1574 = vmatpush1.bf16.msra.mxu1 %v2624_v45  ;;  %1605 = vmatprep.mubr.bf16.mxu1 %v2753_v1  ;;  %v2698_v45 = vld [vmem:[%s3498_s1 + $0x2ac] ss:$100 sps:$4 sm:$0xff]  }
  0x66   :  { %1575 = vmatprep.subr.bf16.mxu1 %v2629_v46  ;;  %v2720_v46 = vld [vmem:[%s3498_s1 + $0x58] ss:$100 sps:$4 sm:$0xff]  }
  0x67   :  { %1535 = vmatpush1.bf16.msra.mxu0 %v2588_v36  ;;  %v2707_v36 = vld [vmem:[%s3498_s1 + $0x4fc] ss:$100 sps:$4 sm:$0xff]  }
  0x68   :  { %1536 = vmatprep.subr.bf16.mxu0 %v2596_v39  ;;  %v2684_v39 = vld [vmem:[%s3498_s1 + $0x118] ss:$100 sps:$4 sm:$0xff]  }
  0x69   :  { %1576 = vmatpush1.bf16.msra.mxu1 %v2627_v49  ;;  %v2704_v49 = vld [vmem:[%s3498_s1 + $0x374] ss:$100 sps:$4 sm:$0xff]  }
  0x6a   :  { %1577 = vmatprep.subr.bf16.mxu1 %v2635_v50  ;;  %v2723_v50 = vld [vmem:[%s3498_s1 + $0x120] ss:$100 sps:$4 sm:$0xff]  }
  0x6b   :  { %1537 = vmatpush1.bf16.msra.mxu0 %v2594_v40  ;;  %v2713_v40 = vld [vmem:[%s3498_s1 + $0x5c4] ss:$100 sps:$4 sm:$0xff]  }
  0x6c   :  { %1538 = vmatprep.subr.bf16.mxu0 %v2602_v43  ;;  %v2690_v43 = vld [vmem:[%s3498_s1 + $0x1e0] ss:$100 sps:$4 sm:$0xff]  }
  0x6d   :  { %1578 = vmatpush1.bf16.msra.mxu1 %v2633_v53  ;;  %v2710_v53 = vld [vmem:[%s3498_s1 + $0x43c] ss:$100 sps:$4 sm:$0xff]  }
  0x6e   :  { %1579 = vmatprep.subr.bf16.mxu1 %v2641_v54  ;;  %v2708_v54 = vld [vmem:[%s3498_s1 + $0x438] ss:$100 sps:$4 sm:$0xff]  }
  0x6f   :  { %1539 = vmatpush1.bf16.msra.mxu0 %v2600_v44  ;;  %v2722_v44 = vld [vmem:[%s3498_s1 + $0x5c] ss:$100 sps:$4 sm:$0xff]  }
  0x70   :  { %1540 = vmatprep.subr.bf16.mxu0 %v2608_v47  ;;  %v2696_v47 = vld [vmem:[%s3498_s1 + $0x2a8] ss:$100 sps:$4 sm:$0xff]  }
  0x71   :  { %1580 = vmatpush1.bf16.msra.mxu1 %v2639_v57  ;;  %v2731_v57 = vld [vmem:[%s3498_s1 + $0x2b0] ss:$100 sps:$4 sm:$0xff]  }
  0x72   :  { %1581 = vmatprep.subr.bf16.mxu1 %v2647_v58  ;;  %v2714_v58 = vld [vmem:[%s3498_s1 + $0x500] ss:$100 sps:$4 sm:$0xff]  }
  0x73   :  { %1541 = vmatpush1.bf16.msra.mxu0 %v2606_v48  ;;  %v2725_v48 = vld [vmem:[%s3498_s1 + $0x124] ss:$100 sps:$4 sm:$0xff]  }
  0x74   :  { %1542 = vmatprep.subr.bf16.mxu0 %v2614_v51  ;;  %v2702_v51 = vld [vmem:[%s3498_s1 + $0x370] ss:$100 sps:$4 sm:$0xff]  }
  0x75   :  { %1582 = vmatpush1.bf16.msra.mxu1 %v2645_v61  ;;  %v2735_v61 = vld [vmem:[%s3498_s1 + $0x378] ss:$100 sps:$4 sm:$0xff]  }
  0x76   :  { %1583 = vmatprep.subr.bf16.mxu1 %v2653_v62  ;;  %v2717_v62 = vld [vmem:[%s3498_s1 + $0x5c8] ss:$100 sps:$4 sm:$0xff]  }
  0x77   :  { %1543 = vmatpush1.bf16.msra.mxu0 %v2612_v52  ;;  %v2729_v52 = vld [vmem:[%s3498_s1 + $0x1ec] ss:$100 sps:$4 sm:$0xff]  }
  0x78   :  { %1544 = vmatprep.subr.bf16.mxu0 %v2620_v55  ;;  %v2733_v55 = vld [vmem:[%s3498_s1 + $0x2b4] ss:$100 sps:$4 sm:$0xff]  }
  0x79   :  { %1584 = vmatpush1.bf16.msra.mxu1 %v2651_v2  ;;  %v2726_v2 = vld [vmem:[%s3498_s1 + $0x60] ss:$100 sps:$4 sm:$0xff]  }
  0x7a   :  { %1585 = vmatprep.subr.bf16.mxu1 %v2659_v3  ;;  %v2745_v3 = vld [vmem:[%s3498_s1 + $0x50c] ss:$100 sps:$4 sm:$0xff]  }
  0x7b   :  { %1545 = vmatpush1.bf16.msra.mxu0 %v2618_v56  ;;  %v2716_v56 = vld [vmem:[%s3498_s1 + $0x504] ss:$100 sps:$4 sm:$0xff]  }
  0x7c   :  { %1546 = vmatprep.subr.bf16.mxu0 %v2623_v59  ;;  %v2737_v59 = vld [vmem:[%s3498_s1 + $0x37c] ss:$100 sps:$4 sm:$0xff]  }
  0x7d   :  { %1586 = vmatpush1.bf16.msra.mxu1 %v2657_v5  ;;  %v2743_v5 = vld [vmem:[%s3498_s1 + $0x508] ss:$100 sps:$4 sm:$0xff]  }
  0x7e   :  { %1587 = vmatprep.subr.bf16.mxu1 %v2665_v7  ;;  %v2749_v7 = vld [vmem:[%s3498_s1 + $0x5d4] ss:$100 sps:$4 sm:$0xff]  }
  0x7f   :  { %1547 = vmatpush1.bf16.msra.mxu0 %v2621_v60  ;;  %v2719_v60 = vld [vmem:[%s3498_s1 + $0x5cc] ss:$100 sps:$4 sm:$0xff]  }
  0x80   :  { %1614 = vmatprep.subr.bf16.mxu0 %v2632_v63  ;;  %v2741_v63 = vld [vmem:[%s3498_s1 + $0x444] ss:$100 sps:$4 sm:$0xff]  }
  0x81   :  { %1588 = vmatpush1.bf16.msra.mxu1 %v2663_v10  ;;  %v2752_v10 = vld [vmem:[%s3499_s0] sm:$0xf] }
  0x82   :  { %1565 = vmatmul.mubr.bf16.vlgmr.msra.gmra.mrb[12].mxu0 %v2865_v29  ;;  %1655 = vmatprep.subr.bf16.mxu1 %v2674_v11  ;;  %v2742_v11 = vld [vmem:[%s3498_s1 + $0x380] ss:$100 sps:$4 sm:$0xff]  }
  0x83   :  { %1615 = vmatpush1.bf16.msra.mxu0 %v2630_v0  ;;  %1646 = vmatprep.mubr.bf16.mxu0 %v2753_v1  ;;  %v2739_v0 = vld [vmem:[%s3498_s1 + $0x440] ss:$100 sps:$4 sm:$0xff]  }
  0x84   :  { %1616 = vmatprep.subr.bf16.mxu0 %v2638_v4  ;;  %1606 = vmatmul.mubr.bf16.vlgmr.msra.gmra.mrb[12].mxu1 %v2865_v29  ;;  %v2754_v4 = vmov 0.0  }
  0x85   :  { %1656 = vmatpush1.bf16.msra.mxu1 %v2672_v13  ;;  %1687 = vmatprep.mubr.bf16.mxu1 %v2753_v1  ;;  %v2750_v13 = vld [vmem:[%s3498_s1 + $0x510] ss:$100 sps:$4 sm:$0xff]  }
  0x86   :  { %1657 = vmatprep.subr.bf16.mxu1 %v2677_v15  ;;  %v1904_v15 = vlaneseq }
  0x87   :  { %1617 = vmatpush1.bf16.msra.mxu0 %v2636_v6  ;;  %v2730_v6 = vld [vmem:[%s3498_s1 + $0x128] ss:$100 sps:$4 sm:$0xff]  }
  0x88   :  { %1618 = vmatprep.subr.bf16.mxu0 %v2644_v8  ;;  %v2734_v8 = vld [vmem:[%s3498_s1 + $0x1f0] ss:$100 sps:$4 sm:$0xff]  }
  0x89   :  { %1658 = vmatpush1.bf16.msra.mxu1 %v2675_v17 }
  0x8a   :  { %1659 = vmatprep.subr.bf16.mxu1 %v2683_v19 }
  0x8b   :  { %1619 = vmatpush1.bf16.msra.mxu0 %v2642_v9  ;;  %v2738_v9 = vld [vmem:[%s3498_s1 + $0x2b8] ss:$100 sps:$4 sm:$0xff]  }
  0x8c   :  { %1620 = vmatprep.subr.bf16.mxu0 %v2650_v12  ;;  %v2746_v12 = vld [vmem:[%s3498_s1 + $0x448] ss:$100 sps:$4 sm:$0xff]  }
  0x8d   :  { %1660 = vmatpush1.bf16.msra.mxu1 %v2681_v21 }
  0x8e   :  { %1661 = vmatprep.subr.bf16.mxu1 %v2689_v23 }
  0x8f   :  { %1621 = vmatpush1.bf16.msra.mxu0 %v2648_v14  ;;  %v2751_v14 = vld [vmem:[%s3498_s1 + $0x5d8] ss:$100 sps:$4 sm:$0xff]  }
  0x90   :  { %1622 = vmatprep.subr.bf16.mxu0 %v2656_v16  ;;  %v1905_v16 = vshrl.u32 %v1904_v15, 7 }
  0x91   :  { %1662 = vmatpush1.bf16.msra.mxu1 %v2687_v25 }
  0x92   :  { %1663 = vmatprep.subr.bf16.mxu1 %v2695_v27  ;;  %v3407_v17 = vsub.s32 0, %v1905_v16  ;;  %v3412_v19 = vsub.s32 1, %v1905_v16 }
  0x93   :  { %1623 = vmatpush1.bf16.msra.mxu0 %v2654_v18  ;;  %v1896_v18 = vld [vmem:[%s3500_s2] sm:$0xff] }
  0x94   :  { %1624 = vmatprep.subr.bf16.mxu0 %v2662_v20  ;;  %v1907_v20 = vrot.slane %v1896_v18, %v3407_v17  ;;  %v1911_v21 = vrot.slane %v1896_v18, %v3412_v19 }
  0x95   :  { %1664 = vmatpush1.bf16.msra.mxu1 %v2693_v30 }
  0x96   :  { %1665 = vmatprep.subr.bf16.mxu1 %v2701_v32  ;;  %v3418_v32 = vsub.s32 3, %v1905_v16 }
  0x97   :  { %1625 = vmatpush1.bf16.msra.mxu0 %v2660_v22 }
  0x98   :  { %1626 = vmatprep.subr.bf16.mxu0 %v2668_v24 }
  0x99   :  { %1666 = vmatpush1.bf16.msra.mxu1 %v2699_v34 }
  0x9a   :  { %1667 = vmatprep.subr.bf16.mxu1 %v2707_v36 }
  0x9b   :  { %1627 = vmatpush1.bf16.msra.mxu0 %v2666_v26 }
  0x9c   :  { %1628 = vmatprep.subr.bf16.mxu0 %v2671_v28 }
  0x9d   :  { %1668 = vmatpush1.bf16.msra.mxu1 %v2705_v38 }
  0x9e   :  { %1669 = vmatprep.subr.bf16.mxu1 %v2713_v40 }
  0x9f   :  { %1629 = vmatpush1.bf16.msra.mxu0 %v2669_v31  ;;  %v3416_v31 = vsub.s32 2, %v1905_v16 }
  0xa0   :  { %1696 = vmatprep.subr.bf16.mxu0 %v2680_v33 }
  0xa1   :  { %1670 = vmatpush1.bf16.msra.mxu1 %v2711_v42  ;;  %v1915_v34 = vrot.slane %v1896_v18, %v3416_v31 }
  0xa2   :  { %1647 = vmatmul.mubr.bf16.vlgmr.msra.gmra.mrb[16].mxu0 %v2865_v29  ;;  %1737 = vmatprep.subr.bf16.mxu1 %v2722_v44 }
  0xa3   :  { %1697 = vmatpush1.bf16.msra.mxu0 %v2678_v35  ;;  %1728 = vmatprep.mubr.bf16.mxu0 %v2753_v1  ;;  %v1919_v35 = vrot.slane %v1896_v18, %v3418_v32 }
  0xa4   :  { %1698 = vmatprep.subr.bf16.mxu0 %v2686_v37  ;;  %1688 = vmatmul.mubr.bf16.vlgmr.msra.gmra.mrb[16].mxu1 %v2865_v29 }
  0xa5   :  { %1738 = vmatpush1.bf16.msra.mxu1 %v2720_v46  ;;  %1769 = vmatprep.mubr.bf16.mxu1 %v2753_v1  ;;  %v2727_v1 = vld [vmem:[%s3498_s1 + $0x1e8] ss:$100 sps:$4 sm:$0xff]   ;;  %v3430_v46 = vsub.s32 5, %v1905_v16 }
  0xa6   :  { %1739 = vmatprep.subr.bf16.mxu1 %v2725_v48 }
  0xa7   :  { %1699 = vmatpush1.bf16.msra.mxu0 %v2684_v39  ;;  %v1927_v48 = vrot.slane %v1896_v18, %v3430_v46 }
  0xa8   :  { %1700 = vmatprep.subr.bf16.mxu0 %v2692_v41 }
  0xa9   :  { %1740 = vmatpush1.bf16.msra.mxu1 %v2723_v50 }
  0xaa   :  { %1741 = vmatprep.subr.bf16.mxu1 %v2729_v52 }
  0xab   :  { %1701 = vmatpush1.bf16.msra.mxu0 %v2690_v43 }
  0xac   :  { %1702 = vmatprep.subr.bf16.mxu0 %v2698_v45  ;;  %v3428_v45 = vsub.s32 4, %v1905_v16 }
  0xad   :  { %1742 = vmatpush1.bf16.msra.mxu1 %v2727_v1 }
  0xae   :  { %1743 = vmatprep.subr.bf16.mxu1 %v2733_v55 }
  0xaf   :  { %1703 = vmatpush1.bf16.msra.mxu0 %v2696_v47  ;;  %v1923_v47 = vrot.slane %v1896_v18, %v3428_v45 }
  0xb0   :  { %1704 = vmatprep.subr.bf16.mxu0 %v2704_v49 }
  0xb1   :  { %1744 = vmatpush1.bf16.msra.mxu1 %v2731_v57  ;;  %v3436_v57 = vsub.s32 7, %v1905_v16 }
  0xb2   :  { %1745 = vmatprep.subr.bf16.mxu1 %v2737_v59 }
  0xb3   :  { %1705 = vmatpush1.bf16.msra.mxu0 %v2702_v51 }
  0xb4   :  { %1706 = vmatprep.subr.bf16.mxu0 %v2710_v53 }
  0xb5   :  { %1746 = vmatpush1.bf16.msra.mxu1 %v2735_v61 }
  0xb6   :  { %1747 = vmatprep.subr.bf16.mxu1 %v2741_v63 }
  0xb7   :  { %1707 = vmatpush1.bf16.msra.mxu0 %v2708_v54 }
  0xb8   :  { %1708 = vmatprep.subr.bf16.mxu0 %v2716_v56  ;;  %v3434_v56 = vsub.s32 6, %v1905_v16 }
  0xb9   :  { %1748 = vmatpush1.bf16.msra.mxu1 %v2739_v0 }
  0xba   :  { %1749 = vmatprep.subr.bf16.mxu1 %v2745_v3  ;;  %v1931_v59 = vrot.slane %v1896_v18, %v3434_v56 }
  0xbb   :  { %1709 = vmatpush1.bf16.msra.mxu0 %v2714_v58 }
  0xbc   :  { %1710 = vmatprep.subr.bf16.mxu0 %v2719_v60  ;;  %v1935_v60 = vrot.slane %v1896_v18, %v3436_v57 }
  0xbd   :  { %1750 = vmatpush1.bf16.msra.mxu1 %v2743_v5 }
  0xbe   :  { %1751 = vmatprep.subr.bf16.mxu1 %v2749_v7  ;;  %v1897_v7 = vld [vmem:[%s3500_s2 + $0x8] sm:$0xff] }
  0xbf   :  { %1711 = vmatpush1.bf16.msra.mxu0 %v2717_v62 }
  0xc0   :  { %2433 = vmatprep.subr.bf16.mxu0 %v2754_v4 }
  0xc2   :  { %1729 = vmatmul.mubr.bf16.vlgmr.msra.gmra.mrb[20].mxu0 %v2865_v29  ;;  %v2747_v29 = vld [vmem:[%s3498_s1 + $0x5d0] ss:$100 sps:$4 sm:$0xff]  }
  0xc3   :  { %2434 = vmatpush3.bf16.msra.mxu0 %v2726_v2  ;;  %2449 = vmatprep.mubr.msk.bf16.mxu0 %vm2755_vm0, %v2754_v4 }
  0xc4   :  { %2435 = vmatprep.subr.bf16.mxu0 %v2754_v4  ;;  %1752 = vmatpush1.bf16.msra.mxu1 %v2747_v29  ;;  %v1939_v29 = vrot.slane %v1897_v7, %v3407_v17 }
  0xc7   :  { %2436 = vmatpush3.bf16.msra.mxu0 %v2730_v6  ;;  %1770 = vmatmul.mubr.bf16.vlgmr.msra.gmra.mrb[20].mxu1 %v2752_v10 }
  0xc8   :  { %2437 = vmatprep.subr.bf16.mxu0 %v2754_v4 }
  0xcb   :  { %2438 = vmatpush3.bf16.msra.mxu0 %v2734_v8  ;;  %v1943_v8 = vrot.slane %v1897_v7, %v3412_v19 }
  0xcc   :  { %2439 = vmatprep.subr.bf16.mxu0 %v2754_v4 }
  0xcf   :  { %2440 = vmatpush3.bf16.msra.mxu0 %v2738_v9 }
  0xd0   :  { %2441 = vmatprep.subr.bf16.mxu0 %v2754_v4 }
  0xd3   :  { %2442 = vmatpush3.bf16.msra.mxu0 %v2742_v11 }
  0xd4   :  { %2443 = vmatprep.subr.bf16.mxu0 %v2754_v4 }
  0xd7   :  { %2444 = vmatpush3.bf16.msra.mxu0 %v2746_v12 }
  0xd8   :  { %2445 = vmatprep.subr.bf16.mxu0 %v2754_v4 }
  0xdb   :  { %2446 = vmatpush3.bf16.msra.mxu0 %v2750_v13 }
  0xdc   :  { %2447 = vmatprep.subr.bf16.mxu0 %v2754_v4 }
  0xdf   :  { %2448 = vmatpush3.bf16.msra.mxu0 %v2751_v14 }
  0xe2   :  { %2450 = vmatmul.mubr.bf16.vlgmr.msra.gmra.mrb[24].mxu0 %v2752_v10 }
  0xf5   :  { %v1320_v22 = vpop.f32.mrb[0].mxu0 }
  0xf6   :  { %v2029_v23 = vadd.f32 %v1907_v20, %v1320_v22  ;;  %v1322_v24 = vpop.f32.mrb[1].mxu0  ;;  %v1947_v20 = vrot.slane %v1897_v7, %v3416_v31 }
  0xf7   :  { %v2030_v25 = vadd.f32 %v1911_v21, %v1322_v24  ;;  %v1324_v26 = vpop.f32.mrb[2].mxu0  ;;  %v1361_v36 = vpop.f32.mrb[0].mxu1  ;;  %v1951_v21 = vrot.slane %v1897_v7, %v3418_v32 }
  0xf8   :  { %v2054_v27 = vmax.f32 %v2029_v23, 0.0  ;;  %v1325_v28 = vpop.f32.mrb[3].mxu0  ;;  %v2031_v37 = vadd.f32 %v1915_v34, %v1361_v36  ;;  %v1363_v38 = vpop.f32.mrb[1].mxu1  ;;  %v1955_v34 = vrot.slane %v1897_v7, %v3428_v45 }
  0xf9   :  { %v2055_v30 = vmax.f32 %v2030_v25, 0.0  ;;  %v2032_v39 = vadd.f32 %v1919_v35, %v1363_v38  ;;  %v1365_v40 = vpop.f32.mrb[2].mxu1  ;;  %v1959_v35 = vrot.slane %v1897_v7, %v3430_v46 }
  0xfa   :  { %v2056_v41 = vmax.f32 %v2031_v37, 0.0  ;;  %v1366_v42 = vpop.f32.mrb[3].mxu1 }
  0xfb   :  { %v2411_v33 = vpack.c.bf16 %v2055_v30, %v2054_v27  ;;  %v2057_v43 = vmax.f32 %v2032_v39, 0.0 }
  0xfd   :  { %2180 = vst [vmem:[%s3501_s3] sm:$0xff] %v2411_v33  ;;  %v2412_v44 = vpack.c.bf16 %v2057_v43, %v2056_v41 }
  0xff   :  { %2181 = vst [vmem:[%s3501_s3 + $0x8] sm:$0xff] %v2412_v44 }
 0x115   :  { %v1402_v49 = vpop.f32.mrb[4].mxu0 }
 0x116   :  { %v2033_v50 = vadd.f32 %v1923_v47, %v1402_v49  ;;  %v1404_v51 = vpop.f32.mrb[5].mxu0  ;;  %v1963_v47 = vrot.slane %v1897_v7, %v3434_v56 }
 0x117   :  { %v2034_v52 = vadd.f32 %v1927_v48, %v1404_v51  ;;  %v1406_v53 = vpop.f32.mrb[6].mxu0  ;;  %v1443_v61 = vpop.f32.mrb[4].mxu1  ;;  %v1967_v48 = vrot.slane %v1897_v7, %v3436_v57 }
 0x118   :  { %v2058_v1 = vmax.f32 %v2033_v50, 0.0  ;;  %v1407_v54 = vpop.f32.mrb[7].mxu0  ;;  %v2035_v62 = vadd.f32 %v1931_v59, %v1443_v61  ;;  %v1445_v63 = vpop.f32.mrb[5].mxu1  ;;  %v1898_v59 = vld [vmem:[%s3500_s2 + $0x10] sm:$0xff] }
 0x119   :  { %v2059_v55 = vmax.f32 %v2034_v52, 0.0  ;;  %v2036_v0 = vadd.f32 %v1935_v60, %v1445_v63  ;;  %v1447_v2 = vpop.f32.mrb[6].mxu1  ;;  %v1971_v60 = vrot.slane %v1898_v59, %v3407_v17  ;;  %v1975_v61 = vrot.slane %v1898_v59, %v3412_v19 }
 0x11a   :  { %v2060_v3 = vmax.f32 %v2035_v62, 0.0  ;;  %v1448_v4 = vpop.f32.mrb[7].mxu1 }
 0x11b   :  { %v2413_v58 = vpack.c.bf16 %v2059_v55, %v2058_v1  ;;  %v2061_v5 = vmax.f32 %v2036_v0, 0.0 }
 0x11d   :  { %2182 = vst [vmem:[%s3501_s3 + $0x10] sm:$0xff] %v2413_v58  ;;  %v2414_v6 = vpack.c.bf16 %v2061_v5, %v2060_v3 }
 0x11f   :  { %2183 = vst [vmem:[%s3501_s3 + $0x18] sm:$0xff] %v2414_v6 }
 0x135   :  { %v1484_v9 = vpop.f32.mrb[8].mxu0 }
 0x136   :  { %v2037_v10 = vadd.f32 %v1939_v29, %v1484_v9  ;;  %v1486_v11 = vpop.f32.mrb[9].mxu0  ;;  %v1979_v29 = vrot.slane %v1898_v59, %v3416_v31 }
 0x137   :  { %v2038_v12 = vadd.f32 %v1943_v8, %v1486_v11  ;;  %v1488_v13 = vpop.f32.mrb[10].mxu0  ;;  %v1525_v22 = vpop.f32.mrb[8].mxu1  ;;  %v1983_v8 = vrot.slane %v1898_v59, %v3418_v32 }
 0x138   :  { %v2062_v14 = vmax.f32 %v2037_v10, 0.0  ;;  %v1489_v15 = vpop.f32.mrb[11].mxu0  ;;  %v2039_v23 = vadd.f32 %v1947_v20, %v1525_v22  ;;  %v1527_v24 = vpop.f32.mrb[9].mxu1 }
 0x139   :  { %v2063_v16 = vmax.f32 %v2038_v12, 0.0  ;;  %v2040_v25 = vadd.f32 %v1951_v21, %v1527_v24  ;;  %v1529_v26 = vpop.f32.mrb[10].mxu1 }
 0x13a   :  { %v2064_v27 = vmax.f32 %v2039_v23, 0.0  ;;  %v1530_v28 = vpop.f32.mrb[11].mxu1 }
 0x13b   :  { %v2415_v18 = vpack.c.bf16 %v2063_v16, %v2062_v14  ;;  %v2065_v30 = vmax.f32 %v2040_v25, 0.0  ;;  %v1987_v16 = vrot.slane %v1898_v59, %v3428_v45  ;;  %v1999_v28 = vrot.slane %v1898_v59, %v3436_v57 }
 0x13d   :  { %2184 = vst [vmem:[%s3501_s3 + $0x20] sm:$0xff] %v2415_v18  ;;  %v2416_v33 = vpack.c.bf16 %v2065_v30, %v2064_v27  ;;  %v1991_v18 = vrot.slane %v1898_v59, %v3430_v46  ;;  %v1995_v27 = vrot.slane %v1898_v59, %v3434_v56 }
 0x13f   :  { %2185 = vst [vmem:[%s3501_s3 + $0x28] sm:$0xff] %v2416_v33 }
 0x155   :  { %v1566_v36 = vpop.f32.mrb[12].mxu0 }
 0x156   :  { %v2041_v37 = vadd.f32 %v1955_v34, %v1566_v36  ;;  %v1568_v38 = vpop.f32.mrb[13].mxu0 }
 0x157   :  { %v2042_v39 = vadd.f32 %v1959_v35, %v1568_v38  ;;  %v1570_v40 = vpop.f32.mrb[14].mxu0  ;;  %v1607_v49 = vpop.f32.mrb[12].mxu1 }
 0x158   :  { %v2066_v41 = vmax.f32 %v2041_v37, 0.0  ;;  %v1571_v42 = vpop.f32.mrb[15].mxu0  ;;  %v2043_v50 = vadd.f32 %v1963_v47, %v1607_v49  ;;  %v1609_v51 = vpop.f32.mrb[13].mxu1 }
 0x159   :  { %v2067_v43 = vmax.f32 %v2042_v39, 0.0  ;;  %v2044_v52 = vadd.f32 %v1967_v48, %v1609_v51  ;;  %v1611_v53 = vpop.f32.mrb[14].mxu1  ;;  %v2397_v39 = vld [vmem:[%s3500_s2 + $0x18] ss:$0 sm:$0xff] }
 0x15a   :  { %v2068_v1 = vmax.f32 %v2043_v50, 0.0  ;;  %v1612_v54 = vpop.f32.mrb[15].mxu1 }
 0x15b   :  { %v2417_v44 = vpack.c.bf16 %v2067_v43, %v2066_v41  ;;  %v2069_v55 = vmax.f32 %v2044_v52, 0.0 }
 0x15d   :  { %2186 = vst [vmem:[%s3501_s3 + $0x30] sm:$0xff] %v2417_v44  ;;  %v2418_v58 = vpack.c.bf16 %v2069_v55, %v2068_v1 }
 0x15f   :  { %2187 = vst [vmem:[%s3501_s3 + $0x38] sm:$0xff] %v2418_v58 }
 0x175   :  { %v1648_v62 = vpop.f32.mrb[16].mxu0 }
 0x176   :  { %v2045_v63 = vadd.f32 %v1971_v60, %v1648_v62  ;;  %v1650_v0 = vpop.f32.mrb[17].mxu0 }
 0x177   :  { %v2046_v2 = vadd.f32 %v1975_v61, %v1650_v0  ;;  %v1652_v3 = vpop.f32.mrb[18].mxu0  ;;  %v1689_v17 = vpop.f32.mrb[16].mxu1 }
 0x178   :  { %v2070_v4 = vmax.f32 %v2045_v63, 0.0  ;;  %v1653_v5 = vpop.f32.mrb[19].mxu0  ;;  %v2047_v9 = vadd.f32 %v1979_v29, %v1689_v17  ;;  %v1691_v19 = vpop.f32.mrb[17].mxu1 }
 0x179   :  { %v2071_v6 = vmax.f32 %v2046_v2, 0.0  ;;  %v2048_v10 = vadd.f32 %v1983_v8, %v1691_v19  ;;  %v1693_v11 = vpop.f32.mrb[18].mxu1 }
 0x17a   :  { %v2072_v12 = vmax.f32 %v2047_v9, 0.0  ;;  %v1694_v13 = vpop.f32.mrb[19].mxu1 }
 0x17b   :  { %v2419_v7 = vpack.c.bf16 %v2071_v6, %v2070_v4  ;;  %v2073_v14 = vmax.f32 %v2048_v10, 0.0 }
 0x17d   :  { %2188 = vst [vmem:[%s3501_s3 + $0x40] sm:$0xff] %v2419_v7  ;;  %v2420_v15 = vpack.c.bf16 %v2073_v14, %v2072_v12 }
 0x17f   :  { %2189 = vst [vmem:[%s3501_s3 + $0x48] sm:$0xff] %v2420_v15 }
 0x195   :  { %v1730_v31 = vpop.f32.mrb[20].mxu0 }
 0x196   :  { %v2049_v20 = vadd.f32 %v1987_v16, %v1730_v31  ;;  %v1732_v32 = vpop.f32.mrb[21].mxu0 }
 0x197   :  { %v2050_v21 = vadd.f32 %v1991_v18, %v1732_v32  ;;  %v1734_v22 = vpop.f32.mrb[22].mxu0 }
 0x198   :  { %v2074_v23 = vmax.f32 %v2049_v20, 0.0  ;;  %v1735_v24 = vpop.f32.mrb[23].mxu0 }
 0x199   :  { %v2075_v25 = vmax.f32 %v2050_v21, 0.0 }
 0x19a   :  { %v1771_v45 = vpop.f32.mrb[20].mxu1 }
 0x19b   :  { %v2421_v26 = vpack.c.bf16 %v2075_v25, %v2074_v23  ;;  %v2051_v30 = vadd.f32 %v1995_v27, %v1771_v45  ;;  %v1773_v46 = vpop.f32.mrb[21].mxu1 }
 0x19c   :  { %v2052_v33 = vadd.f32 %v1999_v28, %v1773_v46  ;;  %v1775_v34 = vpop.f32.mrb[22].mxu1 }
 0x19d   :  { %2190 = vst [vmem:[%s3501_s3 + $0x50] sm:$0xff] %v2421_v26  ;;  %v2076_v35 = vmax.f32 %v2051_v30, 0.0  ;;  %v1776_v36 = vpop.f32.mrb[23].mxu1 }
 0x19e   :  { %v2077_v37 = vmax.f32 %v2052_v33, 0.0 }
 0x1a0   :  { %v2422_v38 = vpack.c.bf16 %v2077_v37, %v2076_v35 }
 0x1a2   :  { %2191 = vst [vmem:[%s3501_s3 + $0x58] sm:$0xff] %v2422_v38 }
 0x1b5   :  { %v1812_v56 = vpop.f32.mrb[24].mxu0 }
 0x1b6   :  { %v2053_v40 = vadd.f32 %v2397_v39, %v1812_v56  ;;  %v2451_v57 = vpop.f32.mrb[25].mxu0 }
 0x1b7   :  { %v1815_v41 = vpop.f32.mrb[26].mxu0 }
 0x1b8   :  { %v2078_v42 = vmax.f32 %v2053_v40, 0.0  ;;  %v2452_v43 = vpop.f32.mrb[27].mxu0 }
 0x1ba   :  { %v2423_v44 = vpack.c.bf16 %v2078_v42, %v2078_v42 }
 0x1bc   :  { %2192 = vst [vmem:[%s3501_s3 + $0x60] sm:$0xf] %v2423_v44 }

// kernel: vae_forward.14
= control target key start
LH: loop header
LB: loop body
LE: loop exit
PB: predicated region body
PF: predicated region fallthrough
CT: control target
= control target key end

     0   :  { %s1675_s12 = smov 0   ;;  %s1677_s13 = smov 0   ;;  %s1849_s0 = inlined_call_operand.vmem [shape: bf16[512,256], index: 0, kind: input, shape index: {}]   ;;  %s1850_s1 = inlined_call_operand.vmem [shape: bf16[256,128], index: 1, kind: input, shape index: {}]   ;;  %s1851_s2 = inlined_call_operand.vmem [shape: f32[1,128], index: 2, kind: input, shape index: {}]   ;;  %s1852_s3 = inlined_call_operand.vmem [shape: bf16[512,128], index: 3, kind: output, shape index: {}]  }
   0x1   :  { %s1679_s14 = smov 0  }
   0x2 LB: > { %s25_s15 = sadd.s32 1, %s1649_s13  ;;  %p1198_p0 = scmp.ge.s32.totalorder %s1653_s14, 1  ;;  %s1653_s14 = sphi %s1679_s14, %s13_s14   ;;  %s1649_s13 = sphi %s1677_s13, %s1854_s13   ;;  %s1645_s12 = sphi %s1675_s12, %s1853_s12  }
   0x3   : > { %p27_p1 = scmp.ge.s32.totalorder %s25_s15, 2  ;;  %p169_p2 = scmp.lt.s32.totalorder %s1653_s14, 3 }
   0x5   : > { %s1856_s15 = smov (%p27_p1, %s25_s15), 0  ;;  %p170_p3 = pnand %p1198_p0, %p169_p2 }
   0x6   : > { %v1567_v0 = vld [vmem:[%s1850_s1 + $0x40] sm:$0xff] (!%p170_p3)   ;;  %s1199_s18 = sshll.u32 (!%p170_p3), %s1645_s12, 5  ;;  %v1569_v2 = vld [vmem:[%s1850_s1 + $0x48] sm:$0xff] (!%p170_p3)   ;;  %v1571_v4 = vld [vmem:[%s1850_s1 + $0x50] sm:$0xff] (!%p170_p3)  }
   0x7   : > { %173 = sbr.rel (%p170_p3) target bundleno = 320 (0x140), region = 32  ;;  %v1568_v1 = vld [vmem:[%s1850_s1] sm:$0xff] (!%p170_p3)   ;;  %1415 = vmatprep.subr.bf16.mxu0 (!%p170_p3), %v1567_v0  ;;  %1527 = vmatprep.subr.bf16.mxu1 (!%p170_p3), %v1567_v0  ;;  %v1570_v3 = vld [vmem:[%s1850_s1 + $0x8] sm:$0xff] (!%p170_p3)   ;;  %p205_p4 = scmp.lt.s32.totalorder (!%p170_p3), %s1199_s18, 63  ;;  %v1572_v5 = vld [vmem:[%s1850_s1 + $0x10] sm:$0xff] (!%p170_p3)  }
   0x8   : > { %1416 = vmatpush3.bf16.msra.mxu0 (!%p170_p3), %v1568_v1  ;;  %1535 = vmatpush3.bf16.msra.mxu1 (!%p170_p3), %v1568_v1  ;;  %v1573_v6 = vld [vmem:[%s1850_s1 + $0x58] sm:$0xff] (!%p170_p3)   ;;  %v1575_v8 = vld [vmem:[%s1850_s1 + $0x60] sm:$0xff] (!%p170_p3)   ;;  %v1577_v10 = vld [vmem:[%s1850_s1 + $0x68] sm:$0xff] (!%p170_p3)  }
   0x9   : > { %1417 = vmatprep.subr.bf16.mxu0 (!%p170_p3), %v1569_v2  ;;  %1528 = vmatprep.subr.bf16.mxu1 (!%p170_p3), %v1569_v2  ;;  %v1574_v7 = vld [vmem:[%s1850_s1 + $0x18] sm:$0xff] (!%p170_p3)   ;;  %v1576_v9 = vld [vmem:[%s1850_s1 + $0x20] sm:$0xff] (!%p170_p3)   ;;  %v1578_v13 = vld [vmem:[%s1850_s1 + $0x28] sm:$0xff] (!%p170_p3)  }
   0xa   : > { %v1579_v14 = vld [vmem:[%s1850_s1 + $0x70] sm:$0xff] (!%p170_p3)   ;;  %v1581_v16 = vld [vmem:[%s1850_s1 + $0x78] sm:$0xff] (!%p170_p3)   ;;  %v1784_v51 = vld [vmem:[%s1851_s2] ss:$0 sm:$0xff] (!%p170_p3) }
   0xb   : > { %v1580_v15 = vld [vmem:[%s1850_s1 + $0x30] sm:$0xff] (!%p170_p3)   ;;  %v1582_v17 = vld [vmem:[%s1850_s1 + $0x38] sm:$0xff] (!%p170_p3)  }
   0xc   : > { %1418 = vmatpush3.bf16.msra.mxu0 (!%p170_p3), %v1570_v3  ;;  %1536 = vmatpush3.bf16.msra.mxu1 (!%p170_p3), %v1570_v3 }
   0xd   : > { %1419 = vmatprep.subr.bf16.mxu0 (!%p170_p3), %v1571_v4  ;;  %1529 = vmatprep.subr.bf16.mxu1 (!%p170_p3), %v1571_v4 }
   0xe   : > { %s1858_s18 = smov (!%p205_p4, %s1199_s18), 63 }
   0xf   : > { %s1287_s6 = sshll.u32 %s1858_s18, 3  ;;  %s1203_s5 = sshll.u32 %s1858_s18, 2 }
  0x10   : > { %1420 = vmatpush3.bf16.msra.mxu0 %v1572_v5  ;;  %1537 = vmatpush3.bf16.msra.mxu1 %v1572_v5  ;;  %s1726_s11 = scalar_lea.vmem %s1849_s0, %s1287_s6  ;;  %s1794_s8 = scalar_lea.vmem %s1852_s3, %s1203_s5 }
  0x11   : > { %1421 = vmatprep.subr.bf16.mxu0 %v1573_v6  ;;  %1530 = vmatprep.subr.bf16.mxu1 %v1573_v6  ;;  %v1585_v11 = vld [vmem:[%s1726_s11 + $0x4] ss:$8 sps:$4 sm:$0xff]   ;;  %v1583_v18 = vld [vmem:[%s1726_s11] ss:$8 sps:$4 sm:$0xff]   ;;  %v1589_v20 = vld [vmem:[%s1726_s11 + $0x14] ss:$8 sps:$4 sm:$0xff]  }
  0x12   : > { %v1588_v12 = vld [vmem:[%s1726_s11 + $0x84] ss:$8 sps:$4 sm:$0xff]   ;;  %648 = vmatprep.mubr.bf16.mxu0 %v1585_v11  ;;  %v1586_v19 = vld [vmem:[%s1726_s11 + $0x80] ss:$8 sps:$4 sm:$0xff]   ;;  %v1591_v21 = vld [vmem:[%s1726_s11 + $0x94] ss:$8 sps:$4 sm:$0xff]  }
  0x13   : > { %712 = vmatprep.mubr.bf16.mxu1 %v1588_v12  ;;  %v1593_v22 = vld [vmem:[%s1726_s11 + $0x10] ss:$8 sps:$4 sm:$0xff]   ;;  %v1595_v24 = vld [vmem:[%s1726_s11 + $0x24] ss:$8 sps:$4 sm:$0xff]   ;;  %v1599_v26 = vld [vmem:[%s1726_s11 + $0x20] ss:$8 sps:$4 sm:$0xff]  }
  0x14   : > { %1422 = vmatpush3.bf16.msra.mxu0 %v1574_v7  ;;  %1538 = vmatpush3.bf16.msra.mxu1 %v1574_v7  ;;  %v1594_v23 = vld [vmem:[%s1726_s11 + $0x90] ss:$8 sps:$4 sm:$0xff]   ;;  %v1597_v25 = vld [vmem:[%s1726_s11 + $0xa4] ss:$8 sps:$4 sm:$0xff]   ;;  %v1600_v27 = vld [vmem:[%s1726_s11 + $0xa0] ss:$8 sps:$4 sm:$0xff]  }
  0x15   : > { %1423 = vmatprep.subr.bf16.mxu0 %v1575_v8  ;;  %1531 = vmatprep.subr.bf16.mxu1 %v1575_v8  ;;  %v1601_v28 = vld [vmem:[%s1726_s11 + $0x34] ss:$8 sps:$4 sm:$0xff]   ;;  %v1605_v30 = vld [vmem:[%s1726_s11 + $0x30] ss:$8 sps:$4 sm:$0xff]   ;;  %v1607_v32 = vld [vmem:[%s1726_s11 + $0x44] ss:$8 sps:$4 sm:$0xff]  }
  0x16   : > { %v1603_v29 = vld [vmem:[%s1726_s11 + $0xb4] ss:$8 sps:$4 sm:$0xff]   ;;  %v1606_v31 = vld [vmem:[%s1726_s11 + $0xb0] ss:$8 sps:$4 sm:$0xff]   ;;  %v1609_v33 = vld [vmem:[%s1726_s11 + $0xc4] ss:$8 sps:$4 sm:$0xff]  }
  0x17   : > { %v1611_v34 = vld [vmem:[%s1726_s11 + $0x40] ss:$8 sps:$4 sm:$0xff]   ;;  %v1613_v36 = vld [vmem:[%s1726_s11 + $0x54] ss:$8 sps:$4 sm:$0xff]   ;;  %v1617_v38 = vld [vmem:[%s1726_s11 + $0x50] ss:$8 sps:$4 sm:$0xff]  }
  0x18   : > { %1424 = vmatpush3.bf16.msra.mxu0 %v1576_v9  ;;  %1539 = vmatpush3.bf16.msra.mxu1 %v1576_v9  ;;  %v1612_v35 = vld [vmem:[%s1726_s11 + $0xc0] ss:$8 sps:$4 sm:$0xff]   ;;  %v1615_v37 = vld [vmem:[%s1726_s11 + $0xd4] ss:$8 sps:$4 sm:$0xff]   ;;  %v1618_v39 = vld [vmem:[%s1726_s11 + $0xd0] ss:$8 sps:$4 sm:$0xff]  }
  0x19   : > { %1425 = vmatprep.subr.bf16.mxu0 %v1577_v10  ;;  %1532 = vmatprep.subr.bf16.mxu1 %v1577_v10  ;;  %v1619_v40 = vld [vmem:[%s1726_s11 + $0x64] ss:$8 sps:$4 sm:$0xff]   ;;  %v1623_v42 = vld [vmem:[%s1726_s11 + $0x60] ss:$8 sps:$4 sm:$0xff]   ;;  %v1625_v44 = vld [vmem:[%s1726_s11 + $0x74] ss:$8 sps:$4 sm:$0xff]  }
  0x1a   : > { %v1621_v41 = vld [vmem:[%s1726_s11 + $0xe4] ss:$8 sps:$4 sm:$0xff]   ;;  %v1624_v43 = vld [vmem:[%s1726_s11 + $0xe0] ss:$8 sps:$4 sm:$0xff]   ;;  %v1627_v45 = vld [vmem:[%s1726_s11 + $0xf4] ss:$8 sps:$4 sm:$0xff]  }
  0x1b   : > { %v1629_v46 = vld [vmem:[%s1726_s11 + $0x70] ss:$8 sps:$4 sm:$0xff]  }
  0x1c   : > { %1426 = vmatpush3.bf16.msra.mxu0 %v1578_v13  ;;  %1540 = vmatpush3.bf16.msra.mxu1 %v1578_v13  ;;  %v1630_v47 = vld [vmem:[%s1726_s11 + $0xf0] ss:$8 sps:$4 sm:$0xff]  }
  0x1d   : > { %1427 = vmatprep.subr.bf16.mxu0 %v1579_v14  ;;  %1533 = vmatprep.subr.bf16.mxu1 %v1579_v14 }
  0x20   : > { %1428 = vmatpush3.bf16.msra.mxu0 %v1580_v15  ;;  %1541 = vmatpush3.bf16.msra.mxu1 %v1580_v15 }
  0x21   : > { %1429 = vmatprep.subr.bf16.mxu0 %v1581_v16  ;;  %1534 = vmatprep.subr.bf16.mxu1 %v1581_v16 }
  0x24   : > { %1430 = vmatpush3.bf16.msra.mxu0 %v1582_v17  ;;  %1542 = vmatpush3.bf16.msra.mxu1 %v1582_v17 }
  0x27   : > { %649 = vmatmul.mubr.bf16.vlgmr.msra.gmra.mrb[0].mxu0 %v1583_v18  ;;  %713 = vmatmul.mubr.bf16.vlgmr.msra.gmra.mrb[0].mxu1 %v1586_v19 }
  0x28   : > { %656 = vmatprep.mubr.bf16.mxu0 %v1589_v20  ;;  %720 = vmatprep.mubr.bf16.mxu1 %v1591_v21 }
  0x2f   : > { %657 = vmatmul.mubr.bf16.gmra.mrb[4].mxu0 %v1593_v22  ;;  %721 = vmatmul.mubr.bf16.gmra.mrb[4].mxu1 %v1594_v23 }
  0x30   : > { %664 = vmatprep.mubr.bf16.mxu0 %v1595_v24  ;;  %728 = vmatprep.mubr.bf16.mxu1 %v1597_v25 }
  0x37   : > { %665 = vmatmul.mubr.bf16.gmra.mrb[8].mxu0 %v1599_v26  ;;  %729 = vmatmul.mubr.bf16.gmra.mrb[8].mxu1 %v1600_v27 }
  0x38   : > { %672 = vmatprep.mubr.bf16.mxu0 %v1601_v28  ;;  %736 = vmatprep.mubr.bf16.mxu1 %v1603_v29 }
  0x3f   : > { %673 = vmatmul.mubr.bf16.gmra.mrb[12].mxu0 %v1605_v30  ;;  %737 = vmatmul.mubr.bf16.gmra.mrb[12].mxu1 %v1606_v31 }
  0x40   : > { %680 = vmatprep.mubr.bf16.mxu0 %v1607_v32  ;;  %744 = vmatprep.mubr.bf16.mxu1 %v1609_v33 }
  0x47   : > { %681 = vmatmul.mubr.bf16.gmra.mrb[16].mxu0 %v1611_v34  ;;  %745 = vmatmul.mubr.bf16.gmra.mrb[16].mxu1 %v1612_v35 }
  0x48   : > { %688 = vmatprep.mubr.bf16.mxu0 %v1613_v36  ;;  %752 = vmatprep.mubr.bf16.mxu1 %v1615_v37 }
  0x4f   : > { %689 = vmatmul.mubr.bf16.gmra.mrb[20].mxu0 %v1617_v38  ;;  %753 = vmatmul.mubr.bf16.gmra.mrb[20].mxu1 %v1618_v39 }
  0x50   : > { %696 = vmatprep.mubr.bf16.mxu0 %v1619_v40  ;;  %760 = vmatprep.mubr.bf16.mxu1 %v1621_v41 }
  0x57   : > { %697 = vmatmul.mubr.bf16.gmra.mrb[24].mxu0 %v1623_v42  ;;  %761 = vmatmul.mubr.bf16.gmra.mrb[24].mxu1 %v1624_v43 }
  0x58   : > { %704 = vmatprep.mubr.bf16.mxu0 %v1625_v44  ;;  %768 = vmatprep.mubr.bf16.mxu1 %v1627_v45 }
  0x5f   : > { %705 = vmatmul.mubr.bf16.gmra.mrb[28].mxu0 %v1629_v46  ;;  %769 = vmatmul.mubr.bf16.gmra.mrb[28].mxu1 %v1630_v47 }
  0xfa   : > { %v1431_v48 = vpop.f32.mrb[0].mxu0  ;;  %v1479_v49 = vpop.f32.mrb[0].mxu1 }
  0xfb   : > { %v1432_v50 = vpop.f32.mrb[1].mxu0  ;;  %v1480_v52 = vpop.f32.mrb[1].mxu1 }
  0xfc   : > { %v1433_v53 = vadd.f32 %v1432_v50, %v1431_v48  ;;  %v1481_v54 = vadd.f32 %v1480_v52, %v1479_v49  ;;  %v1434_v55 = vpop.f32.mrb[2].mxu0  ;;  %v1482_v56 = vpop.f32.mrb[2].mxu1 }
  0xfd   : > { %v1435_v57 = vpop.f32.mrb[3].mxu0  ;;  %v1483_v58 = vpop.f32.mrb[3].mxu1 }
  0xfe   : > { %v883_v59 = vadd.f32 %v1433_v53, %v1784_v51  ;;  %v899_v60 = vadd.f32 %v1481_v54, %v1784_v51  ;;  %v1436_v61 = vadd.f32 %v1435_v57, %v1434_v55  ;;  %v1484_v62 = vadd.f32 %v1483_v58, %v1482_v56 }
 0x100   : > { %v884_v63 = vadd.f32 %v1436_v61, %v1784_v51  ;;  %v900_v0 = vadd.f32 %v1484_v62, %v1784_v51  ;;  %v915_v1 = vmax.f32 %v883_v59, 0.0  ;;  %v931_v2 = vmax.f32 %v899_v60, 0.0 }
 0x102   : > { %v916_v3 = vmax.f32 %v884_v63, 0.0  ;;  %v932_v4 = vmax.f32 %v900_v0, 0.0  ;;  %v1437_v5 = vpop.f32.mrb[4].mxu0  ;;  %v1485_v6 = vpop.f32.mrb[4].mxu1 }
 0x103   : > { %v1438_v7 = vpop.f32.mrb[5].mxu0  ;;  %v1486_v8 = vpop.f32.mrb[5].mxu1 }
 0x104   : > { %v1323_v9 = vpack.c.bf16 %v916_v3, %v915_v1  ;;  %v1363_v10 = vpack.c.bf16 %v932_v4, %v931_v2  ;;  %v1439_v11 = vadd.f32 %v1438_v7, %v1437_v5  ;;  %v1487_v12 = vadd.f32 %v1486_v8, %v1485_v6  ;;  %v1440_v13 = vpop.f32.mrb[6].mxu0  ;;  %v1488_v14 = vpop.f32.mrb[6].mxu1 }
 0x105   : > { %v1441_v15 = vpop.f32.mrb[7].mxu0  ;;  %v1489_v16 = vpop.f32.mrb[7].mxu1 }
 0x106   : > { %1324 = vst [vmem:[%s1794_s8] sm:$0xff] %v1323_v9   ;;  %1407 = vst [vmem:[%s1794_s8 + $0x40] sm:$0xff] %v1363_v10   ;;  %v885_v17 = vadd.f32 %v1439_v11, %v1784_v51  ;;  %v901_v18 = vadd.f32 %v1487_v12, %v1784_v51  ;;  %v1442_v19 = vadd.f32 %v1441_v15, %v1440_v13 }
 0x107   : > { %v1490_v20 = vadd.f32 %v1489_v16, %v1488_v14 }
 0x108   : > { %v886_v21 = vadd.f32 %v1442_v19, %v1784_v51  ;;  %v917_v23 = vmax.f32 %v885_v17, 0.0  ;;  %v933_v24 = vmax.f32 %v901_v18, 0.0 }
 0x109   : > { %v902_v22 = vadd.f32 %v1490_v20, %v1784_v51 }
 0x10a   : > { %v918_v25 = vmax.f32 %v886_v21, 0.0  ;;  %v1443_v27 = vpop.f32.mrb[8].mxu0  ;;  %v1491_v28 = vpop.f32.mrb[8].mxu1 }
 0x10b   : > { %v934_v26 = vmax.f32 %v902_v22, 0.0  ;;  %v1444_v29 = vpop.f32.mrb[9].mxu0  ;;  %v1492_v30 = vpop.f32.mrb[9].mxu1 }
 0x10c   : > { %v1328_v31 = vpack.c.bf16 %v918_v25, %v917_v23  ;;  %v1445_v33 = vadd.f32 %v1444_v29, %v1443_v27  ;;  %v1493_v34 = vadd.f32 %v1492_v30, %v1491_v28  ;;  %v1446_v35 = vpop.f32.mrb[10].mxu0  ;;  %v1494_v36 = vpop.f32.mrb[10].mxu1 }
 0x10d   : > { %v1368_v32 = vpack.c.bf16 %v934_v26, %v933_v24  ;;  %v1447_v37 = vpop.f32.mrb[11].mxu0  ;;  %v1495_v38 = vpop.f32.mrb[11].mxu1 }
 0x10e   : > { %1400 = vst [vmem:[%s1794_s8 + $0x8] sm:$0xff] %v1328_v31   ;;  %v887_v39 = vadd.f32 %v1445_v33, %v1784_v51  ;;  %v903_v40 = vadd.f32 %v1493_v34, %v1784_v51  ;;  %v1448_v41 = vadd.f32 %v1447_v37, %v1446_v35  ;;  %v1496_v42 = vadd.f32 %v1495_v38, %v1494_v36 }
 0x10f   : > { %1408 = vst [vmem:[%s1794_s8 + $0x48] sm:$0xff] %v1368_v32  }
 0x110   : > { %v888_v43 = vadd.f32 %v1448_v41, %v1784_v51  ;;  %v904_v44 = vadd.f32 %v1496_v42, %v1784_v51  ;;  %v919_v45 = vmax.f32 %v887_v39, 0.0  ;;  %v935_v46 = vmax.f32 %v903_v40, 0.0 }
 0x112   : > { %v920_v47 = vmax.f32 %v888_v43, 0.0  ;;  %v936_v48 = vmax.f32 %v904_v44, 0.0  ;;  %v1449_v49 = vpop.f32.mrb[12].mxu0  ;;  %v1497_v50 = vpop.f32.mrb[12].mxu1 }
 0x113   : > { %v1450_v52 = vpop.f32.mrb[13].mxu0  ;;  %v1498_v53 = vpop.f32.mrb[13].mxu1 }
 0x114   : > { %v1333_v54 = vpack.c.bf16 %v920_v47, %v919_v45  ;;  %v1373_v55 = vpack.c.bf16 %v936_v48, %v935_v46  ;;  %v1451_v56 = vadd.f32 %v1450_v52, %v1449_v49  ;;  %v1499_v57 = vadd.f32 %v1498_v53, %v1497_v50  ;;  %v1452_v58 = vpop.f32.mrb[14].mxu0  ;;  %v1500_v59 = vpop.f32.mrb[14].mxu1 }
 0x115   : > { %v1453_v60 = vpop.f32.mrb[15].mxu0  ;;  %v1501_v61 = vpop.f32.mrb[15].mxu1 }
 0x116   : > { %1401 = vst [vmem:[%s1794_s8 + $0x10] sm:$0xff] %v1333_v54   ;;  %1409 = vst [vmem:[%s1794_s8 + $0x50] sm:$0xff] %v1373_v55   ;;  %v889_v62 = vadd.f32 %v1451_v56, %v1784_v51  ;;  %v905_v63 = vadd.f32 %v1499_v57, %v1784_v51  ;;  %v1454_v0 = vadd.f32 %v1453_v60, %v1452_v58 }
 0x117   : > { %v1502_v1 = vadd.f32 %v1501_v61, %v1500_v59 }
 0x118   : > { %v890_v2 = vadd.f32 %v1454_v0, %v1784_v51  ;;  %v921_v4 = vmax.f32 %v889_v62, 0.0  ;;  %v937_v5 = vmax.f32 %v905_v63, 0.0 }
 0x119   : > { %v906_v3 = vadd.f32 %v1502_v1, %v1784_v51 }
 0x11a   : > { %v922_v6 = vmax.f32 %v890_v2, 0.0  ;;  %v1455_v8 = vpop.f32.mrb[16].mxu0  ;;  %v1503_v9 = vpop.f32.mrb[16].mxu1 }
 0x11b   : > { %v938_v7 = vmax.f32 %v906_v3, 0.0  ;;  %v1456_v10 = vpop.f32.mrb[17].mxu0  ;;  %v1504_v11 = vpop.f32.mrb[17].mxu1 }
 0x11c   : > { %v1338_v12 = vpack.c.bf16 %v922_v6, %v921_v4  ;;  %v1457_v14 = vadd.f32 %v1456_v10, %v1455_v8  ;;  %v1505_v15 = vadd.f32 %v1504_v11, %v1503_v9  ;;  %v1458_v16 = vpop.f32.mrb[18].mxu0  ;;  %v1506_v17 = vpop.f32.mrb[18].mxu1 }
 0x11d   : > { %v1378_v13 = vpack.c.bf16 %v938_v7, %v937_v5  ;;  %v1459_v18 = vpop.f32.mrb[19].mxu0  ;;  %v1507_v19 = vpop.f32.mrb[19].mxu1 }
 0x11e   : > { %1402 = vst [vmem:[%s1794_s8 + $0x18] sm:$0xff] %v1338_v12   ;;  %v891_v20 = vadd.f32 %v1457_v14, %v1784_v51  ;;  %v907_v21 = vadd.f32 %v1505_v15, %v1784_v51  ;;  %v1460_v22 = vadd.f32 %v1459_v18, %v1458_v16  ;;  %v1508_v23 = vadd.f32 %v1507_v19, %v1506_v17 }
 0x11f   : > { %1410 = vst [vmem:[%s1794_s8 + $0x58] sm:$0xff] %v1378_v13  }
 0x120   : > { %v892_v24 = vadd.f32 %v1460_v22, %v1784_v51  ;;  %v908_v25 = vadd.f32 %v1508_v23, %v1784_v51  ;;  %v923_v26 = vmax.f32 %v891_v20, 0.0  ;;  %v939_v27 = vmax.f32 %v907_v21, 0.0 }
 0x122   : > { %v924_v28 = vmax.f32 %v892_v24, 0.0  ;;  %v940_v29 = vmax.f32 %v908_v25, 0.0  ;;  %v1461_v30 = vpop.f32.mrb[20].mxu0  ;;  %v1509_v31 = vpop.f32.mrb[20].mxu1 }
 0x123   : > { %v1462_v32 = vpop.f32.mrb[21].mxu0  ;;  %v1510_v33 = vpop.f32.mrb[21].mxu1 }
 0x124   : > { %v1343_v34 = vpack.c.bf16 %v924_v28, %v923_v26  ;;  %v1383_v35 = vpack.c.bf16 %v940_v29, %v939_v27  ;;  %v1463_v36 = vadd.f32 %v1462_v32, %v1461_v30  ;;  %v1511_v37 = vadd.f32 %v1510_v33, %v1509_v31  ;;  %v1464_v38 = vpop.f32.mrb[22].mxu0  ;;  %v1512_v39 = vpop.f32.mrb[22].mxu1 }
 0x125   : > { %v1465_v40 = vpop.f32.mrb[23].mxu0  ;;  %v1513_v41 = vpop.f32.mrb[23].mxu1 }
 0x126   : > { %1403 = vst [vmem:[%s1794_s8 + $0x20] sm:$0xff] %v1343_v34   ;;  %1411 = vst [vmem:[%s1794_s8 + $0x60] sm:$0xff] %v1383_v35   ;;  %v893_v42 = vadd.f32 %v1463_v36, %v1784_v51  ;;  %v909_v43 = vadd.f32 %v1511_v37, %v1784_v51  ;;  %v1466_v44 = vadd.f32 %v1465_v40, %v1464_v38 }
 0x127   : > { %v1514_v45 = vadd.f32 %v1513_v41, %v1512_v39 }
 0x128   : > { %v894_v46 = vadd.f32 %v1466_v44, %v1784_v51  ;;  %v925_v48 = vmax.f32 %v893_v42, 0.0  ;;  %v941_v49 = vmax.f32 %v909_v43, 0.0 }
 0x129   : > { %v910_v47 = vadd.f32 %v1514_v45, %v1784_v51 }
 0x12a   : > { %v926_v50 = vmax.f32 %v894_v46, 0.0  ;;  %v1467_v53 = vpop.f32.mrb[24].mxu0  ;;  %v1515_v54 = vpop.f32.mrb[24].mxu1 }
 0x12b   : > { %v942_v52 = vmax.f32 %v910_v47, 0.0  ;;  %v1468_v55 = vpop.f32.mrb[25].mxu0  ;;  %v1516_v56 = vpop.f32.mrb[25].mxu1 }
 0x12c   : > { %v1348_v57 = vpack.c.bf16 %v926_v50, %v925_v48  ;;  %v1469_v59 = vadd.f32 %v1468_v55, %v1467_v53  ;;  %v1517_v60 = vadd.f32 %v1516_v56, %v1515_v54  ;;  %v1470_v61 = vpop.f32.mrb[26].mxu0  ;;  %v1518_v62 = vpop.f32.mrb[26].mxu1 }
 0x12d   : > { %v1388_v58 = vpack.c.bf16 %v942_v52, %v941_v49  ;;  %v1471_v63 = vpop.f32.mrb[27].mxu0  ;;  %v1519_v0 = vpop.f32.mrb[27].mxu1 }
 0x12e   : > { %1404 = vst [vmem:[%s1794_s8 + $0x28] sm:$0xff] %v1348_v57   ;;  %v895_v1 = vadd.f32 %v1469_v59, %v1784_v51  ;;  %v911_v2 = vadd.f32 %v1517_v60, %v1784_v51  ;;  %v1472_v3 = vadd.f32 %v1471_v63, %v1470_v61  ;;  %v1520_v4 = vadd.f32 %v1519_v0, %v1518_v62 }
 0x12f   : > { %1412 = vst [vmem:[%s1794_s8 + $0x68] sm:$0xff] %v1388_v58  }
 0x130   : > { %v896_v5 = vadd.f32 %v1472_v3, %v1784_v51  ;;  %v912_v6 = vadd.f32 %v1520_v4, %v1784_v51  ;;  %v927_v7 = vmax.f32 %v895_v1, 0.0  ;;  %v943_v8 = vmax.f32 %v911_v2, 0.0 }
 0x132   : > { %v928_v9 = vmax.f32 %v896_v5, 0.0  ;;  %v944_v10 = vmax.f32 %v912_v6, 0.0  ;;  %v1473_v11 = vpop.f32.mrb[28].mxu0  ;;  %v1521_v12 = vpop.f32.mrb[28].mxu1 }
 0x133   : > { %v1474_v13 = vpop.f32.mrb[29].mxu0  ;;  %v1522_v14 = vpop.f32.mrb[29].mxu1 }
 0x134   : > { %v1353_v15 = vpack.c.bf16 %v928_v9, %v927_v7  ;;  %v1393_v16 = vpack.c.bf16 %v944_v10, %v943_v8  ;;  %v1475_v17 = vadd.f32 %v1474_v13, %v1473_v11  ;;  %v1523_v18 = vadd.f32 %v1522_v14, %v1521_v12  ;;  %v1476_v19 = vpop.f32.mrb[30].mxu0  ;;  %v1524_v20 = vpop.f32.mrb[30].mxu1 }
 0x135   : > { %v1477_v21 = vpop.f32.mrb[31].mxu0  ;;  %v1525_v22 = vpop.f32.mrb[31].mxu1 }
 0x136   : > { %1405 = vst [vmem:[%s1794_s8 + $0x30] sm:$0xff] %v1353_v15   ;;  %1413 = vst [vmem:[%s1794_s8 + $0x70] sm:$0xff] %v1393_v16   ;;  %v897_v23 = vadd.f32 %v1475_v17, %v1784_v51  ;;  %v913_v24 = vadd.f32 %v1523_v18, %v1784_v51  ;;  %v1478_v25 = vadd.f32 %v1477_v21, %v1476_v19 }
 0x137   : > { %v1526_v26 = vadd.f32 %v1525_v22, %v1524_v20 }
 0x138   : > { %v898_v27 = vadd.f32 %v1478_v25, %v1784_v51  ;;  %v929_v29 = vmax.f32 %v897_v23, 0.0  ;;  %v945_v30 = vmax.f32 %v913_v24, 0.0 }
 0x139   : > { %v914_v28 = vadd.f32 %v1526_v26, %v1784_v51 }
 0x13a   : > { %v930_v31 = vmax.f32 %v898_v27, 0.0 }
 0x13b   : > { %v946_v32 = vmax.f32 %v914_v28, 0.0 }
 0x13c   : > { %v1358_v33 = vpack.c.bf16 %v930_v31, %v929_v29 }
 0x13d   : > { %v1398_v34 = vpack.c.bf16 %v946_v32, %v945_v30 }
 0x13e   : > { %1406 = vst [vmem:[%s1794_s8 + $0x38] sm:$0xff] %v1358_v33  }
 0x13f   : > { %1414 = vst [vmem:[%s1794_s8 + $0x78] sm:$0xff] %v1398_v34  }
 0x140 PF: > { %s13_s14 = sadd.s32 1, %s1653_s14   ;;  %s1853_s12 = smov %s1649_s13 }
 0x141   : > { %p10_p5 = scmp.ge.s32.totalorder %s13_s14, 4   ;;  %s1854_s13 = smov %s1856_s15 }
 0x143   :  { %12 = sbr.rel (!%p10_p5) target bundleno = 2 (0x2), region = 73 }

// kernel: vae_forward.15
= control target key start
LH: loop header
LB: loop body
LE: loop exit
PB: predicated region body
PF: predicated region fallthrough
CT: control target
= control target key end

     0   :  { %s2180_s12 = smov 0   ;;  %s2182_s13 = smov 0   ;;  %s2443_s0 = inlined_call_operand.vmem [shape: bf16[1792,384], index: 0, kind: input, shape index: {}]   ;;  %s2444_s1 = inlined_call_operand.vmem [shape: bf16[384,128], index: 1, kind: input, shape index: {}]   ;;  %s2445_s2 = inlined_call_operand.vmem [shape: f32[1,128], index: 2, kind: input, shape index: {}]   ;;  %s2446_s3 = inlined_call_operand.vmem [shape: f32[1792,128], index: 3, kind: output, shape index: {}]  }
   0x1   :  { %s2184_s14 = smov 0  }
   0x2 LB: > { %s25_s15 = sadd.s32 1, %s2154_s13  ;;  %p1583_p0 = scmp.ge.s32.totalorder %s2158_s14, 1  ;;  %s2158_s14 = sphi %s2184_s14, %s13_s14   ;;  %s2154_s13 = sphi %s2182_s13, %s2448_s13   ;;  %s2150_s12 = sphi %s2180_s12, %s2447_s12  }
   0x3   : > { %p27_p1 = scmp.ge.s32.totalorder %s25_s15, 7  ;;  %p169_p2 = scmp.lt.s32.totalorder %s2158_s14, 8 }
   0x5   : > { %s2450_s15 = smov (%p27_p1, %s25_s15), 0  ;;  %p170_p3 = pnand %p1583_p0, %p169_p2 }
   0x6   : > { %v1920_v0 = vld [vmem:[%s2444_s1 + $0x40] sm:$0xff] (!%p170_p3)   ;;  %s1584_s18 = sshll.u32 (!%p170_p3), %s2150_s12, 5  ;;  %v1922_v2 = vld [vmem:[%s2444_s1 + $0x48] sm:$0xff] (!%p170_p3)   ;;  %v1924_v4 = vld [vmem:[%s2444_s1 + $0x50] sm:$0xff] (!%p170_p3)  }
   0x7   : > { %173 = sbr.rel (%p170_p3) target bundleno = 386 (0x182), region = 32  ;;  %v1921_v1 = vld [vmem:[%s2444_s1] sm:$0xff] (!%p170_p3)   ;;  %1695 = vmatprep.subr.bf16.mxu0 (!%p170_p3), %v1920_v0  ;;  %1879 = vmatprep.subr.bf16.mxu1 (!%p170_p3), %v1920_v0  ;;  %p205_p4 = scmp.lt.s32.totalorder (!%p170_p3), %s1584_s18, 223  ;;  %v1923_v3 = vld [vmem:[%s2444_s1 + $0x8] sm:$0xff] (!%p170_p3)   ;;  %v1925_v5 = vld [vmem:[%s2444_s1 + $0x10] sm:$0xff] (!%p170_p3)  }
   0x8   : > { %1696 = vmatpush3.bf16.msra.mxu0 (!%p170_p3), %v1921_v1  ;;  %1887 = vmatpush3.bf16.msra.mxu1 (!%p170_p3), %v1921_v1  ;;  %v1926_v6 = vld [vmem:[%s2444_s1 + $0x58] sm:$0xff] (!%p170_p3)   ;;  %v1928_v8 = vld [vmem:[%s2444_s1 + $0x60] sm:$0xff] (!%p170_p3)   ;;  %v1930_v10 = vld [vmem:[%s2444_s1 + $0x68] sm:$0xff] (!%p170_p3)  }
   0x9   : > { %1697 = vmatprep.subr.bf16.mxu0 (!%p170_p3), %v1922_v2  ;;  %1880 = vmatprep.subr.bf16.mxu1 (!%p170_p3), %v1922_v2  ;;  %v1927_v7 = vld [vmem:[%s2444_s1 + $0x18] sm:$0xff] (!%p170_p3)   ;;  %v1929_v9 = vld [vmem:[%s2444_s1 + $0x20] sm:$0xff] (!%p170_p3)   ;;  %v1931_v13 = vld [vmem:[%s2444_s1 + $0x28] sm:$0xff] (!%p170_p3)  }
   0xa   : > { %v1932_v14 = vld [vmem:[%s2444_s1 + $0x70] sm:$0xff] (!%p170_p3)   ;;  %v1934_v16 = vld [vmem:[%s2444_s1 + $0x78] sm:$0xff] (!%p170_p3)   ;;  %v1942_v18 = vld [vmem:[%s2444_s1 + $0x80] sm:$0xff] (!%p170_p3)  }
   0xb   : > { %v1933_v15 = vld [vmem:[%s2444_s1 + $0x30] sm:$0xff] (!%p170_p3)   ;;  %v1935_v17 = vld [vmem:[%s2444_s1 + $0x38] sm:$0xff] (!%p170_p3)   ;;  %v1943_v22 = vld [vmem:[%s2444_s1 + $0x88] sm:$0xff] (!%p170_p3)  }
   0xc   : > { %1698 = vmatpush3.bf16.msra.mxu0 (!%p170_p3), %v1923_v3  ;;  %1888 = vmatpush3.bf16.msra.mxu1 (!%p170_p3), %v1923_v3  ;;  %v1950_v25 = vld [vmem:[%s2444_s1 + $0x90] sm:$0xff] (!%p170_p3)   ;;  %v1951_v27 = vld [vmem:[%s2444_s1 + $0x98] sm:$0xff] (!%p170_p3)   ;;  %v1958_v30 = vld [vmem:[%s2444_s1 + $0xa0] sm:$0xff] (!%p170_p3)  }
   0xd   : > { %1699 = vmatprep.subr.bf16.mxu0 (!%p170_p3), %v1924_v4  ;;  %1881 = vmatprep.subr.bf16.mxu1 (!%p170_p3), %v1924_v4  ;;  %v1959_v33 = vld [vmem:[%s2444_s1 + $0xa8] sm:$0xff] (!%p170_p3)   ;;  %v1966_v36 = vld [vmem:[%s2444_s1 + $0xb0] sm:$0xff] (!%p170_p3)   ;;  %v1967_v40 = vld [vmem:[%s2444_s1 + $0xb8] sm:$0xff] (!%p170_p3)  }
   0xe   : > { %s2452_s18 = smov (!%p205_p4, %s1584_s18), 223 }
   0xf   : > { %s1895_s4 = smul.u32 12, %s2452_s18  ;;  %s1587_s25 = sshll.u32 %s2452_s18, 3 }
  0x10   : > { %1700 = vmatpush3.bf16.msra.mxu0 %v1925_v5  ;;  %1889 = vmatpush3.bf16.msra.mxu1 %v1925_v5  ;;  %s2366_s18 = scalar_lea.vmem %s2446_s3, %s1587_s25 }
  0x11   : > { %1701 = vmatprep.subr.bf16.mxu0 %v1926_v6  ;;  %1882 = vmatprep.subr.bf16.mxu1 %v1926_v6  ;;  %s2231_s11 = scalar_lea.vmem %s2443_s0, %s1895_s4 }
  0x12   : > { %v1938_v11 = vld [vmem:[%s2231_s11 + $0x4] ss:$12 sps:$4 sm:$0xff]   ;;  %v1936_v19 = vld [vmem:[%s2231_s11] ss:$12 sps:$4 sm:$0xff]   ;;  %v1944_v21 = vld [vmem:[%s2231_s11 + $0x1c] ss:$12 sps:$4 sm:$0xff]  }
  0x13   : > { %v1941_v12 = vld [vmem:[%s2231_s11 + $0x124] ss:$12 sps:$4 sm:$0xff]   ;;  %840 = vmatprep.mubr.bf16.mxu0 %v1938_v11  ;;  %v1939_v20 = vld [vmem:[%s2231_s11 + $0x120] ss:$12 sps:$4 sm:$0xff]   ;;  %v1946_v23 = vld [vmem:[%s2231_s11 + $0x13c] ss:$12 sps:$4 sm:$0xff]  }
  0x14   : > { %1702 = vmatpush3.bf16.msra.mxu0 %v1927_v7  ;;  %1890 = vmatpush3.bf16.msra.mxu1 %v1927_v7  ;;  %v1948_v24 = vld [vmem:[%s2231_s11 + $0x18] ss:$12 sps:$4 sm:$0xff]   ;;  %v1952_v28 = vld [vmem:[%s2231_s11 + $0x34] ss:$12 sps:$4 sm:$0xff]   ;;  %v1956_v31 = vld [vmem:[%s2231_s11 + $0x30] ss:$12 sps:$4 sm:$0xff]  }
  0x15   : > { %1703 = vmatprep.subr.bf16.mxu0 %v1928_v8  ;;  %1883 = vmatprep.subr.bf16.mxu1 %v1928_v8  ;;  %v1949_v26 = vld [vmem:[%s2231_s11 + $0x138] ss:$12 sps:$4 sm:$0xff]   ;;  %v1954_v29 = vld [vmem:[%s2231_s11 + $0x154] ss:$12 sps:$4 sm:$0xff]   ;;  %v1957_v32 = vld [vmem:[%s2231_s11 + $0x150] ss:$12 sps:$4 sm:$0xff]  }
  0x16   : > { %936 = vmatprep.mubr.bf16.mxu1 %v1941_v12  ;;  %v1960_v34 = vld [vmem:[%s2231_s11 + $0x4c] ss:$12 sps:$4 sm:$0xff]   ;;  %v1964_v37 = vld [vmem:[%s2231_s11 + $0x48] ss:$12 sps:$4 sm:$0xff]   ;;  %v1968_v39 = vld [vmem:[%s2231_s11 + $0x64] ss:$12 sps:$4 sm:$0xff]  }
  0x17   : > { %v1962_v35 = vld [vmem:[%s2231_s11 + $0x16c] ss:$12 sps:$4 sm:$0xff]   ;;  %v1965_v38 = vld [vmem:[%s2231_s11 + $0x168] ss:$12 sps:$4 sm:$0xff]   ;;  %v1977_v47 = vld [vmem:[%s2231_s11 + $0x50] ss:$12 sps:$4 sm:$0xff]  }
  0x18   : > { %1704 = vmatpush3.bf16.msra.mxu0 %v1929_v9  ;;  %1891 = vmatpush3.bf16.msra.mxu1 %v1929_v9  ;;  %v1970_v41 = vld [vmem:[%s2231_s11 + $0x8] ss:$12 sps:$4 sm:$0xff]   ;;  %v1971_v42 = vld [vmem:[%s2231_s11 + $0x60] ss:$12 sps:$4 sm:$0xff]   ;;  %v1975_v45 = vld [vmem:[%s2231_s11 + $0x38] ss:$12 sps:$4 sm:$0xff]  }
  0x19   : > { %1705 = vmatprep.subr.bf16.mxu0 %v1930_v10  ;;  %1884 = vmatprep.subr.bf16.mxu1 %v1930_v10  ;;  %v1972_v43 = vld [vmem:[%s2231_s11 + $0x20] ss:$12 sps:$4 sm:$0xff]   ;;  %v1973_v44 = vld [vmem:[%s2231_s11 + $0x7c] ss:$12 sps:$4 sm:$0xff]   ;;  %v1976_v46 = vld [vmem:[%s2231_s11 + $0x78] ss:$12 sps:$4 sm:$0xff]  }
  0x1a   : > { %v1978_v48 = vld [vmem:[%s2231_s11 + $0x94] ss:$12 sps:$4 sm:$0xff]   ;;  %v1981_v50 = vld [vmem:[%s2231_s11 + $0x90] ss:$12 sps:$4 sm:$0xff]   ;;  %v1983_v52 = vld [vmem:[%s2231_s11 + $0xac] ss:$12 sps:$4 sm:$0xff]  }
  0x1b   : > { %v1980_v49 = vld [vmem:[%s2231_s11 + $0x68] ss:$12 sps:$4 sm:$0xff]   ;;  %v1982_v51 = vld [vmem:[%s2231_s11 + $0x80] ss:$12 sps:$4 sm:$0xff]   ;;  %v1985_v53 = vld [vmem:[%s2231_s11 + $0x98] ss:$12 sps:$4 sm:$0xff]  }
  0x1c   : > { %1706 = vmatpush3.bf16.msra.mxu0 %v1931_v13  ;;  %1892 = vmatpush3.bf16.msra.mxu1 %v1931_v13  ;;  %v1986_v54 = vld [vmem:[%s2231_s11 + $0xa8] ss:$12 sps:$4 sm:$0xff]   ;;  %v1987_v55 = vld [vmem:[%s2231_s11 + $0xb0] ss:$12 sps:$4 sm:$0xff]   ;;  %v1991_v58 = vld [vmem:[%s2231_s11 + $0xc0] ss:$12 sps:$4 sm:$0xff]  }
  0x1d   : > { %1707 = vmatprep.subr.bf16.mxu0 %v1932_v14  ;;  %1885 = vmatprep.subr.bf16.mxu1 %v1932_v14  ;;  %v1988_v56 = vld [vmem:[%s2231_s11 + $0xc4] ss:$12 sps:$4 sm:$0xff]   ;;  %v1990_v57 = vld [vmem:[%s2231_s11 + $0xc8] ss:$12 sps:$4 sm:$0xff]   ;;  %v1992_v59 = vld [vmem:[%s2231_s11 + $0xe0] ss:$12 sps:$4 sm:$0xff]  }
  0x1e   : > { %v1993_v60 = vld [vmem:[%s2231_s11 + $0xdc] ss:$12 sps:$4 sm:$0xff]   ;;  %v1995_v61 = vld [vmem:[%s2231_s11 + $0xf8] ss:$12 sps:$4 sm:$0xff]   ;;  %v1998_v0 = vld [vmem:[%s2231_s11 + $0xf4] ss:$12 sps:$4 sm:$0xff]  }
  0x1f   : > { %v1996_v62 = vld [vmem:[%s2231_s11 + $0xd8] ss:$12 sps:$4 sm:$0xff]   ;;  %v1997_v63 = vld [vmem:[%s2231_s11 + $0x110] ss:$12 sps:$4 sm:$0xff]   ;;  %v2000_v1 = vld [vmem:[%s2231_s11 + $0x128] ss:$12 sps:$4 sm:$0xff]  }
  0x20   : > { %1708 = vmatpush3.bf16.msra.mxu0 %v1933_v15  ;;  %1893 = vmatpush3.bf16.msra.mxu1 %v1933_v15  ;;  %v2001_v2 = vld [vmem:[%s2231_s11 + $0xf0] ss:$12 sps:$4 sm:$0xff]   ;;  %v2002_v3 = vld [vmem:[%s2231_s11 + $0x140] ss:$12 sps:$4 sm:$0xff]   ;;  %v2005_v5 = vld [vmem:[%s2231_s11 + $0x158] ss:$12 sps:$4 sm:$0xff]  }
  0x21   : > { %1709 = vmatprep.subr.bf16.mxu0 %v1934_v16  ;;  %1886 = vmatprep.subr.bf16.mxu1 %v1934_v16  ;;  %v2003_v4 = vld [vmem:[%s2231_s11 + $0x10c] ss:$12 sps:$4 sm:$0xff]   ;;  %v2006_v6 = vld [vmem:[%s2231_s11 + $0x108] ss:$12 sps:$4 sm:$0xff]   ;;  %v2007_v7 = vld [vmem:[%s2231_s11 + $0x170] ss:$12 sps:$4 sm:$0xff]  }
  0x24   : > { %1710 = vmatpush3.bf16.msra.mxu0 %v1935_v17  ;;  %1894 = vmatpush3.bf16.msra.mxu1 %v1935_v17 }
  0x25   : > { %1831 = vmatprep.subr.bf16.mxu1 %v1942_v18 }
  0x27   : > { %841 = vmatmul.mubr.bf16.vlgmr.msra.gmra.mrb[0].mxu0 %v1936_v19  ;;  %937 = vmatmul.mubr.bf16.vlgmr.msra.gmra.mrb[0].mxu1 %v1939_v20 }
  0x28   : > { %1832 = vmatpush3.bf16.msra.mxu1 %v1942_v18  ;;  %848 = vmatprep.mubr.bf16.mxu0 %v1944_v21 }
  0x29   : > { %1833 = vmatprep.subr.bf16.mxu1 %v1943_v22  ;;  %944 = vmatprep.mubr.bf16.mxu1 %v1946_v23 }
  0x2c   : > { %1834 = vmatpush3.bf16.msra.mxu1 %v1943_v22 }
  0x2d   : > { %1835 = vmatprep.subr.bf16.mxu1 %v1950_v25 }
  0x2f   : > { %849 = vmatmul.mubr.bf16.gmra.mrb[4].mxu0 %v1948_v24  ;;  %945 = vmatmul.mubr.bf16.gmra.mrb[4].mxu1 %v1949_v26 }
  0x30   : > { %1836 = vmatpush3.bf16.msra.mxu1 %v1950_v25  ;;  %856 = vmatprep.mubr.bf16.mxu0 %v1952_v28 }
  0x31   : > { %1837 = vmatprep.subr.bf16.mxu1 %v1951_v27  ;;  %952 = vmatprep.mubr.bf16.mxu1 %v1954_v29 }
  0x34   : > { %1838 = vmatpush3.bf16.msra.mxu1 %v1951_v27 }
  0x35   : > { %1839 = vmatprep.subr.bf16.mxu1 %v1958_v30 }
  0x37   : > { %857 = vmatmul.mubr.bf16.gmra.mrb[8].mxu0 %v1956_v31  ;;  %953 = vmatmul.mubr.bf16.gmra.mrb[8].mxu1 %v1957_v32 }
  0x38   : > { %1840 = vmatpush3.bf16.msra.mxu1 %v1958_v30  ;;  %864 = vmatprep.mubr.bf16.mxu0 %v1960_v34 }
  0x39   : > { %1841 = vmatprep.subr.bf16.mxu1 %v1959_v33  ;;  %960 = vmatprep.mubr.bf16.mxu1 %v1962_v35 }
  0x3c   : > { %1842 = vmatpush3.bf16.msra.mxu1 %v1959_v33 }
  0x3d   : > { %1843 = vmatprep.subr.bf16.mxu1 %v1966_v36 }
  0x3f   : > { %865 = vmatmul.mubr.bf16.gmra.mrb[12].mxu0 %v1964_v37  ;;  %961 = vmatmul.mubr.bf16.gmra.mrb[12].mxu1 %v1965_v38 }
  0x40   : > { %1844 = vmatpush3.bf16.msra.mxu1 %v1966_v36  ;;  %872 = vmatprep.mubr.bf16.mxu0 %v1968_v39 }
  0x41   : > { %1845 = vmatprep.subr.bf16.mxu1 %v1967_v40  ;;  %1847 = vmatprep.mubr.bf16.mxu1 %v1970_v41 }
  0x44   : > { %1846 = vmatpush3.bf16.msra.mxu1 %v1967_v40 }
  0x47   : > { %873 = vmatmul.mubr.bf16.gmra.mrb[16].mxu0 %v1971_v42  ;;  %1848 = vmatmul.mubr.bf16.vlgmr.msra.gmra.mrb[16].mxu1 %v1972_v43 }
  0x48   : > { %880 = vmatprep.mubr.bf16.mxu0 %v1973_v44  ;;  %1851 = vmatprep.mubr.bf16.mxu1 %v1975_v45 }
  0x4f   : > { %881 = vmatmul.mubr.bf16.gmra.mrb[20].mxu0 %v1976_v46  ;;  %1852 = vmatmul.mubr.bf16.gmra.mrb[20].mxu1 %v1977_v47 }
  0x50   : > { %888 = vmatprep.mubr.bf16.mxu0 %v1978_v48  ;;  %1855 = vmatprep.mubr.bf16.mxu1 %v1980_v49 }
  0x57   : > { %889 = vmatmul.mubr.bf16.gmra.mrb[24].mxu0 %v1981_v50  ;;  %1856 = vmatmul.mubr.bf16.gmra.mrb[24].mxu1 %v1982_v51 }
  0x58   : > { %896 = vmatprep.mubr.bf16.mxu0 %v1983_v52  ;;  %1859 = vmatprep.mubr.bf16.mxu1 %v1985_v53 }
  0x5f   : > { %897 = vmatmul.mubr.bf16.gmra.mrb[28].mxu0 %v1986_v54  ;;  %1860 = vmatmul.mubr.bf16.gmra.mrb[28].mxu1 %v1987_v55 }
  0x60   : > { %904 = vmatprep.mubr.bf16.mxu0 %v1988_v56  ;;  %1863 = vmatprep.mubr.bf16.mxu1 %v1990_v57 }
  0x67   : > { %905 = vmatmul.mubr.bf16.gmra.mrb[32].mxu0 %v1991_v58  ;;  %1864 = vmatmul.mubr.bf16.gmra.mrb[32].mxu1 %v1992_v59  ;;  %v2345_v58 = vld [vmem:[%s2445_s2] ss:$0 sm:$0xff] }
  0x68   : > { %912 = vmatprep.mubr.bf16.mxu0 %v1993_v60  ;;  %1867 = vmatprep.mubr.bf16.mxu1 %v1995_v61 }
  0x6f   : > { %913 = vmatmul.mubr.bf16.gmra.mrb[36].mxu0 %v1996_v62  ;;  %1868 = vmatmul.mubr.bf16.gmra.mrb[36].mxu1 %v1997_v63 }
  0x70   : > { %920 = vmatprep.mubr.bf16.mxu0 %v1998_v0  ;;  %1871 = vmatprep.mubr.bf16.mxu1 %v2000_v1 }
  0x77   : > { %921 = vmatmul.mubr.bf16.gmra.mrb[40].mxu0 %v2001_v2  ;;  %1872 = vmatmul.mubr.bf16.gmra.mrb[40].mxu1 %v2002_v3 }
  0x78   : > { %928 = vmatprep.mubr.bf16.mxu0 %v2003_v4  ;;  %1875 = vmatprep.mubr.bf16.mxu1 %v2005_v5 }
  0x7f   : > { %929 = vmatmul.mubr.bf16.gmra.mrb[44].mxu0 %v2006_v6  ;;  %1876 = vmatmul.mubr.bf16.gmra.mrb[44].mxu1 %v2007_v7 }
  0xfa   : > { %v1711_v8 = vpop.f32.mrb[0].mxu0  ;;  %v1783_v9 = vpop.f32.mrb[0].mxu1 }
  0xfb   : > { %v1712_v10 = vpop.f32.mrb[1].mxu0  ;;  %v1784_v11 = vpop.f32.mrb[1].mxu1 }
  0xfc   : > { %v1713_v12 = vadd.f32 %v1712_v10, %v1711_v8  ;;  %v2326_v13 = vadd.f32 %v1784_v11, %v1783_v9  ;;  %v1714_v14 = vpop.f32.mrb[2].mxu0  ;;  %v1786_v15 = vpop.f32.mrb[2].mxu1 }
  0xfd   : > { %v1715_v16 = vpop.f32.mrb[3].mxu0  ;;  %v1787_v17 = vpop.f32.mrb[3].mxu1 }
  0xfe   : > { %v1716_v18 = vadd.f32 %v1715_v16, %v1714_v14  ;;  %v2328_v19 = vadd.f32 %v1787_v17, %v1786_v15 }
 0x102   : > { %v1717_v20 = vpop.f32.mrb[4].mxu0  ;;  %v1789_v21 = vpop.f32.mrb[4].mxu1 }
 0x103   : > { %v1718_v22 = vpop.f32.mrb[5].mxu0  ;;  %v1790_v23 = vpop.f32.mrb[5].mxu1 }
 0x104   : > { %v1719_v24 = vadd.f32 %v1718_v22, %v1717_v20  ;;  %v2330_v25 = vadd.f32 %v1790_v23, %v1789_v21  ;;  %v1720_v26 = vpop.f32.mrb[6].mxu0  ;;  %v1792_v27 = vpop.f32.mrb[6].mxu1 }
 0x105   : > { %v1721_v28 = vpop.f32.mrb[7].mxu0  ;;  %v1793_v29 = vpop.f32.mrb[7].mxu1 }
 0x106   : > { %v1722_v30 = vadd.f32 %v1721_v28, %v1720_v26  ;;  %v2332_v31 = vadd.f32 %v1793_v29, %v1792_v27 }
 0x10a   : > { %v1723_v32 = vpop.f32.mrb[8].mxu0  ;;  %v1795_v33 = vpop.f32.mrb[8].mxu1 }
 0x10b   : > { %v1724_v34 = vpop.f32.mrb[9].mxu0  ;;  %v1796_v35 = vpop.f32.mrb[9].mxu1 }
 0x10c   : > { %v1725_v36 = vadd.f32 %v1724_v34, %v1723_v32  ;;  %v2334_v37 = vadd.f32 %v1796_v35, %v1795_v33  ;;  %v1726_v38 = vpop.f32.mrb[10].mxu0  ;;  %v1798_v39 = vpop.f32.mrb[10].mxu1 }
 0x10d   : > { %v1727_v40 = vpop.f32.mrb[11].mxu0  ;;  %v1799_v41 = vpop.f32.mrb[11].mxu1 }
 0x10e   : > { %v1728_v42 = vadd.f32 %v1727_v40, %v1726_v38  ;;  %v2336_v43 = vadd.f32 %v1799_v41, %v1798_v39 }
 0x112   : > { %v1729_v44 = vpop.f32.mrb[12].mxu0  ;;  %v1801_v45 = vpop.f32.mrb[12].mxu1 }
 0x113   : > { %v1730_v46 = vpop.f32.mrb[13].mxu0  ;;  %v1802_v47 = vpop.f32.mrb[13].mxu1 }
 0x114   : > { %v1731_v48 = vadd.f32 %v1730_v46, %v1729_v44  ;;  %v2338_v49 = vadd.f32 %v1802_v47, %v1801_v45  ;;  %v1732_v50 = vpop.f32.mrb[14].mxu0  ;;  %v1804_v51 = vpop.f32.mrb[14].mxu1 }
 0x115   : > { %v1733_v52 = vpop.f32.mrb[15].mxu0  ;;  %v1805_v53 = vpop.f32.mrb[15].mxu1 }
 0x116   : > { %v1734_v54 = vadd.f32 %v1733_v52, %v1732_v50  ;;  %v2340_v55 = vadd.f32 %v1805_v53, %v1804_v51 }
 0x11a   : > { %v1735_v56 = vpop.f32.mrb[16].mxu0  ;;  %v1849_v57 = vpop.f32.mrb[16].mxu1 }
 0x11b   : > { %v1012_v59 = vadd.f32 %v1849_v57, %v1719_v24  ;;  %v1736_v60 = vpop.f32.mrb[17].mxu0  ;;  %v1003_v61 = vpop.f32.mrb[17].mxu1 }
 0x11c   : > { %v1737_v62 = vadd.f32 %v1736_v60, %v1735_v56  ;;  %v1004_v63 = vadd.f32 %v1713_v12, %v1003_v61  ;;  %v1738_v0 = vpop.f32.mrb[18].mxu0  ;;  %v1850_v1 = vpop.f32.mrb[18].mxu1 }
 0x11d   : > { %v1238_v2 = vadd.f32 %v2345_v58, %v1012_v59  ;;  %v1015_v3 = vadd.f32 %v1850_v1, %v1722_v30  ;;  %v1739_v4 = vpop.f32.mrb[19].mxu0  ;;  %v1006_v5 = vpop.f32.mrb[19].mxu1 }
 0x11e   : > { %v1236_v6 = vadd.f32 %v2345_v58, %v1004_v63  ;;  %v2349_v7 = vadd.f32 %v1739_v4, %v1738_v0  ;;  %v1007_v8 = vadd.f32 %v1716_v18, %v1006_v5 }
 0x11f   : > { %v1663_v9 = vmul.f32 -1.442695, %v1238_v2  ;;  %v1239_v10 = vadd.f32 %v2345_v58, %v1015_v3 }
 0x120   : > { %v1661_v11 = vmul.f32 -1.442695, %v1236_v6  ;;  %v1237_v14 = vadd.f32 %v2345_v58, %v1007_v8 }
 0x121   : > { %2008 = vpow2.f32 %v1663_v9  ;;  %v1664_v12 = vmul.f32 -1.442695, %v1239_v10 }
 0x122   : > { %2010 = vpow2.f32 %v1661_v11  ;;  %v1662_v15 = vmul.f32 -1.442695, %v1237_v14  ;;  %v1741_v16 = vpop.f32.mrb[20].mxu0  ;;  %v1853_v17 = vpop.f32.mrb[20].mxu1 }
 0x123   : > { %2012 = vpow2.f32 %v1664_v12  ;;  %v1028_v20 = vadd.f32 %v1853_v17, %v1731_v48  ;;  %v1742_v21 = vpop.f32.mrb[21].mxu0  ;;  %v1019_v22 = vpop.f32.mrb[21].mxu1 }
 0x124   : > { %2014 = vpow2.f32 %v1662_v15  ;;  %v1743_v23 = vadd.f32 %v1742_v21, %v1741_v16  ;;  %v1020_v24 = vadd.f32 %v1725_v36, %v1019_v22  ;;  %v1744_v18 = vpop.f32.mrb[22].mxu0  ;;  %v1854_v26 = vpop.f32.mrb[22].mxu1 }
 0x125   : > { %v1242_v27 = vadd.f32 %v2345_v58, %v1028_v20  ;;  %v1031_v28 = vadd.f32 %v1854_v26, %v1734_v54  ;;  %v1745_v29 = vpop.f32.mrb[23].mxu0  ;;  %v1022_v30 = vpop.f32.mrb[23].mxu1 }
 0x126   : > { %v1240_v32 = vadd.f32 %v2345_v58, %v1020_v24  ;;  %v1746_v33 = vadd.f32 %v1745_v29, %v1744_v18  ;;  %v1023_v34 = vadd.f32 %v1728_v42, %v1022_v30 }
 0x127   : > { %v1667_v35 = vmul.f32 -1.442695, %v1242_v27  ;;  %v1243_v38 = vadd.f32 %v2345_v58, %v1031_v28 }
 0x128   : > { %v1665_v39 = vmul.f32 -1.442695, %v1240_v32  ;;  %v1241_v40 = vadd.f32 %v2345_v58, %v1023_v34 }
 0x129   : > { %2016 = vpow2.f32 %v1667_v35  ;;  %v1668_v41 = vmul.f32 -1.442695, %v1243_v38 }
 0x12a   : > { %2018 = vpow2.f32 %v1665_v39  ;;  %v1666_v36 = vmul.f32 -1.442695, %v1241_v40  ;;  %v1747_v44 = vpop.f32.mrb[24].mxu0  ;;  %v1857_v45 = vpop.f32.mrb[24].mxu1 }
 0x12b   : > { %v2009_v46 = vpop.eup %2008  ;;  %2020 = vpow2.f32 %v1668_v41  ;;  %v1044_v47 = vadd.f32 %v1857_v45, %v1743_v23  ;;  %v1748_v48 = vpop.f32.mrb[25].mxu0 }
 0x12c   : > { %v1035_v50 = vpop.f32.mrb[25].mxu1  ;;  %v2011_v51 = vpop.eup %2010  ;;  %v1366_v52 = vadd.f32 1.0, %v2009_v46  ;;  %2022 = vpow2.f32 %v1666_v36  ;;  %v1749_v42 = vadd.f32 %v1748_v48, %v1747_v44 }
 0x12d   : > { %v1036_v53 = vadd.f32 %v1737_v62, %v1035_v50  ;;  %v1750_v54 = vpop.f32.mrb[26].mxu0  ;;  %v1858_v56 = vpop.f32.mrb[26].mxu1  ;;  %v1364_v59 = vadd.f32 1.0, %v2011_v51  ;;  %v1246_v60 = vadd.f32 %v2345_v58, %v1044_v47 }
 0x12e   : > { %v2013_v57 = vpop.eup %2012  ;;  %v1047_v61 = vadd.f32 %v1858_v56, %v1746_v33  ;;  %v1751_v63 = vpop.f32.mrb[27].mxu0  ;;  %2024 = vrcp.f32 %v1366_v52 }
 0x12f   : > { %v1038_v0 = vpop.f32.mrb[27].mxu1  ;;  %v2015_v1 = vpop.eup %2014  ;;  %v1367_v2 = vadd.f32 1.0, %v2013_v57  ;;  %v1244_v3 = vadd.f32 %v2345_v58, %v1036_v53  ;;  %v1752_v4 = vadd.f32 %v1751_v63, %v1750_v54  ;;  %2026 = vrcp.f32 %v1364_v59 }
 0x130   : > { %v1365_v5 = vadd.f32 1.0, %v2015_v1  ;;  %v1671_v6 = vmul.f32 -1.442695, %v1246_v60  ;;  %v1247_v62 = vadd.f32 %v2345_v58, %v1047_v61  ;;  %v1039_v9 = vadd.f32 %v2349_v7, %v1038_v0 }
 0x131   : > { %2028 = vrcp.f32 %v1367_v2  ;;  %v1669_v8 = vmul.f32 -1.442695, %v1244_v3 }
 0x132   : > { %2030 = vrcp.f32 %v1365_v5  ;;  %v1672_v10 = vmul.f32 -1.442695, %v1247_v62  ;;  %v1245_v11 = vadd.f32 %v2345_v58, %v1039_v9  ;;  %v1753_v14 = vpop.f32.mrb[28].mxu0  ;;  %v1861_v12 = vpop.f32.mrb[28].mxu1 }
 0x133   : > { %2032 = vpow2.f32 %v1671_v6  ;;  %v2017_v15 = vpop.eup %2016  ;;  %v1754_v16 = vpop.f32.mrb[29].mxu0 }
 0x134   : > { %2034 = vpow2.f32 %v1669_v8  ;;  %v1051_v17 = vpop.f32.mrb[29].mxu1  ;;  %v2019_v20 = vpop.eup %2018  ;;  %v1370_v21 = vadd.f32 1.0, %v2017_v15  ;;  %v1755_v22 = vadd.f32 %v1754_v16, %v1753_v14  ;;  %v1670_v26 = vmul.f32 -1.442695, %v1245_v11 }
 0x135   : > { %2036 = vpow2.f32 %v1672_v10  ;;  %v1756_v23 = vpop.f32.mrb[30].mxu0  ;;  %v1862_v24 = vpop.f32.mrb[30].mxu1  ;;  %v1368_v7 = vadd.f32 1.0, %v2019_v20  ;;  %v1052_v27 = vadd.f32 %v1749_v42, %v1051_v17 }
 0x136   : > { %v2021_v18 = vpop.eup %2020  ;;  %v1757_v28 = vpop.f32.mrb[31].mxu0  ;;  %2038 = vrcp.f32 %v1370_v21  ;;  %v1060_v33 = vadd.f32 %v1861_v12, %v1755_v22 }
 0x137   : > { %v1054_v29 = vpop.f32.mrb[31].mxu1  ;;  %v2023_v30 = vpop.eup %2022  ;;  %v1371_v32 = vadd.f32 1.0, %v2021_v18  ;;  %v1758_v34 = vadd.f32 %v1757_v28, %v1756_v23  ;;  %2040 = vrcp.f32 %v1368_v7  ;;  %v1248_v38 = vadd.f32 %v2345_v58, %v1052_v27 }
 0x138   : > { %v1369_v35 = vadd.f32 1.0, %v2023_v30  ;;  %v1055_v39 = vadd.f32 %v1752_v4, %v1054_v29  ;;  %v2025_v40 = vpop.eup %2024  ;;  %v1250_v41 = vadd.f32 %v2345_v58, %v1060_v33 }
 0x139   : > { %2042 = vrcp.f32 %v1371_v32  ;;  %v1063_v36 = vadd.f32 %v1862_v24, %v1758_v34  ;;  %v2027_v44 = vpop.eup %2026  ;;  %1462 = vst [vmem:[%s2366_s18 + $0x10] sm:$0xff] %v2025_v40  ;;  %v1673_v45 = vmul.f32 -1.442695, %v1248_v38 }
 0x13a   : > { %2044 = vrcp.f32 %v1369_v35  ;;  %v1249_v46 = vadd.f32 %v2345_v58, %v1055_v39  ;;  %1460 = vst [vmem:[%s2366_s18] sm:$0xff] %v2027_v44  ;;  %v1675_v48 = vmul.f32 -1.442695, %v1250_v41  ;;  %v1759_v51 = vpop.f32.mrb[32].mxu0  ;;  %v1865_v52 = vpop.f32.mrb[32].mxu1 }
 0x13b   : > { %v2029_v47 = vpop.eup %2028  ;;  %2046 = vpow2.f32 %v1670_v26  ;;  %v1251_v50 = vadd.f32 %v2345_v58, %v1063_v36  ;;  %v1760_v54 = vpop.f32.mrb[33].mxu0 }
 0x13c   : > { %v2031_v42 = vpop.eup %2030  ;;  %1463 = vst [vmem:[%s2366_s18 + $0x18] sm:$0xff] %v2029_v47  ;;  %2048 = vpow2.f32 %v1673_v45  ;;  %v1674_v53 = vmul.f32 -1.442695, %v1249_v46  ;;  %v1067_v56 = vpop.f32.mrb[33].mxu1  ;;  %v1761_v60 = vadd.f32 %v1760_v54, %v1759_v51 }
 0x13d   : > { %v2033_v57 = vpop.eup %2032  ;;  %1461 = vst [vmem:[%s2366_s18 + $0x8] sm:$0xff] %v2031_v42  ;;  %2050 = vpow2.f32 %v1675_v48  ;;  %v1676_v59 = vmul.f32 -1.442695, %v1251_v50  ;;  %v1762_v61 = vpop.f32.mrb[34].mxu0 }
 0x13e   : > { %v1866_v63 = vpop.f32.mrb[34].mxu1  ;;  %v2035_v0 = vpop.eup %2034  ;;  %v1374_v1 = vadd.f32 1.0, %v2033_v57  ;;  %2052 = vpow2.f32 %v1674_v53  ;;  %v1068_v6 = vadd.f32 %v1761_v60, %v1067_v56 }
 0x13f   : > { %v1763_v2 = vpop.f32.mrb[35].mxu0  ;;  %v1070_v3 = vpop.f32.mrb[35].mxu1  ;;  %v1372_v5 = vadd.f32 1.0, %v2035_v0  ;;  %2054 = vpow2.f32 %v1676_v59 }
 0x140   : > { %v2037_v4 = vpop.eup %2036  ;;  %v1764_v62 = vadd.f32 %v1763_v2, %v1762_v61  ;;  %2056 = vrcp.f32 %v1374_v1  ;;  %v1252_v10 = vadd.f32 %v2345_v58, %v1068_v6 }
 0x141   : > { %v1375_v8 = vadd.f32 1.0, %v2037_v4  ;;  %v2039_v9 = vpop.eup %2038  ;;  %2058 = vrcp.f32 %v1372_v5 }
 0x142   : > { %v1071_v11 = vadd.f32 %v1764_v62, %v1070_v3  ;;  %v2041_v14 = vpop.eup %2040  ;;  %1466 = vst [vmem:[%s2366_s18 + $0x30] sm:$0xff] %v2039_v9  ;;  %v1677_v15 = vmul.f32 -1.442695, %v1252_v10  ;;  %v1765_v17 = vpop.f32.mrb[36].mxu0 }
 0x143   : > { %2060 = vrcp.f32 %v1375_v8  ;;  %v2043_v12 = vpop.eup %2042  ;;  %1464 = vst [vmem:[%s2366_s18 + $0x20] sm:$0xff] %v2041_v14  ;;  %v2380_v20 = vpop.f32.mrb[36].mxu1 }
 0x144   : > { %v1253_v16 = vadd.f32 %v2345_v58, %v1071_v11  ;;  %v2045_v21 = vpop.eup %2044  ;;  %1467 = vst [vmem:[%s2366_s18 + $0x38] sm:$0xff] %v2043_v12  ;;  %v1766_v22 = vpop.f32.mrb[37].mxu0  ;;  %2062 = vpow2.f32 %v1677_v15 }
 0x145   : > { %v1083_v23 = vpop.f32.mrb[37].mxu1  ;;  %v2047_v24 = vpop.eup %2046  ;;  %1465 = vst [vmem:[%s2366_s18 + $0x28] sm:$0xff] %v2045_v21  ;;  %v1767_v7 = vadd.f32 %v1766_v22, %v1765_v17 }
 0x146   : > { %v1678_v18 = vmul.f32 -1.442695, %v1253_v16  ;;  %v1768_v26 = vpop.f32.mrb[38].mxu0  ;;  %v2384_v27 = vpop.f32.mrb[38].mxu1  ;;  %v1373_v29 = vadd.f32 1.0, %v2047_v24 }
 0x147   : > { %v2049_v28 = vpop.eup %2048  ;;  %v1769_v30 = vpop.f32.mrb[39].mxu0  ;;  %v1076_v35 = vadd.f32 %v1865_v52, %v1767_v7 }
 0x148   : > { %v1086_v32 = vpop.f32.mrb[39].mxu1  ;;  %v2051_v33 = vpop.eup %2050  ;;  %v1376_v34 = vadd.f32 1.0, %v2049_v28  ;;  %2064 = vpow2.f32 %v1678_v18  ;;  %v1770_v38 = vadd.f32 %v1769_v30, %v1768_v26 }
 0x149   : > { %v2053_v39 = vpop.eup %2052  ;;  %2066 = vrcp.f32 %v1373_v29  ;;  %v1378_v40 = vadd.f32 1.0, %v2051_v33  ;;  %v1254_v44 = vadd.f32 %v2345_v58, %v1076_v35 }
 0x14a   : > { %v2055_v41 = vpop.eup %2054  ;;  %2068 = vrcp.f32 %v1376_v34  ;;  %v1377_v36 = vadd.f32 1.0, %v2053_v39  ;;  %v1079_v45 = vadd.f32 %v1866_v63, %v1770_v38  ;;  %v1771_v52 = vpop.f32.mrb[40].mxu0 }
 0x14b   : > { %v2057_v46 = vpop.eup %2056  ;;  %2070 = vrcp.f32 %v1378_v40  ;;  %v1379_v47 = vadd.f32 1.0, %v2055_v41  ;;  %v1679_v50 = vmul.f32 -1.442695, %v1254_v44  ;;  %v1873_v42 = vpop.f32.mrb[40].mxu1 }
 0x14c   : > { %v2059_v48 = vpop.eup %2058  ;;  %1470 = vst [vmem:[%s2366_s18 + $0x50] sm:$0xff] %v2057_v46  ;;  %2072 = vrcp.f32 %v1377_v36  ;;  %v1255_v51 = vadd.f32 %v2345_v58, %v1079_v45  ;;  %v1108_v54 = vadd.f32 %v1873_v42, %v2330_v25  ;;  %v1772_v56 = vpop.f32.mrb[41].mxu0 }
 0x14d   : > { %v2061_v53 = vpop.eup %2060  ;;  %1468 = vst [vmem:[%s2366_s18 + $0x40] sm:$0xff] %v2059_v48  ;;  %2074 = vrcp.f32 %v1379_v47  ;;  %v1099_v57 = vpop.f32.mrb[41].mxu1  ;;  %v1773_v60 = vadd.f32 %v1772_v56, %v1771_v52 }
 0x14e   : > { %1471 = vst [vmem:[%s2366_s18 + $0x58] sm:$0xff] %v2061_v53  ;;  %2076 = vpow2.f32 %v1679_v50  ;;  %v1680_v59 = vmul.f32 -1.442695, %v1255_v51  ;;  %v1100_v61 = vadd.f32 %v2326_v13, %v1099_v57  ;;  %v1774_v63 = vpop.f32.mrb[42].mxu0  ;;  %v1874_v0 = vpop.f32.mrb[42].mxu1  ;;  %v1262_v1 = vadd.f32 %v2345_v58, %v1108_v54 }
 0x14f   : > { %v1111_v2 = vadd.f32 %v1874_v0, %v2332_v31  ;;  %v1775_v3 = vpop.f32.mrb[43].mxu0  ;;  %v1102_v4 = vpop.f32.mrb[43].mxu1  ;;  %v1084_v6 = vadd.f32 %v1773_v60, %v1083_v23 }
 0x150   : > { %v2063_v5 = vpop.eup %2062  ;;  %2078 = vpow2.f32 %v1680_v59  ;;  %v1260_v25 = vadd.f32 %v2345_v58, %v1100_v61  ;;  %v1776_v62 = vadd.f32 %v1775_v3, %v1774_v63  ;;  %v1687_v9 = vmul.f32 -1.442695, %v1262_v1 }
 0x151   : > { %v1380_v8 = vadd.f32 1.0, %v2063_v5  ;;  %v1263_v10 = vadd.f32 %v2345_v58, %v1111_v2  ;;  %v1103_v13 = vadd.f32 %v2328_v19, %v1102_v4  ;;  %v1256_v14 = vadd.f32 %v2345_v58, %v1084_v6 }
 0x152   : > { %v2065_v11 = vpop.eup %2064  ;;  %v1087_v31 = vadd.f32 %v1776_v62, %v1086_v32  ;;  %v1685_v16 = vmul.f32 -1.442695, %v1260_v25  ;;  %v1777_v19 = vpop.f32.mrb[44].mxu0 }
 0x153   : > { %v2067_v12 = vpop.eup %2066  ;;  %2080 = vrcp.f32 %v1380_v8  ;;  %v1381_v15 = vadd.f32 1.0, %v2065_v11  ;;  %v1261_v17 = vadd.f32 %v2345_v58, %v1103_v13  ;;  %v1681_v22 = vmul.f32 -1.442695, %v1256_v14  ;;  %v1877_v18 = vpop.f32.mrb[44].mxu1 }
 0x154   : > { %v2069_v21 = vpop.eup %2068  ;;  %1469 = vst [vmem:[%s2366_s18 + $0x48] sm:$0xff] %v2067_v12  ;;  %2082 = vpow2.f32 %v1687_v9  ;;  %v1688_v23 = vmul.f32 -1.442695, %v1263_v10  ;;  %v1257_v24 = vadd.f32 %v2345_v58, %v1087_v31  ;;  %v1124_v28 = vadd.f32 %v1877_v18, %v2338_v49  ;;  %v1778_v29 = vpop.f32.mrb[45].mxu0 }
 0x155   : > { %v2071_v7 = vpop.eup %2070  ;;  %1472 = vst [vmem:[%s2366_s18 + $0x60] sm:$0xff] %v2069_v21  ;;  %2084 = vrcp.f32 %v1381_v15  ;;  %v1686_v26 = vmul.f32 -1.442695, %v1261_v17  ;;  %v1115_v30 = vpop.f32.mrb[45].mxu1  ;;  %v1779_v34 = vadd.f32 %v1778_v29, %v1777_v19 }
 0x156   : > { %v2073_v32 = vpop.eup %2072  ;;  %1474 = vst [vmem:[%s2366_s18 + $0x70] sm:$0xff] %v2071_v7  ;;  %2086 = vpow2.f32 %v1681_v22  ;;  %v1682_v33 = vmul.f32 -1.442695, %v1257_v24  ;;  %v1116_v35 = vadd.f32 %v2334_v37, %v1115_v30  ;;  %v1780_v38 = vpop.f32.mrb[46].mxu0  ;;  %v1266_v41 = vadd.f32 %v2345_v58, %v1124_v28 }
 0x157   : > { %v1878_v39 = vpop.f32.mrb[46].mxu1  ;;  %v2075_v40 = vpop.eup %2074  ;;  %1473 = vst [vmem:[%s2366_s18 + $0x68] sm:$0xff] %v2073_v32  ;;  %2088 = vpow2.f32 %v1685_v16  ;;  %v1092_v46 = vadd.f32 %v2380_v20, %v1779_v34 }
 0x158   : > { %v1127_v36 = vadd.f32 %v1878_v39, %v2340_v55  ;;  %v1781_v49 = vpop.f32.mrb[47].mxu0  ;;  %v1118_v44 = vpop.f32.mrb[47].mxu1  ;;  %1475 = vst [vmem:[%s2366_s18 + $0x78] sm:$0xff] %v2075_v40  ;;  %2090 = vpow2.f32 %v1688_v23  ;;  %v1264_v47 = vadd.f32 %v2345_v58, %v1116_v35  ;;  %v1691_v50 = vmul.f32 -1.442695, %v1266_v41 }
 0x159   : > { %v2077_v45 = vpop.eup %2076  ;;  %v1782_v48 = vadd.f32 %v1781_v49, %v1780_v38  ;;  %2092 = vpow2.f32 %v1682_v33  ;;  %v1258_v55 = vadd.f32 %v2345_v58, %v1092_v46  ;;  %v1119_v20 = vadd.f32 %v2336_v43, %v1118_v44 }
 0x15a   : > { %v1382_v37 = vadd.f32 1.0, %v2077_v45  ;;  %v1267_v51 = vadd.f32 %v2345_v58, %v1127_v36  ;;  %v2079_v52 = vpop.eup %2078  ;;  %2094 = vpow2.f32 %v1686_v26  ;;  %v1689_v54 = vmul.f32 -1.442695, %v1264_v47 }
 0x15b   : > { %v1095_v42 = vadd.f32 %v2384_v27, %v1782_v48  ;;  %v1383_v53 = vadd.f32 1.0, %v2079_v52  ;;  %v1683_v56 = vmul.f32 -1.442695, %v1258_v55  ;;  %v1265_v61 = vadd.f32 %v2345_v58, %v1119_v20 }
 0x15c   : > { %2096 = vrcp.f32 %v1382_v37  ;;  %v1692_v57 = vmul.f32 -1.442695, %v1267_v51 }
 0x15d   : > { %2098 = vpow2.f32 %v1691_v50  ;;  %v1259_v59 = vadd.f32 %v2345_v58, %v1095_v42  ;;  %v2081_v60 = vpop.eup %2080  ;;  %v1690_v8 = vmul.f32 -1.442695, %v1265_v61 }
 0x15e   : > { %2100 = vrcp.f32 %v1383_v53  ;;  %v2083_v63 = vpop.eup %2082  ;;  %1476 = vst [vmem:[%s2366_s18 + $0x80] sm:$0xff] %v2081_v60 }
 0x15f   : > { %2102 = vpow2.f32 %v1683_v56  ;;  %v1684_v0 = vmul.f32 -1.442695, %v1259_v59  ;;  %v2085_v27 = vpop.eup %2084  ;;  %v1390_v1 = vadd.f32 1.0, %v2083_v63 }
 0x160   : > { %2104 = vpow2.f32 %v1689_v54  ;;  %v2087_v2 = vpop.eup %2086  ;;  %1477 = vst [vmem:[%s2366_s18 + $0x88] sm:$0xff] %v2085_v27 }
 0x161   : > { %2106 = vpow2.f32 %v1692_v57  ;;  %v2089_v43 = vpop.eup %2088  ;;  %v1384_v3 = vadd.f32 1.0, %v2087_v2 }
 0x162   : > { %2108 = vrcp.f32 %v1390_v1  ;;  %v2091_v4 = vpop.eup %2090  ;;  %v1388_v5 = vadd.f32 1.0, %v2089_v43 }
 0x163   : > { %2110 = vpow2.f32 %v1684_v0  ;;  %v2093_v6 = vpop.eup %2092  ;;  %v1391_v58 = vadd.f32 1.0, %v2091_v4 }
 0x164   : > { %2112 = vrcp.f32 %v1384_v3  ;;  %v2095_v25 = vpop.eup %2094  ;;  %v1385_v62 = vadd.f32 1.0, %v2093_v6 }
 0x165   : > { %2114 = vrcp.f32 %v1388_v5  ;;  %v1389_v10 = vadd.f32 1.0, %v2095_v25 }
 0x166   : > { %v2097_v9 = vpop.eup %2096  ;;  %2116 = vrcp.f32 %v1391_v58 }
 0x167   : > { %v2099_v13 = vpop.eup %2098  ;;  %1478 = vst [vmem:[%s2366_s18 + $0x90] sm:$0xff] %v2097_v9  ;;  %2118 = vrcp.f32 %v1385_v62 }
 0x168   : > { %v2101_v11 = vpop.eup %2100  ;;  %2120 = vrcp.f32 %v1389_v10  ;;  %v1394_v14 = vadd.f32 1.0, %v2099_v13 }
 0x169   : > { %v2103_v31 = vpop.eup %2102  ;;  %1479 = vst [vmem:[%s2366_s18 + $0x98] sm:$0xff] %v2101_v11  ;;  %2122 = vpow2.f32 %v1690_v8 }
 0x16a   : > { %v2105_v12 = vpop.eup %2104  ;;  %2124 = vrcp.f32 %v1394_v14  ;;  %v1386_v15 = vadd.f32 1.0, %v2103_v31 }
 0x16b   : > { %v2107_v16 = vpop.eup %2106  ;;  %v1392_v17 = vadd.f32 1.0, %v2105_v12 }
 0x16c   : > { %v2109_v21 = vpop.eup %2108  ;;  %2126 = vrcp.f32 %v1386_v15  ;;  %v1395_v22 = vadd.f32 1.0, %v2107_v16 }
 0x16d   : > { %v2111_v23 = vpop.eup %2110  ;;  %1486 = vst [vmem:[%s2366_s18 + $0xd0] sm:$0xff] %v2109_v21  ;;  %2128 = vrcp.f32 %v1392_v17 }
 0x16e   : > { %v2113_v24 = vpop.eup %2112  ;;  %2130 = vrcp.f32 %v1395_v22  ;;  %v1387_v19 = vadd.f32 1.0, %v2111_v23 }
 0x16f   : > { %v2115_v18 = vpop.eup %2114  ;;  %1480 = vst [vmem:[%s2366_s18 + $0xa0] sm:$0xff] %v2113_v24 }
 0x170   : > { %v2117_v7 = vpop.eup %2116  ;;  %1484 = vst [vmem:[%s2366_s18 + $0xc0] sm:$0xff] %v2115_v18  ;;  %2132 = vrcp.f32 %v1387_v19 }
 0x171   : > { %v2119_v26 = vpop.eup %2118  ;;  %1487 = vst [vmem:[%s2366_s18 + $0xd8] sm:$0xff] %v2117_v7 }
 0x172   : > { %v2121_v28 = vpop.eup %2120  ;;  %1481 = vst [vmem:[%s2366_s18 + $0xa8] sm:$0xff] %v2119_v26 }
 0x173   : > { %v2123_v29 = vpop.eup %2122  ;;  %1485 = vst [vmem:[%s2366_s18 + $0xc8] sm:$0xff] %v2121_v28 }
 0x174   : > { %v2125_v30 = vpop.eup %2124  ;;  %v1393_v32 = vadd.f32 1.0, %v2123_v29 }
 0x175   : > { %1490 = vst [vmem:[%s2366_s18 + $0xf0] sm:$0xff] %v2125_v30 }
 0x176   : > { %v2127_v33 = vpop.eup %2126  ;;  %2134 = vrcp.f32 %v1393_v32 }
 0x177   : > { %v2129_v34 = vpop.eup %2128  ;;  %1482 = vst [vmem:[%s2366_s18 + $0xb0] sm:$0xff] %v2127_v33 }
 0x178   : > { %v2131_v35 = vpop.eup %2130  ;;  %1488 = vst [vmem:[%s2366_s18 + $0xe0] sm:$0xff] %v2129_v34 }
 0x179   : > { %1491 = vst [vmem:[%s2366_s18 + $0xf8] sm:$0xff] %v2131_v35 }
 0x17a   : > { %v2133_v38 = vpop.eup %2132 }
 0x17b   : > { %1483 = vst [vmem:[%s2366_s18 + $0xb8] sm:$0xff] %v2133_v38 }
 0x180   : > { %v2135_v39 = vpop.eup %2134 }
 0x181   : > { %1489 = vst [vmem:[%s2366_s18 + $0xe8] sm:$0xff] %v2135_v39 }
 0x182 PF: > { %s13_s14 = sadd.s32 1, %s2158_s14   ;;  %s2447_s12 = smov %s2154_s13 }
 0x183   : > { %p10_p5 = scmp.ge.s32.totalorder %s13_s14, 9   ;;  %s2448_s13 = smov %s2450_s15 }
 0x185   :  { %12 = sbr.rel (!%p10_p5) target bundleno = 2 (0x2), region = 73 }

</bundles_post_ra>
